<compile_context>
chip_gen: v7x
topology: tpu7x:2x2x1
jax: 0.10.0
libtpu: 0.0.40
codegen_flags: <defaults>
</compile_context>

<pallas_src>
import functools

import jax
import jax.numpy as jnp
from jax.experimental import pallas as pl
from jax.experimental.pallas import tpu as pltpu


# ---------------------------------------------------------------------------
# helpers
# ---------------------------------------------------------------------------
def _round_up(x, m):
    return (x + m - 1) // m * m


def _fit_tile(n, target, step):
    """Largest multiple of `step` that divides `n` and is <= target (fallback n)."""
    t = min(target, n)
    t -= t % step
    while t >= step:
        if n % t == 0:
            return t
        t -= step
    return n


def _rmsnorm(v, g):
    var = jnp.mean(v * v, axis=-1, keepdims=True)
    return v * jax.lax.rsqrt(var + 1e-6) * g


def _pick_vmem_limit():
    """Generation-dependent scoped-VMEM cap (~48 MiB v7x, ~96 MiB v5e/v6e)."""
    try:
        cap = int(pltpu.get_tpu_info().vmem_capacity_bytes)
    except Exception:
        cap = 64 * 1024 * 1024
    return int(min(max(cap * 3 // 4, 32 * 1024 * 1024), 100 * 1024 * 1024))


_VMEM_LIMIT = _pick_vmem_limit()


# -- probe whether single-buffered constant blocks (pl.Buffered(1)) lower ----
def _probe_buffered_kernel(x_ref, w_ref, o_ref):
    o_ref[...] = x_ref[...] + w_ref[...]


def _buffered1_supported():
    try:
        w_spec = pl.BlockSpec((8, 128), lambda i: (0, 0),
                              pipeline_mode=pl.Buffered(1))
        f = pl.pallas_call(
            _probe_buffered_kernel,
            grid=(2,),
            in_specs=[pl.BlockSpec((8, 128), lambda i: (i, 0)), w_spec],
            out_specs=pl.BlockSpec((8, 128), lambda i: (i, 0)),
            out_shape=jax.ShapeDtypeStruct((16, 128), jnp.float32),
        )
        jax.block_until_ready(f(jnp.zeros((16, 128), jnp.float32),
                                jnp.ones((8, 128), jnp.float32)))
        return True
    except Exception:
        return False


_BUFFERED1_OK = _buffered1_supported()


def _const_spec(shape, grid_ndim):
    """Constant-index block; single-buffered when supported (VMEM saving)."""
    if grid_ndim == 1:
        idx = lambda i: (0,) * len(shape)
    elif grid_ndim == 2:
        idx = lambda i, j: (0,) * len(shape)
    else:
        idx = lambda i, j, k: (0,) * len(shape)
    if _BUFFERED1_OK:
        return pl.BlockSpec(shape, idx, pipeline_mode=pl.Buffered(1))
    return pl.BlockSpec(shape, idx)


# ---------------------------------------------------------------------------
# Kernel 1: PointCloudProjector MLP  (pos_enc=False -> in_dim = 3)
# ---------------------------------------------------------------------------
def projector_kernel(x_ref, w1_ref, b1_ref, w2_ref, b2_ref, w3_ref, b3_ref,
                     out_ref):
    x = x_ref[...]                               # (tm, 3) f32
    w1 = w1_ref[...]                             # (3, 128) f32
    # Layer 1 (K=3) on the VPU as broadcast FMAs (a K=3 MXU matmul wastes
    # ~125/128 of the systolic K depth).
    h1 = (x[:, 0:1] * w1[0:1, :] + x[:, 1:2] * w1[1:2, :]
          + x[:, 2:3] * w1[2:3, :] + b1_ref[...])
    h1 = jnp.maximum(h1, 0.0)
    # Layers 2-3: bf16 MXU matmuls, f32 accumulation.
    h2 = jnp.dot(h1.astype(jnp.bfloat16), w2_ref[...],
                 preferred_element_type=jnp.float32) + b2_ref[...]
    h2 = jnp.maximum(h2, 0.0)
    out_ref[...] = jnp.dot(h2.astype(jnp.bfloat16), w3_ref[...],
                           preferred_element_type=jnp.float32) + b3_ref[...]


def run_projector(points, proj_params, *, tm=512):
    """points: (B, N_pts, 3) -> (B, N_pts, E), row-tiled + pipelined."""
    B, N, _ = points.shape
    E = proj_params["w3"].shape[1]
    M = B * N
    x = points.reshape(M, 3)

    tm = max(8, min(tm, _round_up(M, 8)))
    tm -= tm % 8
    M_pad = _round_up(M, tm)
    if M_pad != M:
        x = jnp.pad(x, ((0, M_pad - M), (0, 0)))

    out = pl.pallas_call(
        projector_kernel,
        grid=(M_pad // tm,),
        in_specs=[
            pl.BlockSpec((tm, 3), lambda i: (i, 0)),
            _const_spec((3, 128), 1),
            _const_spec((1, 128), 1),
            _const_spec((128, 512), 1),
            _const_spec((1, 512), 1),
            _const_spec((512, E), 1),
            _const_spec((1, E), 1),
        ],
        out_specs=pl.BlockSpec((tm, E), lambda i: (i, 0)),
        out_shape=jax.ShapeDtypeStruct((M_pad, E), jnp.float32),
        compiler_params=pltpu.CompilerParams(
            dimension_semantics=("parallel",),
            vmem_limit_bytes=_VMEM_LIMIT),
    )(x, proj_params["w1"], proj_params["b1"],
      proj_params["w2"], proj_params["b2"],
      proj_params["w3"], proj_params["b3"])
    return out[:M].reshape(B, N, E)


# ---------------------------------------------------------------------------
# Kernel 2: fused pre-RMSNorm + Q/K/V projection (bf16 outputs, computed once)
# ---------------------------------------------------------------------------
def qkv_kernel(x_ref, g1_ref, wq_ref, wk_ref, wv_ref, q_ref, k_ref, v_ref, *,
               scale):
    bf16 = jnp.bfloat16
    h = _rmsnorm(x_ref[...], g1_ref[...]).astype(bf16)
    q = jnp.dot(h, wq_ref[...], preferred_element_type=jnp.float32) * scale
    q_ref[...] = q.astype(bf16)                  # scale folded in before cast
    k_ref[...] = jnp.dot(h, wk_ref[...],
                         preferred_element_type=jnp.float32).astype(bf16)
    v_ref[...] = jnp.dot(h, wv_ref[...],
                         preferred_element_type=jnp.float32).astype(bf16)


# ---------------------------------------------------------------------------
# Kernel 3: causal self-attention (flash / online-softmax over precomputed KV)
# ---------------------------------------------------------------------------
def attention_kernel(x_ref, q_ref, k_ref, v_ref, wo_ref, out_ref,
                     m_sc, l_sc, acc_sc):
    qi = pl.program_id(1)
    kv = pl.program_id(2)
    n_kv = pl.num_programs(2)
    bf16 = jnp.bfloat16
    tq = q_ref.shape[1]
    tkv = k_ref.shape[1]

    @pl.when(kv == 0)
    def _():
        m_sc[...] = jnp.full(m_sc.shape, -jnp.inf, jnp.float32)
        l_sc[...] = jnp.zeros(l_sc.shape, jnp.float32)
        acc_sc[...] = jnp.zeros(acc_sc.shape, jnp.float32)

    def _step(apply_mask):
        kb = k_ref[0]                            # (tkv, E) bf16, precomputed
        vb = v_ref[0]                            # (tkv, E) bf16, precomputed
        # contract the E axes directly (no explicit transpose / vxpose)
        s = jax.lax.dot_general(q_ref[0], kb, (((1,), (1,)), ((), ())),
                                preferred_element_type=jnp.float32)
        if apply_mask:                           # diagonal tile only (tq == tkv)
            row = jax.lax.broadcasted_iota(jnp.int32, (tq, tkv), 0)
            col = jax.lax.broadcasted_iota(jnp.int32, (tq, tkv), 1)
            s = jnp.where(col <= row, s, -1e30)
        m_prev = m_sc[...]
        m_new = jnp.maximum(m_prev, jnp.max(s, axis=-1, keepdims=True))
        alpha = jnp.exp(m_prev - m_new)
        p = jnp.exp(s - m_new)
        l_sc[...] = alpha * l_sc[...] + jnp.sum(p, axis=-1, keepdims=True)
        acc_sc[...] = alpha * acc_sc[...] + jnp.dot(
            p.astype(bf16), vb, preferred_element_type=jnp.float32)
        m_sc[...] = m_new

    @pl.when(kv < qi)        # fully-visible tile: no mask work
    def _():
        _step(False)

    @pl.when(kv == qi)       # diagonal tile: intra-tile causal mask
    def _():
        _step(True)

    # kv > qi : fully-masked upper-triangle tile -> all compute skipped

    @pl.when(kv == n_kv - 1)
    def _():
        attn = acc_sc[...] * pl.reciprocal(l_sc[...], approx=True)
        out_ref[0] = x_ref[0] + jnp.dot(attn.astype(bf16), wo_ref[...],
                                        preferred_element_type=jnp.float32)


# ---------------------------------------------------------------------------
# Kernel 4: FFN (pre-RMSNorm, ReLU MLP), hidden dim K-tiled with accumulator
# ---------------------------------------------------------------------------
def ffn_kernel(x_ref, g2_ref, w1f_ref, b1f_ref, w2f_ref, b2f_ref,
               out_ref, h_sc, acc_sc):
    hi = pl.program_id(1)
    n_h = pl.num_programs(1)
    bf16 = jnp.bfloat16

    @pl.when(hi == 0)
    def _():
        x = x_ref[...]
        acc_sc[...] = x + b2f_ref[...]               # residual + out bias, once
        h_sc[...] = _rmsnorm(x, g2_ref[...]).astype(bf16)

    f = jnp.dot(h_sc[...], w1f_ref[...],
                preferred_element_type=jnp.float32) + b1f_ref[...]
    f = jnp.maximum(f, 0.0)
    acc_sc[...] += jnp.dot(f.astype(bf16), w2f_ref[...],
                           preferred_element_type=jnp.float32)

    @pl.when(hi == n_h - 1)
    def _():
        out_ref[...] = acc_sc[...]


# ---------------------------------------------------------------------------
# Kernel 5: LM head, vocab-tiled, weight block resident across row tiles
# ---------------------------------------------------------------------------
def lm_head_kernel(x_ref, wlm_ref, out_ref):
    out_ref[...] = jnp.dot(x_ref[...].astype(jnp.bfloat16), wlm_ref[...],
                           preferred_element_type=jnp.float32)


# ---------------------------------------------------------------------------
# Decoder wrapper
# ---------------------------------------------------------------------------
def run_decoder(inputs_embeds, dec_params, *, t_seq=256, tr=256, tv=1024,
                th=1024):
    """inputs_embeds: (B, S, E) -> logits (B, S, V)."""
    B, S, E = inputs_embeds.shape
    V = dec_params["wlm"].shape[1]
    H = dec_params["w1f"].shape[1]

    # --- tile / padding setup (16-row granularity: bf16 sublane tile) -------
    t_seq = max(16, min(t_seq, _round_up(S, 16)))
    t_seq -= t_seq % 16
    S_pad = _round_up(S, t_seq)
    ns = S_pad // t_seq

    x = inputs_embeds
    if S_pad != S:
        # padded rows only attend causally to real keys and are sliced off
        x = jnp.pad(x, ((0, 0), (0, S_pad - S), (0, 0)))

    M = B * S_pad
    tr = _fit_tile(M, max(16, tr - tr % 16), 16)
    nr = M // tr

    # pad vocab / hidden to the tile size instead of degrading the tile
    tv = max(128, min(tv - tv % 128, _round_up(V, 128)))
    V_pad = _round_up(V, tv)
    nv = V_pad // tv
    wlm = dec_params["wlm"]
    if V_pad != V:
        # TODO(synk): pad weights once at parameter-load time, not per forward.
        wlm = jnp.pad(wlm, ((0, 0), (0, V_pad - V)))

    th = max(128, min(th - th % 128, _round_up(H, 128)))
    H_pad = _round_up(H, th)
    nh = H_pad // th
    w1f, b1f, w2f = dec_params["w1f"], dec_params["b1f"], dec_params["w2f"]
    if H_pad != H:
        w1f = jnp.pad(w1f, ((0, 0), (0, H_pad - H)))
        b1f = jnp.pad(b1f, ((0, 0), (0, H_pad - H)))
        w2f = jnp.pad(w2f, ((0, H_pad - H), (0, 0)))

    cp1 = pltpu.CompilerParams(dimension_semantics=("parallel",),
                               vmem_limit_bytes=_VMEM_LIMIT)
    cp2_arb = pltpu.CompilerParams(dimension_semantics=("parallel", "arbitrary"),
                                   vmem_limit_bytes=_VMEM_LIMIT)
    cp2_par = pltpu.CompilerParams(dimension_semantics=("parallel", "parallel"),
                                   vmem_limit_bytes=_VMEM_LIMIT)
    cp3 = pltpu.CompilerParams(
        dimension_semantics=("parallel", "parallel", "arbitrary"),
        vmem_limit_bytes=_VMEM_LIMIT)

    # --- QKV projection (once per token, bf16 outputs) -----------------------
    x_flat = x.reshape(M, E)
    scale = 1.0 / (float(E) ** 0.5)   # single-head layer -> head_dim == E
    q, k, v = pl.pallas_call(
        functools.partial(qkv_kernel, scale=scale),
        grid=(nr,),
        in_specs=[
            pl.BlockSpec((tr, E), lambda r: (r, 0)),
            _const_spec((1, E), 1),
            _const_spec((E, E), 1),
            _const_spec((E, E), 1),
            _const_spec((E, E), 1),
        ],
        out_specs=(pl.BlockSpec((tr, E), lambda r: (r, 0)),) * 3,
        out_shape=(jax.ShapeDtypeStruct((M, E), jnp.bfloat16),) * 3,
        compiler_params=cp1,
    )(x_flat, dec_params["g1"], dec_params["wq"], dec_params["wk"],
      dec_params["wv"])
    q = q.reshape(B, S_pad, E)
    k = k.reshape(B, S_pad, E)
    v = v.reshape(B, S_pad, E)

    # --- attention: grid (B, q_tiles, kv_tiles), flash accumulation ---------
    h1 = pl.pallas_call(
        attention_kernel,
        grid=(B, ns, ns),
        in_specs=[
            pl.BlockSpec((1, t_seq, E), lambda b, qi, ki: (b, qi, 0)),   # x
            pl.BlockSpec((1, t_seq, E), lambda b, qi, ki: (b, qi, 0)),   # q
            pl.BlockSpec((1, t_seq, E), lambda b, qi, ki: (b, ki, 0)),   # k
            pl.BlockSpec((1, t_seq, E), lambda b, qi, ki: (b, ki, 0)),   # v
            _const_spec((E, E), 3),                                      # wo
        ],
        out_specs=pl.BlockSpec((1, t_seq, E), lambda b, qi, ki: (b, qi, 0)),
        out_shape=jax.ShapeDtypeStruct((B, S_pad, E), jnp.float32),
        scratch_shapes=[
            pltpu.VMEM((t_seq, 1), jnp.float32),   # running max
            pltpu.VMEM((t_seq, 1), jnp.float32),   # running denom
            pltpu.VMEM((t_seq, E), jnp.float32),   # un-normalised output acc
        ],
        compiler_params=cp3,
    )(x, q, k, v, dec_params["wo"])

    # --- FFN: flattened rows, grid (row_tiles, hidden_tiles) ----------------
    h2 = pl.pallas_call(
        ffn_kernel,
        grid=(nr, nh),
        in_specs=[
            pl.BlockSpec((tr, E), lambda r, hi: (r, 0)),
            _const_spec((1, E), 2),                           # g2
            pl.BlockSpec((E, th), lambda r, hi: (0, hi)),     # w1f
            pl.BlockSpec((1, th), lambda r, hi: (0, hi)),     # b1f
            pl.BlockSpec((th, E), lambda r, hi: (hi, 0)),     # w2f
            _const_spec((1, E), 2),                           # b2f
        ],
        out_specs=pl.BlockSpec((tr, E), lambda r, hi: (r, 0)),
        out_shape=jax.ShapeDtypeStruct((M, E), jnp.float32),
        scratch_shapes=[
            pltpu.VMEM((tr, E), jnp.bfloat16),   # normed input (bf16, reused)
            pltpu.VMEM((tr, E), jnp.float32),    # residual + accumulator
        ],
        compiler_params=cp2_arb,
    )(h1.reshape(M, E), dec_params["g2"], w1f, b1f, w2f, dec_params["b2f"])

    # --- LM head: vocab-outer grid keeps the (E, tv) weight block resident ---
    # TODO(synk): fuse cross-entropy (online logsumexp + label gather) into this
    # vocab-tiled loop when only the loss is needed; logits are returned here.
    # TODO(synk): on v7x, fp8 wlm/w1f/w2f would halve weight HBM/VMEM traffic.
    logits = pl.pallas_call(
        lm_head_kernel,
        grid=(nv, nr),
        in_specs=[
            pl.BlockSpec((tr, E), lambda vj, r: (r, 0)),
            pl.BlockSpec((E, tv), lambda vj, r: (0, vj)),
        ],
        out_specs=pl.BlockSpec((tr, tv), lambda vj, r: (r, vj)),
        out_shape=jax.ShapeDtypeStruct((M, V_pad), jnp.float32),
        compiler_params=cp2_par,
    )(h2, wlm)

    return logits.reshape(B, S_pad, V_pad)[:, :S, :V]


# ---------------------------------------------------------------------------
# Parameter init (bf16 matmul weights, f32 biases/gains, dims lane-aligned)
# ---------------------------------------------------------------------------
def init_params(key, embed_dim, vocab_size):
    assert embed_dim % 128 == 0, "pad embed dim to a multiple of 128 (lane width)"
    assert vocab_size % 128 == 0, "pad vocab to a multiple of 128 (lane width)"
    ks = jax.random.split(key, 16)
    bf16 = jnp.bfloat16
    sp, sd = 0.02, 0.1
    E, V, H = embed_dim, vocab_size, 4 * embed_dim
    proj = dict(
        w1=jax.random.normal(ks[0], (3, 128), jnp.float32) * sp,   # f32 (VPU layer)
        b1=jnp.zeros((1, 128), jnp.float32),
        w2=(jax.random.normal(ks[1], (128, 512), jnp.float32) * sp).astype(bf16),
        b2=jnp.zeros((1, 512), jnp.float32),
        w3=(jax.random.normal(ks[2], (512, E), jnp.float32) * sp).astype(bf16),
        b3=jnp.zeros((1, E), jnp.float32),
    )
    dec = dict(
        embed=jax.random.normal(ks[3], (V, E), jnp.float32) * sd,  # f32 gather table
        wq=(jax.random.normal(ks[4], (E, E), jnp.float32) * sd).astype(bf16),
        wk=(jax.random.normal(ks[5], (E, E), jnp.float32) * sd).astype(bf16),
        wv=(jax.random.normal(ks[6], (E, E), jnp.float32) * sd).astype(bf16),
        wo=(jax.random.normal(ks[7], (E, E), jnp.float32) * sd).astype(bf16),
        g1=jnp.ones((1, E), jnp.float32),
        w1f=(jax.random.normal(ks[8], (E, H), jnp.float32) * sd).astype(bf16),
        b1f=jnp.zeros((1, H), jnp.float32),
        w2f=(jax.random.normal(ks[9], (H, E), jnp.float32) * sd).astype(bf16),
        b2f=jnp.zeros((1, E), jnp.float32),
        g2=jnp.ones((1, E), jnp.float32),
        wlm=(jax.random.normal(ks[10], (E, V), jnp.float32) * sd).astype(bf16),
    )
    return proj, dec


# ---------------------------------------------------------------------------
# Forward (mirrors CADRecodeModel.forward for tensor `code` / `labels`)
# ---------------------------------------------------------------------------
@functools.partial(jax.jit, static_argnames=("t_seq", "tr", "tv", "th", "tm"))
def cad_recode_forward(points, input_ids, label_ids, proj_params, dec_params,
                       *, t_seq=256, tr=256, tv=1024, th=1024, tm=512):
    """Returns (loss, logits, attention_mask, new_labels)."""
    B, N_pts, _ = points.shape

    # 1) point-cloud prefix tokens (Pallas projector kernel)
    pt_tokens = run_projector(points, proj_params, tm=tm)            # (B, N_pts, E)

    # 2) text token embeddings (gather — plain-JAX glue)
    # TODO(synk): HF tokenizer path for `code: list[str]` is host-side string
    # processing with no Pallas equivalent; tensor input_ids are used instead.
    txt_embeds = dec_params["embed"][input_ids]                      # (B, T, E)

    # 3) concat prefix + text, build attention mask
    inputs_embeds = jnp.concatenate([pt_tokens, txt_embeds], axis=1)  # (B, S, E)
    seq_len = inputs_embeds.shape[1]
    attention_mask = jnp.ones((B, seq_len), dtype=jnp.int32)

    # 4) labels: -100 padding over the point-token prefix
    pad = jnp.full((B, N_pts), -100, dtype=jnp.int32)
    new_labels = jnp.concatenate([pad, label_ids], axis=1)           # (B, S)

    # 5) synthetic causal decoder + LM head (Pallas kernels)
    # TODO(synk): residual-stream activations kept f32 for validation fidelity;
    # bf16 would halve inter-kernel HBM traffic (largest win on v5e).
    logits = run_decoder(inputs_embeds, dec_params,
                         t_seq=t_seq, tr=tr, tv=tv, th=th)

    # 6) HF-style causal-LM loss (shift, ignore_index=-100) — glue
    shift_logits = logits[:, :-1, :]
    shift_labels = new_labels[:, 1:]
    valid = shift_labels != -100
    safe_labels = jnp.where(valid, shift_labels, 0)
    logp = jax.nn.log_softmax(shift_logits, axis=-1)
    nll = -jnp.take_along_axis(logp, safe_labels[..., None], axis=-1)[..., 0]
    loss = jnp.sum(nll * valid) / jnp.maximum(jnp.sum(valid), 1)

    return loss, logits, attention_mask, new_labels


# ---------------------------------------------------------------------------
# Pure-JAX reference (mirrors the bf16 matmul-input casts) for validation
# ---------------------------------------------------------------------------
def _forward_ref(points, input_ids, label_ids, proj, dec):
    bf, f32 = jnp.bfloat16, jnp.float32

    def mm(a, w):
        return jnp.dot(a.astype(bf), w.astype(bf), preferred_element_type=f32)

    B, N, _ = points.shape
    x = points.reshape(B * N, 3)
    h1 = jnp.maximum(jnp.dot(x, proj["w1"]) + proj["b1"], 0.0)
    h2 = jnp.maximum(mm(h1, proj["w2"]) + proj["b2"], 0.0)
    pt = (mm(h2, proj["w3"]) + proj["b3"]).reshape(B, N, -1)

    txt = dec["embed"][input_ids]
    xs = jnp.concatenate([pt, txt], axis=1)
    S, E = xs.shape[1], xs.shape[2]

    h = _rmsnorm(xs, dec["g1"])
    scale = 1.0 / (float(E) ** 0.5)
    q = mm(h, dec["wq"]) * scale
    k = mm(h, dec["wk"]).astype(bf)
    v = mm(h, dec["wv"]).astype(bf)
    s = jnp.einsum("bqe,bke->bqk", q.astype(bf), k, preferred_element_type=f32)
    row = jax.lax.broadcasted_iota(jnp.int32, (S, S), 0)
    col = jax.lax.broadcasted_iota(jnp.int32, (S, S), 1)
    s = jnp.where((col <= row)[None], s, -1e30)
    m = jnp.max(s, axis=-1, keepdims=True)
    p = jnp.exp(s - m)
    l = jnp.sum(p, axis=-1, keepdims=True)
    attn = jnp.einsum("bqk,bke->bqe", p.astype(bf), v,
                      preferred_element_type=f32) / l
    xs = xs + mm(attn, dec["wo"])

    h = _rmsnorm(xs, dec["g2"])
    f = jnp.maximum(mm(h, dec["w1f"]) + dec["b1f"], 0.0)
    xs = xs + mm(f, dec["w2f"]) + dec["b2f"]

    logits = mm(xs, dec["wlm"])

    pad = jnp.full((B, N), -100, dtype=jnp.int32)
    new_labels = jnp.concatenate([pad, label_ids], axis=1)
    shift_logits = logits[:, :-1, :]
    shift_labels = new_labels[:, 1:]
    valid = shift_labels != -100
    safe = jnp.where(valid, shift_labels, 0)
    logp = jax.nn.log_softmax(shift_logits, axis=-1)
    nll = -jnp.take_along_axis(logp, safe[..., None], axis=-1)[..., 0]
    loss = jnp.sum(nll * valid) / jnp.maximum(jnp.sum(valid), 1)
    return loss, logits


# ---------------------------------------------------------------------------
if __name__ == "__main__":
    B, N_PTS, T = 2, 24, 8          # batch, point tokens, text tokens
    E, VOCAB = 128, 256             # lane-aligned embed dim / synthetic vocab

    key = jax.random.PRNGKey(0)
    k_pts, k_ids, k_lbl, k_par = jax.random.split(key, 4)

    points = jax.random.uniform(k_pts, (B, N_PTS, 3), jnp.float32,
                                minval=-1.0, maxval=1.0)
    input_ids = jax.random.randint(k_ids, (B, T), 0, VOCAB - 2, dtype=jnp.int32)
    label_ids = jax.random.randint(k_lbl, (B, T), 0, VOCAB - 2, dtype=jnp.int32)

    proj_params, dec_params = init_params(k_par, E, VOCAB)

    # Small tiles so the demo shapes exercise the multi-tile flash-attention
    # (with tile skipping), hidden-accumulator, and vocab-tiled LM-head paths;
    # production values would be t_seq=256, tr=256, tv=1024, th=1024, tm=512.
    loss, logits, attn_mask, new_labels = cad_recode_forward(
        points, input_ids, label_ids, proj_params, dec_params,
        t_seq=16, tr=16, tv=128, th=256, tm=8)
    jax.block_until_ready((loss, logits, attn_mask, new_labels))

    S = N_PTS + T
    assert logits.shape == (B, S, VOCAB)
    assert attn_mask.shape == (B, S)
    assert new_labels.shape == (B, S)
    assert bool(jnp.isfinite(loss))

    # correctness check against a pure-JAX mirror of the same bf16 math
    loss_ref, logits_ref = jax.jit(_forward_ref)(
        points, input_ids, label_ids, proj_params, dec_params)
    jax.block_until_ready((loss_ref, logits_ref))
    assert bool(jnp.allclose(logits, logits_ref, atol=5e-2, rtol=5e-2))
    assert bool(jnp.abs(loss - loss_ref) < 5e-2)

    print("KERNEL_OK")
</pallas_src>

<mosaic_0001>
module attributes {stable_mosaic.version = 11 : i64} {
  func.func @_probe_buffered_kernel(%arg0: i32, %arg1: memref<8x128xf32, #tpu.memory_space<vmem>>, %arg2: memref<8x128xf32, #tpu.memory_space<vmem>>, %arg3: memref<8x128xf32, #tpu.memory_space<vmem>>) attributes {dimension_semantics = [#tpu.dimension_semantics<arbitrary>], iteration_bounds = array<i64: 2>, scalar_prefetch = 0 : i64, scratch_operands = 0 : i64, tpu.core_type = #tpu.core_type<tc>, window_params = [{transform_indices = @transform_0, window_bounds = array<i64: 8, 128>}, {pipeline_mode = #tpu.pipeline_mode<synchronous>, transform_indices = @transform_1, window_bounds = array<i64: 8, 128>}, {transform_indices = @transform_2, window_bounds = array<i64: 8, 128>}]} {
    %c0 = arith.constant 0 : index
    %c0_0 = arith.constant 0 : index
    %0 = vector.load %arg1[%c0, %c0_0] : memref<8x128xf32, #tpu.memory_space<vmem>>, vector<8x128xf32>
    %c0_1 = arith.constant 0 : index
    %c0_2 = arith.constant 0 : index
    %1 = vector.load %arg2[%c0_1, %c0_2] : memref<8x128xf32, #tpu.memory_space<vmem>>, vector<8x128xf32>
    %2 = arith.addf %0, %1 : vector<8x128xf32>
    %c0_3 = arith.constant 0 : index
    %c0_4 = arith.constant 0 : index
    %3 = vector.load %arg3[%c0_3, %c0_4] : memref<8x128xf32, #tpu.memory_space<vmem>>, vector<8x128xf32>
    tpu.vector_store %arg3[%c0_3, %c0_4], %2 {strides = array<i32>} : memref<8x128xf32, #tpu.memory_space<vmem>>, vector<8x128xf32>,
    return
  }
  func.func @transform_0(%arg0: i32) -> (i32, i32) {
    %c0_i32 = arith.constant 0 : i32
    %c0_i32_0 = arith.constant 0 : i32
    return %arg0, %c0_i32 : i32, i32
  }
  func.func @transform_1(%arg0: i32) -> (i32, i32) {
    %c0_i32 = arith.constant 0 : i32
    %c0_i32_0 = arith.constant 0 : i32
    %c0_i32_1 = arith.constant 0 : i32
    return %c0_i32, %c0_i32_0 : i32, i32
  }
  func.func @transform_2(%arg0: i32) -> (i32, i32) {
    %c0_i32 = arith.constant 0 : i32
    %c0_i32_0 = arith.constant 0 : i32
    return %arg0, %c0_i32 : i32, i32
  }
}

module attributes {stable_mosaic.version = 11 : i64} {
  func.func @qkv_kernel(%arg0: i32, %arg1: memref<16x128xf32, #tpu.memory_space<vmem>>, %arg2: memref<1x128xf32, #tpu.memory_space<vmem>>, %arg3: memref<128x128xbf16, #tpu.memory_space<vmem>>, %arg4: memref<128x128xbf16, #tpu.memory_space<vmem>>, %arg5: memref<128x128xbf16, #tpu.memory_space<vmem>>, %arg6: memref<16x128xbf16, #tpu.memory_space<vmem>>, %arg7: memref<16x128xbf16, #tpu.memory_space<vmem>>, %arg8: memref<16x128xbf16, #tpu.memory_space<vmem>>) attributes {dimension_semantics = [#tpu.dimension_semantics<parallel>], iteration_bounds = array<i64: 4>, scalar_prefetch = 0 : i64, scratch_operands = 0 : i64, tpu.core_type = #tpu.core_type<tc>, window_params = [{transform_indices = @transform_0, window_bounds = array<i64: 16, 128>}, {pipeline_mode = #tpu.pipeline_mode<synchronous>, transform_indices = @transform_1, window_bounds = array<i64: 1, 128>}, {pipeline_mode = #tpu.pipeline_mode<synchronous>, transform_indices = @transform_2, window_bounds = array<i64: 128, 128>}, {pipeline_mode = #tpu.pipeline_mode<synchronous>, transform_indices = @transform_3, window_bounds = array<i64: 128, 128>}, {pipeline_mode = #tpu.pipeline_mode<synchronous>, transform_indices = @transform_4, window_bounds = array<i64: 128, 128>}, {transform_indices = @transform_5, window_bounds = array<i64: 16, 128>}, {transform_indices = @transform_6, window_bounds = array<i64: 16, 128>}, {transform_indices = @transform_7, window_bounds = array<i64: 16, 128>}]} {
    %c0 = arith.constant 0 : index
    %c0_0 = arith.constant 0 : index
    %0 = vector.load %arg1[%c0, %c0_0] : memref<16x128xf32, #tpu.memory_space<vmem>>, vector<16x128xf32>
    %c0_1 = arith.constant 0 : index
    %c0_2 = arith.constant 0 : index
    %1 = vector.load %arg2[%c0_1, %c0_2] : memref<1x128xf32, #tpu.memory_space<vmem>>, vector<1x128xf32>
    %2 = arith.mulf %0, %0 : vector<16x128xf32>
    %cst = arith.constant dense<0.000000e+00> : vector<16xf32>
    %3 = vector.multi_reduction <add>, %2, %cst [1] : vector<16x128xf32> to vector<16xf32>
    %4 = vector.shape_cast %3 : vector<16xf32> to vector<16x1xf32>
    %cst_3 = arith.constant 1.280000e+02 : f32
    %5 = vector.broadcast %cst_3 : f32 to vector<16x1xf32>
    %6 = arith.divf %4, %5 : vector<16x1xf32>
    %cst_4 = arith.constant 9.99999997E-7 : f32
    %7 = vector.broadcast %cst_4 : f32 to vector<16x1xf32>
    %8 = arith.addf %6, %7 : vector<16x1xf32>
    %9 = math.rsqrt %8 : vector<16x1xf32>
    %10 = vector.broadcast %9 : vector<16x1xf32> to vector<16x128xf32>
    %11 = arith.mulf %0, %10 : vector<16x128xf32>
    %12 = vector.broadcast %1 : vector<1x128xf32> to vector<16x128xf32>
    %13 = arith.mulf %11, %12 : vector<16x128xf32>
    %14 = arith.truncf %13 : vector<16x128xf32> to vector<16x128xbf16>
    %c0_5 = arith.constant 0 : index
    %c0_6 = arith.constant 0 : index
    %15 = vector.load %arg3[%c0_5, %c0_6] : memref<128x128xbf16, #tpu.memory_space<vmem>>, vector<128x128xbf16>
    %cst_7 = arith.constant dense<0.000000e+00> : vector<16x128xf32>
    %16 = tpu.matmul %14, %15, %cst_7 {dimension_numbers = #tpu.dot_dimension_numbers<[1], [0], [0], [1], [0, 0, 1, 1], [], []>} : vector<16x128xbf16>, vector<128x128xbf16>, vector<16x128xf32> -> vector<16x128xf32>
    %cst_8 = arith.constant 0.0883883461 : f32
    %17 = vector.broadcast %cst_8 : f32 to vector<16x128xf32>
    %18 = arith.mulf %16, %17 : vector<16x128xf32>
    %19 = arith.truncf %18 : vector<16x128xf32> to vector<16x128xbf16>
    %c0_9 = arith.constant 0 : index
    %c0_10 = arith.constant 0 : index
    %20 = vector.load %arg6[%c0_9, %c0_10] : memref<16x128xbf16, #tpu.memory_space<vmem>>, vector<16x128xbf16>
    tpu.vector_store %arg6[%c0_9, %c0_10], %19 {strides = array<i32>} : memref<16x128xbf16, #tpu.memory_space<vmem>>, vector<16x128xbf16>,
    %c0_11 = arith.constant 0 : index
    %c0_12 = arith.constant 0 : index
    %21 = vector.load %arg4[%c0_11, %c0_12] : memref<128x128xbf16, #tpu.memory_space<vmem>>, vector<128x128xbf16>
    %cst_13 = arith.constant dense<0.000000e+00> : vector<16x128xf32>
    %22 = tpu.matmul %14, %21, %cst_13 {dimension_numbers = #tpu.dot_dimension_numbers<[1], [0], [0], [1], [0, 0, 1, 1], [], []>} : vector<16x128xbf16>, vector<128x128xbf16>, vector<16x128xf32> -> vector<16x128xf32>
    %23 = arith.truncf %22 : vector<16x128xf32> to vector<16x128xbf16>
    %c0_14 = arith.constant 0 : index
    %c0_15 = arith.constant 0 : index
    %24 = vector.load %arg7[%c0_14, %c0_15] : memref<16x128xbf16, #tpu.memory_space<vmem>>, vector<16x128xbf16>
    tpu.vector_store %arg7[%c0_14, %c0_15], %23 {strides = array<i32>} : memref<16x128xbf16, #tpu.memory_space<vmem>>, vector<16x128xbf16>,
    %c0_16 = arith.constant 0 : index
    %c0_17 = arith.constant 0 : index
    %25 = vector.load %arg5[%c0_16, %c0_17] : memref<128x128xbf16, #tpu.memory_space<vmem>>, vector<128x128xbf16>
    %cst_18 = arith.constant dense<0.000000e+00> : vector<16x128xf32>
    %26 = tpu.matmul %14, %25, %cst_18 {dimension_numbers = #tpu.dot_dimension_numbers<[1], [0], [0], [1], [0, 0, 1, 1], [], []>} : vector<16x128xbf16>, vector<128x128xbf16>, vector<16x128xf32> -> vector<16x128xf32>
    %27 = arith.truncf %26 : vector<16x128xf32> to vector<16x128xbf16>
    %c0_19 = arith.constant 0 : index
    %c0_20 = arith.constant 0 : index
    %28 = vector.load %arg8[%c0_19, %c0_20] : memref<16x128xbf16, #tpu.memory_space<vmem>>, vector<16x128xbf16>
    tpu.vector_store %arg8[%c0_19, %c0_20], %27 {strides = array<i32>} : memref<16x128xbf16, #tpu.memory_space<vmem>>, vector<16x128xbf16>,
    return
  }
  func.func @transform_0(%arg0: i32) -> (i32, i32) {
    %c0_i32 = arith.constant 0 : i32
    %c0_i32_0 = arith.constant 0 : i32
    return %arg0, %c0_i32 : i32, i32
  }
  func.func @transform_1(%arg0: i32) -> (i32, i32) {
    %c0_i32 = arith.constant 0 : i32
    %c0_i32_0 = arith.constant 0 : i32
    %c0_i32_1 = arith.constant 0 : i32
    return %c0_i32, %c0_i32_0 : i32, i32
  }
  func.func @transform_2(%arg0: i32) -> (i32, i32) {
    %c0_i32 = arith.constant 0 : i32
    %c0_i32_0 = arith.constant 0 : i32
    %c0_i32_1 = arith.constant 0 : i32
    return %c0_i32, %c0_i32_0 : i32, i32
  }
  func.func @transform_3(%arg0: i32) -> (i32, i32) {
    %c0_i32 = arith.constant 0 : i32
    %c0_i32_0 = arith.constant 0 : i32
    %c0_i32_1 = arith.constant 0 : i32
    return %c0_i32, %c0_i32_0 : i32, i32
  }
  func.func @transform_4(%arg0: i32) -> (i32, i32) {
    %c0_i32 = arith.constant 0 : i32
    %c0_i32_0 = arith.constant 0 : i32
    %c0_i32_1 = arith.constant 0 : i32
    return %c0_i32, %c0_i32_0 : i32, i32
  }
  func.func @transform_5(%arg0: i32) -> (i32, i32) {
    %c0_i32 = arith.constant 0 : i32
    %c0_i32_0 = arith.constant 0 : i32
    return %arg0, %c0_i32 : i32, i32
  }
  func.func @transform_6(%arg0: i32) -> (i32, i32) {
    %c0_i32 = arith.constant 0 : i32
    %c0_i32_0 = arith.constant 0 : i32
    return %arg0, %c0_i32 : i32, i32
  }
  func.func @transform_7(%arg0: i32) -> (i32, i32) {
    %c0_i32 = arith.constant 0 : i32
    %c0_i32_0 = arith.constant 0 : i32
    return %arg0, %c0_i32 : i32, i32
  }
}

module attributes {stable_mosaic.version = 11 : i64} {
  func.func @projector_kernel(%arg0: i32, %arg1: memref<8x3xf32, #tpu.memory_space<vmem>>, %arg2: memref<3x128xf32, #tpu.memory_space<vmem>>, %arg3: memref<1x128xf32, #tpu.memory_space<vmem>>, %arg4: memref<128x512xbf16, #tpu.memory_space<vmem>>, %arg5: memref<1x512xf32, #tpu.memory_space<vmem>>, %arg6: memref<512x128xbf16, #tpu.memory_space<vmem>>, %arg7: memref<1x128xf32, #tpu.memory_space<vmem>>, %arg8: memref<8x128xf32, #tpu.memory_space<vmem>>) attributes {dimension_semantics = [#tpu.dimension_semantics<parallel>], iteration_bounds = array<i64: 6>, scalar_prefetch = 0 : i64, scratch_operands = 0 : i64, tpu.core_type = #tpu.core_type<tc>, window_params = [{transform_indices = @transform_0, window_bounds = array<i64: 8, 3>}, {pipeline_mode = #tpu.pipeline_mode<synchronous>, transform_indices = @transform_1, window_bounds = array<i64: 3, 128>}, {pipeline_mode = #tpu.pipeline_mode<synchronous>, transform_indices = @transform_2, window_bounds = array<i64: 1, 128>}, {pipeline_mode = #tpu.pipeline_mode<synchronous>, transform_indices = @transform_3, window_bounds = array<i64: 128, 512>}, {pipeline_mode = #tpu.pipeline_mode<synchronous>, transform_indices = @transform_4, window_bounds = array<i64: 1, 512>}, {pipeline_mode = #tpu.pipeline_mode<synchronous>, transform_indices = @transform_5, window_bounds = array<i64: 512, 128>}, {pipeline_mode = #tpu.pipeline_mode<synchronous>, transform_indices = @transform_6, window_bounds = array<i64: 1, 128>}, {transform_indices = @transform_7, window_bounds = array<i64: 8, 128>}]} {
    %c0 = arith.constant 0 : index
    %c0_0 = arith.constant 0 : index
    %0 = vector.load %arg1[%c0, %c0_0] : memref<8x3xf32, #tpu.memory_space<vmem>>, vector<8x3xf32>
    %c0_1 = arith.constant 0 : index
    %c0_2 = arith.constant 0 : index
    %1 = vector.load %arg2[%c0_1, %c0_2] : memref<3x128xf32, #tpu.memory_space<vmem>>, vector<3x128xf32>
    %2 = vector.extract_strided_slice %0 {offsets = [0, 0], sizes = [8, 1], strides = [1, 1]} : vector<8x3xf32> to vector<8x1xf32>
    %3 = vector.extract_strided_slice %1 {offsets = [0, 0], sizes = [1, 128], strides = [1, 1]} : vector<3x128xf32> to vector<1x128xf32>
    %4 = vector.broadcast %2 : vector<8x1xf32> to vector<8x128xf32>
    %5 = vector.broadcast %3 : vector<1x128xf32> to vector<8x128xf32>
    %6 = arith.mulf %4, %5 : vector<8x128xf32>
    %7 = vector.extract_strided_slice %0 {offsets = [0, 1], sizes = [8, 1], strides = [1, 1]} : vector<8x3xf32> to vector<8x1xf32>
    %8 = vector.extract_strided_slice %1 {offsets = [1, 0], sizes = [1, 128], strides = [1, 1]} : vector<3x128xf32> to vector<1x128xf32>
    %9 = vector.broadcast %7 : vector<8x1xf32> to vector<8x128xf32>
    %10 = vector.broadcast %8 : vector<1x128xf32> to vector<8x128xf32>
    %11 = arith.mulf %9, %10 : vector<8x128xf32>
    %12 = arith.addf %6, %11 : vector<8x128xf32>
    %13 = vector.extract_strided_slice %0 {offsets = [0, 2], sizes = [8, 1], strides = [1, 1]} : vector<8x3xf32> to vector<8x1xf32>
    %14 = vector.extract_strided_slice %1 {offsets = [2, 0], sizes = [1, 128], strides = [1, 1]} : vector<3x128xf32> to vector<1x128xf32>
    %15 = vector.broadcast %13 : vector<8x1xf32> to vector<8x128xf32>
    %16 = vector.broadcast %14 : vector<1x128xf32> to vector<8x128xf32>
    %17 = arith.mulf %15, %16 : vector<8x128xf32>
    %18 = arith.addf %12, %17 : vector<8x128xf32>
    %c0_3 = arith.constant 0 : index
    %c0_4 = arith.constant 0 : index
    %19 = vector.load %arg3[%c0_3, %c0_4] : memref<1x128xf32, #tpu.memory_space<vmem>>, vector<1x128xf32>
    %20 = vector.broadcast %19 : vector<1x128xf32> to vector<8x128xf32>
    %21 = arith.addf %18, %20 : vector<8x128xf32>
    %cst = arith.constant 0.000000e+00 : f32
    %22 = vector.broadcast %cst : f32 to vector<8x128xf32>
    %23 = arith.maximumf %21, %22 : vector<8x128xf32>
    %24 = arith.truncf %23 : vector<8x128xf32> to vector<8x128xbf16>
    %c0_5 = arith.constant 0 : index
    %c0_6 = arith.constant 0 : index
    %25 = vector.load %arg4[%c0_5, %c0_6] : memref<128x512xbf16, #tpu.memory_space<vmem>>, vector<128x512xbf16>
    %cst_7 = arith.constant dense<0.000000e+00> : vector<8x512xf32>
    %26 = tpu.matmul %24, %25, %cst_7 {dimension_numbers = #tpu.dot_dimension_numbers<[1], [0], [0], [1], [0, 0, 1, 1], [], []>} : vector<8x128xbf16>, vector<128x512xbf16>, vector<8x512xf32> -> vector<8x512xf32>
    %c0_8 = arith.constant 0 : index
    %c0_9 = arith.constant 0 : index
    %27 = vector.load %arg5[%c0_8, %c0_9] : memref<1x512xf32, #tpu.memory_space<vmem>>, vector<1x512xf32>
    %28 = vector.broadcast %27 : vector<1x512xf32> to vector<8x512xf32>
    %29 = arith.addf %26, %28 : vector<8x512xf32>
    %cst_10 = arith.constant 0.000000e+00 : f32
    %30 = vector.broadcast %cst_10 : f32 to vector<8x512xf32>
    %31 = arith.maximumf %29, %30 : vector<8x512xf32>
    %32 = arith.truncf %31 : vector<8x512xf32> to vector<8x512xbf16>
    %c0_11 = arith.constant 0 : index
    %c0_12 = arith.constant 0 : index
    %33 = vector.load %arg6[%c0_11, %c0_12] : memref<512x128xbf16, #tpu.memory_space<vmem>>, vector<512x128xbf16>
    %cst_13 = arith.constant dense<0.000000e+00> : vector<8x128xf32>
    %34 = tpu.matmul %32, %33, %cst_13 {dimension_numbers = #tpu.dot_dimension_numbers<[1], [0], [0], [1], [0, 0, 1, 1], [], []>} : vector<8x512xbf16>, vector<512x128xbf16>, vector<8x128xf32> -> vector<8x128xf32>
    %c0_14 = arith.constant 0 : index
    %c0_15 = arith.constant 0 : index
    %35 = vector.load %arg7[%c0_14, %c0_15] : memref<1x128xf32, #tpu.memory_space<vmem>>, vector<1x128xf32>
    %36 = vector.broadcast %35 : vector<1x128xf32> to vector<8x128xf32>
    %37 = arith.addf %34, %36 : vector<8x128xf32>
    %c0_16 = arith.constant 0 : index
    %c0_17 = arith.constant 0 : index
    %38 = vector.load %arg8[%c0_16, %c0_17] : memref<8x128xf32, #tpu.memory_space<vmem>>, vector<8x128xf32>
    tpu.vector_store %arg8[%c0_16, %c0_17], %37 {strides = array<i32>} : memref<8x128xf32, #tpu.memory_space<vmem>>, vector<8x128xf32>,
    return
  }
  func.func @transform_0(%arg0: i32) -> (i32, i32) {
    %c0_i32 = arith.constant 0 : i32
    %c0_i32_0 = arith.constant 0 : i32
    return %arg0, %c0_i32 : i32, i32
  }
  func.func @transform_1(%arg0: i32) -> (i32, i32) {
    %c0_i32 = arith.constant 0 : i32
    %c0_i32_0 = arith.constant 0 : i32
    %c0_i32_1 = arith.constant 0 : i32
    return %c0_i32, %c0_i32_0 : i32, i32
  }
  func.func @transform_2(%arg0: i32) -> (i32, i32) {
    %c0_i32 = arith.constant 0 : i32
    %c0_i32_0 = arith.constant 0 : i32
    %c0_i32_1 = arith.constant 0 : i32
    return %c0_i32, %c0_i32_0 : i32, i32
  }
  func.func @transform_3(%arg0: i32) -> (i32, i32) {
    %c0_i32 = arith.constant 0 : i32
    %c0_i32_0 = arith.constant 0 : i32
    %c0_i32_1 = arith.constant 0 : i32
    return %c0_i32, %c0_i32_0 : i32, i32
  }
  func.func @transform_4(%arg0: i32) -> (i32, i32) {
    %c0_i32 = arith.constant 0 : i32
    %c0_i32_0 = arith.constant 0 : i32
    %c0_i32_1 = arith.constant 0 : i32
    return %c0_i32, %c0_i32_0 : i32, i32
  }
  func.func @transform_5(%arg0: i32) -> (i32, i32) {
    %c0_i32 = arith.constant 0 : i32
    %c0_i32_0 = arith.constant 0 : i32
    %c0_i32_1 = arith.constant 0 : i32
    return %c0_i32, %c0_i32_0 : i32, i32
  }
  func.func @transform_6(%arg0: i32) -> (i32, i32) {
    %c0_i32 = arith.constant 0 : i32
    %c0_i32_0 = arith.constant 0 : i32
    %c0_i32_1 = arith.constant 0 : i32
    return %c0_i32, %c0_i32_0 : i32, i32
  }
  func.func @transform_7(%arg0: i32) -> (i32, i32) {
    %c0_i32 = arith.constant 0 : i32
    %c0_i32_0 = arith.constant 0 : i32
    return %arg0, %c0_i32 : i32, i32
  }
}

module attributes {stable_mosaic.version = 11 : i64} {
  func.func @attention_kernel(%arg0: i32, %arg1: i32, %arg2: i32, %arg3: memref<1x16x128xf32, #tpu.memory_space<vmem>>, %arg4: memref<1x16x128xbf16, #tpu.memory_space<vmem>>, %arg5: memref<1x16x128xbf16, #tpu.memory_space<vmem>>, %arg6: memref<1x16x128xbf16, #tpu.memory_space<vmem>>, %arg7: memref<128x128xbf16, #tpu.memory_space<vmem>>, %arg8: memref<1x16x128xf32, #tpu.memory_space<vmem>>, %arg9: memref<16x1xf32, #tpu.memory_space<vmem>>, %arg10: memref<16x1xf32, #tpu.memory_space<vmem>>, %arg11: memref<16x128xf32, #tpu.memory_space<vmem>>) attributes {dimension_semantics = [#tpu.dimension_semantics<parallel>, #tpu.dimension_semantics<parallel>, #tpu.dimension_semantics<arbitrary>], iteration_bounds = array<i64: 2, 2, 2>, scalar_prefetch = 0 : i64, scratch_operands = 3 : i64, tpu.core_type = #tpu.core_type<tc>, window_params = [{transform_indices = @transform_0, window_bounds = array<i64: 1, 16, 128>}, {transform_indices = @transform_1, window_bounds = array<i64: 1, 16, 128>}, {transform_indices = @transform_2, window_bounds = array<i64: 1, 16, 128>}, {transform_indices = @transform_3, window_bounds = array<i64: 1, 16, 128>}, {pipeline_mode = #tpu.pipeline_mode<synchronous>, transform_indices = @transform_4, window_bounds = array<i64: 128, 128>}, {transform_indices = @transform_5, window_bounds = array<i64: 1, 16, 128>}]} {
    %c0_i32 = arith.constant 0 : i32
    %0 = arith.cmpi eq, %arg2, %c0_i32 : i32
    %1 = arith.extui %0 : i1 to i32
    %c0_i32_0 = arith.constant 0 : i32
    %2 = arith.cmpi ne, %1, %c0_i32_0 : i32
    scf.if %2 {
      %cst = arith.constant 0xFF800000 : f32
      %12 = vector.broadcast %cst : f32 to vector<16x1xf32>
      %c0 = arith.constant 0 : index
      %c0_4 = arith.constant 0 : index
      %13 = vector.load %arg9[%c0, %c0_4] : memref<16x1xf32, #tpu.memory_space<vmem>>, vector<16x1xf32>
      tpu.vector_store %arg9[%c0, %c0_4], %12 {strides = array<i32>} : memref<16x1xf32, #tpu.memory_space<vmem>>, vector<16x1xf32>,
      %cst_5 = arith.constant 0.000000e+00 : f32
      %14 = vector.broadcast %cst_5 : f32 to vector<16x1xf32>
      %c0_6 = arith.constant 0 : index
      %c0_7 = arith.constant 0 : index
      %15 = vector.load %arg10[%c0_6, %c0_7] : memref<16x1xf32, #tpu.memory_space<vmem>>, vector<16x1xf32>
      tpu.vector_store %arg10[%c0_6, %c0_7], %14 {strides = array<i32>} : memref<16x1xf32, #tpu.memory_space<vmem>>, vector<16x1xf32>,
      %cst_8 = arith.constant 0.000000e+00 : f32
      %16 = vector.broadcast %cst_8 : f32 to vector<16x128xf32>
      %c0_9 = arith.constant 0 : index
      %c0_10 = arith.constant 0 : index
      %17 = vector.load %arg11[%c0_9, %c0_10] : memref<16x128xf32, #tpu.memory_space<vmem>>, vector<16x128xf32>
      tpu.vector_store %arg11[%c0_9, %c0_10], %16 {strides = array<i32>} : memref<16x128xf32, #tpu.memory_space<vmem>>, vector<16x128xf32>,
    } else {
    }
    %3 = arith.cmpi slt, %arg2, %arg1 : i32
    %4 = arith.extui %3 : i1 to i32
    %c0_i32_1 = arith.constant 0 : i32
    %5 = arith.cmpi ne, %4, %c0_i32_1 : i32
    scf.if %5 {
      %c0 = arith.constant 0 : index
      %c0_4 = arith.constant 0 : index
      %c0_5 = arith.constant 0 : index
      %12 = vector.load %arg5[%c0, %c0_4, %c0_5] : memref<1x16x128xbf16, #tpu.memory_space<vmem>>, vector<1x16x128xbf16>
      %13 = vector.shape_cast %12 : vector<1x16x128xbf16> to vector<16x128xbf16>
      %c0_6 = arith.constant 0 : index
      %c0_7 = arith.constant 0 : index
      %c0_8 = arith.constant 0 : index
      %14 = vector.load %arg6[%c0_6, %c0_7, %c0_8] : memref<1x16x128xbf16, #tpu.memory_space<vmem>>, vector<1x16x128xbf16>
      %15 = vector.shape_cast %14 : vector<1x16x128xbf16> to vector<16x128xbf16>
      %c0_9 = arith.constant 0 : index
      %c0_10 = arith.constant 0 : index
      %c0_11 = arith.constant 0 : index
      %16 = vector.load %arg4[%c0_9, %c0_10, %c0_11] : memref<1x16x128xbf16, #tpu.memory_space<vmem>>, vector<1x16x128xbf16>
      %17 = vector.shape_cast %16 : vector<1x16x128xbf16> to vector<16x128xbf16>
      %cst = arith.constant dense<0.000000e+00> : vector<16x16xf32>
      %18 = tpu.matmul %17, %13, %cst {dimension_numbers = #tpu.dot_dimension_numbers<[1], [1], [0], [0], [0, 0, 1, 0], [], []>} : vector<16x128xbf16>, vector<16x128xbf16>, vector<16x16xf32> -> vector<16x16xf32>
      %c0_12 = arith.constant 0 : index
      %c0_13 = arith.constant 0 : index
      %19 = vector.load %arg9[%c0_12, %c0_13] : memref<16x1xf32, #tpu.memory_space<vmem>>, vector<16x1xf32>
      %cst_14 = arith.constant dense<0xFF800000> : vector<16xf32>
      %20 = vector.multi_reduction <maximumf>, %18, %cst_14 [1] : vector<16x16xf32> to vector<16xf32>
      %21 = vector.shape_cast %20 : vector<16xf32> to vector<16x1xf32>
      %22 = arith.maximumf %19, %21 : vector<16x1xf32>
      %23 = arith.subf %19, %22 : vector<16x1xf32>
      %24 = math.exp %23 : vector<16x1xf32>
      %25 = vector.broadcast %22 : vector<16x1xf32> to vector<16x16xf32>
      %26 = arith.subf %18, %25 : vector<16x16xf32>
      %27 = math.exp %26 : vector<16x16xf32>
      %c0_15 = arith.constant 0 : index
      %c0_16 = arith.constant 0 : index
      %28 = vector.load %arg10[%c0_15, %c0_16] : memref<16x1xf32, #tpu.memory_space<vmem>>, vector<16x1xf32>
      %29 = arith.mulf %24, %28 : vector<16x1xf32>
      %cst_17 = arith.constant dense<0.000000e+00> : vector<16xf32>
      %30 = vector.multi_reduction <add>, %27, %cst_17 [1] : vector<16x16xf32> to vector<16xf32>
      %31 = vector.shape_cast %30 : vector<16xf32> to vector<16x1xf32>
      %32 = arith.addf %29, %31 : vector<16x1xf32>
      %c0_18 = arith.constant 0 : index
      %c0_19 = arith.constant 0 : index
      %33 = vector.load %arg10[%c0_18, %c0_19] : memref<16x1xf32, #tpu.memory_space<vmem>>, vector<16x1xf32>
      tpu.vector_store %arg10[%c0_18, %c0_19], %32 {strides = array<i32>} : memref<16x1xf32, #tpu.memory_space<vmem>>, vector<16x1xf32>,
      %c0_20 = arith.constant 0 : index
      %c0_21 = arith.constant 0 : index
      %34 = vector.load %arg11[%c0_20, %c0_21] : memref<16x128xf32, #tpu.memory_space<vmem>>, vector<16x128xf32>
      %35 = vector.broadcast %24 : vector<16x1xf32> to vector<16x128xf32>
      %36 = arith.mulf %35, %34 : vector<16x128xf32>
      %37 = arith.truncf %27 : vector<16x16xf32> to vector<16x16xbf16>
      %cst_22 = arith.constant dense<0.000000e+00> : vector<16x128xf32>
      %38 = tpu.matmul %37, %15, %cst_22 {dimension_numbers = #tpu.dot_dimension_numbers<[1], [0], [0], [1], [0, 0, 1, 1], [], []>} : vector<16x16xbf16>, vector<16x128xbf16>, vector<16x128xf32> -> vector<16x128xf32>
      %39 = arith.addf %36, %38 : vector<16x128xf32>
      %c0_23 = arith.constant 0 : index
      %c0_24 = arith.constant 0 : index
      %40 = vector.load %arg11[%c0_23, %c0_24] : memref<16x128xf32, #tpu.memory_space<vmem>>, vector<16x128xf32>
      tpu.vector_store %arg11[%c0_23, %c0_24], %39 {strides = array<i32>} : memref<16x128xf32, #tpu.memory_space<vmem>>, vector<16x128xf32>,
      %c0_25 = arith.constant 0 : index
      %c0_26 = arith.constant 0 : index
      %41 = vector.load %arg9[%c0_25, %c0_26] : memref<16x1xf32, #tpu.memory_space<vmem>>, vector<16x1xf32>
      tpu.vector_store %arg9[%c0_25, %c0_26], %22 {strides = array<i32>} : memref<16x1xf32, #tpu.memory_space<vmem>>, vector<16x1xf32>,
    } else {
    }
    %6 = arith.cmpi eq, %arg2, %arg1 : i32
    %7 = arith.extui %6 : i1 to i32
    %c0_i32_2 = arith.constant 0 : i32
    %8 = arith.cmpi ne, %7, %c0_i32_2 : i32
    scf.if %8 {
      %c0 = arith.constant 0 : index
      %c0_4 = arith.constant 0 : index
      %c0_5 = arith.constant 0 : index
      %12 = vector.load %arg5[%c0, %c0_4, %c0_5] : memref<1x16x128xbf16, #tpu.memory_space<vmem>>, vector<1x16x128xbf16>
      %13 = vector.shape_cast %12 : vector<1x16x128xbf16> to vector<16x128xbf16>
      %c0_6 = arith.constant 0 : index
      %c0_7 = arith.constant 0 : index
      %c0_8 = arith.constant 0 : index
      %14 = vector.load %arg6[%c0_6, %c0_7, %c0_8] : memref<1x16x128xbf16, #tpu.memory_space<vmem>>, vector<1x16x128xbf16>
      %15 = vector.shape_cast %14 : vector<1x16x128xbf16> to vector<16x128xbf16>
      %c0_9 = arith.constant 0 : index
      %c0_10 = arith.constant 0 : index
      %c0_11 = arith.constant 0 : index
      %16 = vector.load %arg4[%c0_9, %c0_10, %c0_11] : memref<1x16x128xbf16, #tpu.memory_space<vmem>>, vector<1x16x128xbf16>
      %17 = vector.shape_cast %16 : vector<1x16x128xbf16> to vector<16x128xbf16>
      %cst = arith.constant dense<0.000000e+00> : vector<16x16xf32>
      %18 = tpu.matmul %17, %13, %cst {dimension_numbers = #tpu.dot_dimension_numbers<[1], [1], [0], [0], [0, 0, 1, 0], [], []>} : vector<16x128xbf16>, vector<16x128xbf16>, vector<16x16xf32> -> vector<16x16xf32>
      %19 = tpu.iota {dimensions = array<i32: 0>} : vector<16x16xi32>
      %20 = tpu.iota {dimensions = array<i32: 1>} : vector<16x16xi32>
      %21 = arith.cmpi sle, %20, %19 : vector<16x16xi32>
      %cst_12 = arith.constant -1.000000e+30 : f32
      %22 = vector.broadcast %cst_12 : f32 to vector<16x16xf32>
      %23 = arith.select %21, %18, %22 : vector<16x16xi1>, vector<16x16xf32>
      %c0_13 = arith.constant 0 : index
      %c0_14 = arith.constant 0 : index
      %24 = vector.load %arg9[%c0_13, %c0_14] : memref<16x1xf32, #tpu.memory_space<vmem>>, vector<16x1xf32>
      %cst_15 = arith.constant dense<0xFF800000> : vector<16xf32>
      %25 = vector.multi_reduction <maximumf>, %23, %cst_15 [1] : vector<16x16xf32> to vector<16xf32>
      %26 = vector.shape_cast %25 : vector<16xf32> to vector<16x1xf32>
      %27 = arith.maximumf %24, %26 : vector<16x1xf32>
      %28 = arith.subf %24, %27 : vector<16x1xf32>
      %29 = math.exp %28 : vector<16x1xf32>
      %30 = vector.broadcast %27 : vector<16x1xf32> to vector<16x16xf32>
      %31 = arith.subf %23, %30 : vector<16x16xf32>
      %32 = math.exp %31 : vector<16x16xf32>
      %c0_16 = arith.constant 0 : index
      %c0_17 = arith.constant 0 : index
      %33 = vector.load %arg10[%c0_16, %c0_17] : memref<16x1xf32, #tpu.memory_space<vmem>>, vector<16x1xf32>
      %34 = arith.mulf %29, %33 : vector<16x1xf32>
      %cst_18 = arith.constant dense<0.000000e+00> : vector<16xf32>
      %35 = vector.multi_reduction <add>, %32, %cst_18 [1] : vector<16x16xf32> to vector<16xf32>
      %36 = vector.shape_cast %35 : vector<16xf32> to vector<16x1xf32>
      %37 = arith.addf %34, %36 : vector<16x1xf32>
      %c0_19 = arith.constant 0 : index
      %c0_20 = arith.constant 0 : index
      %38 = vector.load %arg10[%c0_19, %c0_20] : memref<16x1xf32, #tpu.memory_space<vmem>>, vector<16x1xf32>
      tpu.vector_store %arg10[%c0_19, %c0_20], %37 {strides = array<i32>} : memref<16x1xf32, #tpu.memory_space<vmem>>, vector<16x1xf32>,
      %c0_21 = arith.constant 0 : index
      %c0_22 = arith.constant 0 : index
      %39 = vector.load %arg11[%c0_21, %c0_22] : memref<16x128xf32, #tpu.memory_space<vmem>>, vector<16x128xf32>
      %40 = vector.broadcast %29 : vector<16x1xf32> to vector<16x128xf32>
      %41 = arith.mulf %40, %39 : vector<16x128xf32>
      %42 = arith.truncf %32 : vector<16x16xf32> to vector<16x16xbf16>
      %cst_23 = arith.constant dense<0.000000e+00> : vector<16x128xf32>
      %43 = tpu.matmul %42, %15, %cst_23 {dimension_numbers = #tpu.dot_dimension_numbers<[1], [0], [0], [1], [0, 0, 1, 1], [], []>} : vector<16x16xbf16>, vector<16x128xbf16>, vector<16x128xf32> -> vector<16x128xf32>
      %44 = arith.addf %41, %43 : vector<16x128xf32>
      %c0_24 = arith.constant 0 : index
      %c0_25 = arith.constant 0 : index
      %45 = vector.load %arg11[%c0_24, %c0_25] : memref<16x128xf32, #tpu.memory_space<vmem>>, vector<16x128xf32>
      tpu.vector_store %arg11[%c0_24, %c0_25], %44 {strides = array<i32>} : memref<16x128xf32, #tpu.memory_space<vmem>>, vector<16x128xf32>,
      %c0_26 = arith.constant 0 : index
      %c0_27 = arith.constant 0 : index
      %46 = vector.load %arg9[%c0_26, %c0_27] : memref<16x1xf32, #tpu.memory_space<vmem>>, vector<16x1xf32>
      tpu.vector_store %arg9[%c0_26, %c0_27], %27 {strides = array<i32>} : memref<16x1xf32, #tpu.memory_space<vmem>>, vector<16x1xf32>,
    } else {
    }
    %c1_i32 = arith.constant 1 : i32
    %9 = arith.cmpi eq, %arg2, %c1_i32 : i32
    %10 = arith.extui %9 : i1 to i32
    %c0_i32_3 = arith.constant 0 : i32
    %11 = arith.cmpi ne, %10, %c0_i32_3 : i32
    scf.if %11 {
      %c0 = arith.constant 0 : index
      %c0_4 = arith.constant 0 : index
      %12 = vector.load %arg11[%c0, %c0_4] : memref<16x128xf32, #tpu.memory_space<vmem>>, vector<16x128xf32>
      %c0_5 = arith.constant 0 : index
      %c0_6 = arith.constant 0 : index
      %13 = vector.load %arg10[%c0_5, %c0_6] : memref<16x1xf32, #tpu.memory_space<vmem>>, vector<16x1xf32>
      %14 = tpu.reciprocal %13 {approx = true} : vector<16x1xf32> -> vector<16x1xf32>
      %15 = vector.broadcast %14 : vector<16x1xf32> to vector<16x128xf32>
      %16 = arith.mulf %12, %15 : vector<16x128xf32>
      %c0_7 = arith.constant 0 : index
      %c0_8 = arith.constant 0 : index
      %c0_9 = arith.constant 0 : index
      %17 = vector.load %arg3[%c0_7, %c0_8, %c0_9] : memref<1x16x128xf32, #tpu.memory_space<vmem>>, vector<1x16x128xf32>
      %18 = vector.shape_cast %17 : vector<1x16x128xf32> to vector<16x128xf32>
      %19 = arith.truncf %16 : vector<16x128xf32> to vector<16x128xbf16>
      %c0_10 = arith.constant 0 : index
      %c0_11 = arith.constant 0 : index
      %20 = vector.load %arg7[%c0_10, %c0_11] : memref<128x128xbf16, #tpu.memory_space<vmem>>, vector<128x128xbf16>
      %cst = arith.constant dense<0.000000e+00> : vector<16x128xf32>
      %21 = tpu.matmul %19, %20, %cst {dimension_numbers = #tpu.dot_dimension_numbers<[1], [0], [0], [1], [0, 0, 1, 1], [], []>} : vector<16x128xbf16>, vector<128x128xbf16>, vector<16x128xf32> -> vector<16x128xf32>
      %22 = arith.addf %18, %21 : vector<16x128xf32>
      %c0_12 = arith.constant 0 : index
      %c0_13 = arith.constant 0 : index
      %c0_14 = arith.constant 0 : index
      %23 = vector.load %arg8[%c0_12, %c0_13, %c0_14] : memref<1x16x128xf32, #tpu.memory_space<vmem>>, vector<1x16x128xf32>
      %24 = vector.shape_cast %23 : vector<1x16x128xf32> to vector<16x128xf32>
      %25 = vector.shape_cast %22 : vector<16x128xf32> to vector<1x16x128xf32>
      tpu.vector_store %arg8[%c0_12, %c0_13, %c0_14], %25 {strides = array<i32>} : memref<1x16x128xf32, #tpu.memory_space<vmem>>, vector<1x16x128xf32>,
    } else {
    }
    return
  }
  func.func @transform_0(%arg0: i32, %arg1: i32, %arg2: i32) -> (i32, i32, i32) {
    %c0_i32 = arith.constant 0 : i32
    %c0_i32_0 = arith.constant 0 : i32
    return %arg0, %arg1, %c0_i32 : i32, i32, i32
  }
  func.func @transform_1(%arg0: i32, %arg1: i32, %arg2: i32) -> (i32, i32, i32) {
    %c0_i32 = arith.constant 0 : i32
    %c0_i32_0 = arith.constant 0 : i32
    return %arg0, %arg1, %c0_i32 : i32, i32, i32
  }
  func.func @transform_2(%arg0: i32, %arg1: i32, %arg2: i32) -> (i32, i32, i32) {
    %c0_i32 = arith.constant 0 : i32
    %c0_i32_0 = arith.constant 0 : i32
    return %arg0, %arg2, %c0_i32 : i32, i32, i32
  }
  func.func @transform_3(%arg0: i32, %arg1: i32, %arg2: i32) -> (i32, i32, i32) {
    %c0_i32 = arith.constant 0 : i32
    %c0_i32_0 = arith.constant 0 : i32
    return %arg0, %arg2, %c0_i32 : i32, i32, i32
  }
  func.func @transform_4(%arg0: i32, %arg1: i32, %arg2: i32) -> (i32, i32) {
    %c0_i32 = arith.constant 0 : i32
    %c0_i32_0 = arith.constant 0 : i32
    %c0_i32_1 = arith.constant 0 : i32
    return %c0_i32, %c0_i32_0 : i32, i32
  }
  func.func @transform_5(%arg0: i32, %arg1: i32, %arg2: i32) -> (i32, i32, i32) {
    %c0_i32 = arith.constant 0 : i32
    %c0_i32_0 = arith.constant 0 : i32
    return %arg0, %arg1, %c0_i32 : i32, i32, i32
  }
}

module attributes {stable_mosaic.version = 11 : i64} {
  func.func @ffn_kernel(%arg0: i32, %arg1: i32, %arg2: memref<16x128xf32, #tpu.memory_space<vmem>>, %arg3: memref<1x128xf32, #tpu.memory_space<vmem>>, %arg4: memref<128x256xbf16, #tpu.memory_space<vmem>>, %arg5: memref<1x256xf32, #tpu.memory_space<vmem>>, %arg6: memref<256x128xbf16, #tpu.memory_space<vmem>>, %arg7: memref<1x128xf32, #tpu.memory_space<vmem>>, %arg8: memref<16x128xf32, #tpu.memory_space<vmem>>, %arg9: memref<16x128xbf16, #tpu.memory_space<vmem>>, %arg10: memref<16x128xf32, #tpu.memory_space<vmem>>) attributes {dimension_semantics = [#tpu.dimension_semantics<parallel>, #tpu.dimension_semantics<arbitrary>], iteration_bounds = array<i64: 4, 2>, scalar_prefetch = 0 : i64, scratch_operands = 2 : i64, tpu.core_type = #tpu.core_type<tc>, window_params = [{transform_indices = @transform_0, window_bounds = array<i64: 16, 128>}, {pipeline_mode = #tpu.pipeline_mode<synchronous>, transform_indices = @transform_1, window_bounds = array<i64: 1, 128>}, {transform_indices = @transform_2, window_bounds = array<i64: 128, 256>}, {transform_indices = @transform_3, window_bounds = array<i64: 1, 256>}, {transform_indices = @transform_4, window_bounds = array<i64: 256, 128>}, {pipeline_mode = #tpu.pipeline_mode<synchronous>, transform_indices = @transform_5, window_bounds = array<i64: 1, 128>}, {transform_indices = @transform_6, window_bounds = array<i64: 16, 128>}]} {
    %c0_i32 = arith.constant 0 : i32
    %0 = arith.cmpi eq, %arg1, %c0_i32 : i32
    %1 = arith.extui %0 : i1 to i32
    %c0_i32_0 = arith.constant 0 : i32
    %2 = arith.cmpi ne, %1, %c0_i32_0 : i32
    scf.if %2 {
      %c0_15 = arith.constant 0 : index
      %c0_16 = arith.constant 0 : index
      %20 = vector.load %arg2[%c0_15, %c0_16] : memref<16x128xf32, #tpu.memory_space<vmem>>, vector<16x128xf32>
      %c0_17 = arith.constant 0 : index
      %c0_18 = arith.constant 0 : index
      %21 = vector.load %arg7[%c0_17, %c0_18] : memref<1x128xf32, #tpu.memory_space<vmem>>, vector<1x128xf32>
      %22 = vector.broadcast %21 : vector<1x128xf32> to vector<16x128xf32>
      %23 = arith.addf %20, %22 : vector<16x128xf32>
      %c0_19 = arith.constant 0 : index
      %c0_20 = arith.constant 0 : index
      %24 = vector.load %arg10[%c0_19, %c0_20] : memref<16x128xf32, #tpu.memory_space<vmem>>, vector<16x128xf32>
      tpu.vector_store %arg10[%c0_19, %c0_20], %23 {strides = array<i32>} : memref<16x128xf32, #tpu.memory_space<vmem>>, vector<16x128xf32>,
      %c0_21 = arith.constant 0 : index
      %c0_22 = arith.constant 0 : index
      %25 = vector.load %arg3[%c0_21, %c0_22] : memref<1x128xf32, #tpu.memory_space<vmem>>, vector<1x128xf32>
      %26 = arith.mulf %20, %20 : vector<16x128xf32>
      %cst_23 = arith.constant dense<0.000000e+00> : vector<16xf32>
      %27 = vector.multi_reduction <add>, %26, %cst_23 [1] : vector<16x128xf32> to vector<16xf32>
      %28 = vector.shape_cast %27 : vector<16xf32> to vector<16x1xf32>
      %cst_24 = arith.constant 1.280000e+02 : f32
      %29 = vector.broadcast %cst_24 : f32 to vector<16x1xf32>
      %30 = arith.divf %28, %29 : vector<16x1xf32>
      %cst_25 = arith.constant 9.99999997E-7 : f32
      %31 = vector.broadcast %cst_25 : f32 to vector<16x1xf32>
      %32 = arith.addf %30, %31 : vector<16x1xf32>
      %33 = math.rsqrt %32 : vector<16x1xf32>
      %34 = vector.broadcast %33 : vector<16x1xf32> to vector<16x128xf32>
      %35 = arith.mulf %20, %34 : vector<16x128xf32>
      %36 = vector.broadcast %25 : vector<1x128xf32> to vector<16x128xf32>
      %37 = arith.mulf %35, %36 : vector<16x128xf32>
      %38 = arith.truncf %37 : vector<16x128xf32> to vector<16x128xbf16>
      %c0_26 = arith.constant 0 : index
      %c0_27 = arith.constant 0 : index
      %39 = vector.load %arg9[%c0_26, %c0_27] : memref<16x128xbf16, #tpu.memory_space<vmem>>, vector<16x128xbf16>
      tpu.vector_store %arg9[%c0_26, %c0_27], %38 {strides = array<i32>} : memref<16x128xbf16, #tpu.memory_space<vmem>>, vector<16x128xbf16>,
    } else {
    }
    %c0 = arith.constant 0 : index
    %c0_1 = arith.constant 0 : index
    %3 = vector.load %arg9[%c0, %c0_1] : memref<16x128xbf16, #tpu.memory_space<vmem>>, vector<16x128xbf16>
    %c0_2 = arith.constant 0 : index
    %c0_3 = arith.constant 0 : index
    %4 = vector.load %arg4[%c0_2, %c0_3] : memref<128x256xbf16, #tpu.memory_space<vmem>>, vector<128x256xbf16>
    %cst = arith.constant dense<0.000000e+00> : vector<16x256xf32>
    %5 = tpu.matmul %3, %4, %cst {dimension_numbers = #tpu.dot_dimension_numbers<[1], [0], [0], [1], [0, 0, 1, 1], [], []>} : vector<16x128xbf16>, vector<128x256xbf16>, vector<16x256xf32> -> vector<16x256xf32>
    %c0_4 = arith.constant 0 : index
    %c0_5 = arith.constant 0 : index
    %6 = vector.load %arg5[%c0_4, %c0_5] : memref<1x256xf32, #tpu.memory_space<vmem>>, vector<1x256xf32>
    %7 = vector.broadcast %6 : vector<1x256xf32> to vector<16x256xf32>
    %8 = arith.addf %5, %7 : vector<16x256xf32>
    %cst_6 = arith.constant 0.000000e+00 : f32
    %9 = vector.broadcast %cst_6 : f32 to vector<16x256xf32>
    %10 = arith.maximumf %8, %9 : vector<16x256xf32>
    %c0_7 = arith.constant 0 : index
    %c0_8 = arith.constant 0 : index
    %11 = vector.load %arg10[%c0_7, %c0_8] : memref<16x128xf32, #tpu.memory_space<vmem>>, vector<16x128xf32>
    %12 = arith.truncf %10 : vector<16x256xf32> to vector<16x256xbf16>
    %c0_9 = arith.constant 0 : index
    %c0_10 = arith.constant 0 : index
    %13 = vector.load %arg6[%c0_9, %c0_10] : memref<256x128xbf16, #tpu.memory_space<vmem>>, vector<256x128xbf16>
    %cst_11 = arith.constant dense<0.000000e+00> : vector<16x128xf32>
    %14 = tpu.matmul %12, %13, %cst_11 {dimension_numbers = #tpu.dot_dimension_numbers<[1], [0], [0], [1], [0, 0, 1, 1], [], []>} : vector<16x256xbf16>, vector<256x128xbf16>, vector<16x128xf32> -> vector<16x128xf32>
    %15 = arith.addf %11, %14 : vector<16x128xf32>
    %c0_12 = arith.constant 0 : index
    %c0_13 = arith.constant 0 : index
    %16 = vector.load %arg10[%c0_12, %c0_13] : memref<16x128xf32, #tpu.memory_space<vmem>>, vector<16x128xf32>
    tpu.vector_store %arg10[%c0_12, %c0_13], %15 {strides = array<i32>} : memref<16x128xf32, #tpu.memory_space<vmem>>, vector<16x128xf32>,
    %c1_i32 = arith.constant 1 : i32
    %17 = arith.cmpi eq, %arg1, %c1_i32 : i32
    %18 = arith.extui %17 : i1 to i32
    %c0_i32_14 = arith.constant 0 : i32
    %19 = arith.cmpi ne, %18, %c0_i32_14 : i32
    scf.if %19 {
      %c0_15 = arith.constant 0 : index
      %c0_16 = arith.constant 0 : index
      %20 = vector.load %arg10[%c0_15, %c0_16] : memref<16x128xf32, #tpu.memory_space<vmem>>, vector<16x128xf32>
      %c0_17 = arith.constant 0 : index
      %c0_18 = arith.constant 0 : index
      %21 = vector.load %arg8[%c0_17, %c0_18] : memref<16x128xf32, #tpu.memory_space<vmem>>, vector<16x128xf32>
      tpu.vector_store %arg8[%c0_17, %c0_18], %20 {strides = array<i32>} : memref<16x128xf32, #tpu.memory_space<vmem>>, vector<16x128xf32>,
    } else {
    }
    return
  }
  func.func @transform_0(%arg0: i32, %arg1: i32) -> (i32, i32) {
    %c0_i32 = arith.constant 0 : i32
    %c0_i32_0 = arith.constant 0 : i32
    return %arg0, %c0_i32 : i32, i32
  }
  func.func @transform_1(%arg0: i32, %arg1: i32) -> (i32, i32) {
    %c0_i32 = arith.constant 0 : i32
    %c0_i32_0 = arith.constant 0 : i32
    %c0_i32_1 = arith.constant 0 : i32
    return %c0_i32, %c0_i32_0 : i32, i32
  }
  func.func @transform_2(%arg0: i32, %arg1: i32) -> (i32, i32) {
    %c0_i32 = arith.constant 0 : i32
    %c0_i32_0 = arith.constant 0 : i32
    return %c0_i32, %arg1 : i32, i32
  }
  func.func @transform_3(%arg0: i32, %arg1: i32) -> (i32, i32) {
    %c0_i32 = arith.constant 0 : i32
    %c0_i32_0 = arith.constant 0 : i32
    return %c0_i32, %arg1 : i32, i32
  }
  func.func @transform_4(%arg0: i32, %arg1: i32) -> (i32, i32) {
    %c0_i32 = arith.constant 0 : i32
    %c0_i32_0 = arith.constant 0 : i32
    return %arg1, %c0_i32 : i32, i32
  }
  func.func @transform_5(%arg0: i32, %arg1: i32) -> (i32, i32) {
    %c0_i32 = arith.constant 0 : i32
    %c0_i32_0 = arith.constant 0 : i32
    %c0_i32_1 = arith.constant 0 : i32
    return %c0_i32, %c0_i32_0 : i32, i32
  }
  func.func @transform_6(%arg0: i32, %arg1: i32) -> (i32, i32) {
    %c0_i32 = arith.constant 0 : i32
    %c0_i32_0 = arith.constant 0 : i32
    return %arg0, %c0_i32 : i32, i32
  }
}

module attributes {stable_mosaic.version = 11 : i64} {
  func.func @lm_head_kernel(%arg0: i32, %arg1: i32, %arg2: memref<16x128xf32, #tpu.memory_space<vmem>>, %arg3: memref<128x128xbf16, #tpu.memory_space<vmem>>, %arg4: memref<16x128xf32, #tpu.memory_space<vmem>>) attributes {dimension_semantics = [#tpu.dimension_semantics<parallel>, #tpu.dimension_semantics<parallel>], iteration_bounds = array<i64: 2, 4>, scalar_prefetch = 0 : i64, scratch_operands = 0 : i64, tpu.core_type = #tpu.core_type<tc>, window_params = [{transform_indices = @transform_0, window_bounds = array<i64: 16, 128>}, {transform_indices = @transform_1, window_bounds = array<i64: 128, 128>}, {transform_indices = @transform_2, window_bounds = array<i64: 16, 128>}]} {
    %c0 = arith.constant 0 : index
    %c0_0 = arith.constant 0 : index
    %0 = vector.load %arg2[%c0, %c0_0] : memref<16x128xf32, #tpu.memory_space<vmem>>, vector<16x128xf32>
    %1 = arith.truncf %0 : vector<16x128xf32> to vector<16x128xbf16>
    %c0_1 = arith.constant 0 : index
    %c0_2 = arith.constant 0 : index
    %2 = vector.load %arg3[%c0_1, %c0_2] : memref<128x128xbf16, #tpu.memory_space<vmem>>, vector<128x128xbf16>
    %cst = arith.constant dense<0.000000e+00> : vector<16x128xf32>
    %3 = tpu.matmul %1, %2, %cst {dimension_numbers = #tpu.dot_dimension_numbers<[1], [0], [0], [1], [0, 0, 1, 1], [], []>} : vector<16x128xbf16>, vector<128x128xbf16>, vector<16x128xf32> -> vector<16x128xf32>
    %c0_3 = arith.constant 0 : index
    %c0_4 = arith.constant 0 : index
    %4 = vector.load %arg4[%c0_3, %c0_4] : memref<16x128xf32, #tpu.memory_space<vmem>>, vector<16x128xf32>
    tpu.vector_store %arg4[%c0_3, %c0_4], %3 {strides = array<i32>} : memref<16x128xf32, #tpu.memory_space<vmem>>, vector<16x128xf32>,
    return
  }
  func.func @transform_0(%arg0: i32, %arg1: i32) -> (i32, i32) {
    %c0_i32 = arith.constant 0 : i32
    %c0_i32_0 = arith.constant 0 : i32
    return %arg1, %c0_i32 : i32, i32
  }
  func.func @transform_1(%arg0: i32, %arg1: i32) -> (i32, i32) {
    %c0_i32 = arith.constant 0 : i32
    %c0_i32_0 = arith.constant 0 : i32
    return %c0_i32, %arg0 : i32, i32
  }
  func.func @transform_2(%arg0: i32, %arg1: i32) -> (i32, i32) {
    %c0_i32 = arith.constant 0 : i32
    return %arg1, %arg0 : i32, i32
  }
}

</mosaic_0001>

<bundles_post_ra>
// kernel: tpu_custom_call.1
= control target key start
LH: loop header
LB: loop body
LE: loop exit
PB: predicated region body
PF: predicated region fallthrough
CT: control target
= control target key end

     0   :  { %7 = vsyncpa [#allocation3], 0  ;;  %s690_s0 = inlined_call_operand.hbm [shape: f32[16,128], index: 0, kind: input, shape index: {}]   ;;  %s691_s1 = inlined_call_operand.hbm [shape: f32[8,128], index: 1, kind: input, shape index: {}]   ;;  %s692_s2 = inlined_call_operand.hbm [shape: f32[16,128], index: 2, kind: output, shape index: {}]  }
   0x1   :  { %9 = vsyncpa [#allocation3 + $0x1], 0 }
   0x2   :  { %10 = vsyncpa [#allocation6], 0 }
   0x3   :  { %11 = vsyncpa [#allocation4], 0 }
   0x4   :  { %13 = vsyncpa [#allocation4 + $0x1], 0  ;;  %s489_s9 = smov 0   ;;  %s491_s10 = smov 0  }
   0x5   :  { %s493_s11 = smov 0   ;;  %s495_s12 = smov 0  }
   0x6 LB: > { %s510_s13 = sadd.s32 4294967295, %s469_s12   ;;  %s270_s14 = sadd.s32 4294967294, %s469_s12   ;;  %s469_s12 = sphi %s495_s12, %s716_s12   ;;  %s465_s11 = sphi %s493_s11, %s715_s11   ;;  %s461_s10 = sphi %s491_s10, %s714_s10   ;;  %s457_s9 = sphi %s489_s9, %s713_s9  }
   0x7   : > { %p39_p0 = scmp.ne.s32.totalorder %s461_s10, %s457_s9  ;;  %p693_p1 = scmp.eq.s32.totalorder %s510_s13, 0 }
   0x8   : > { %p90_p3 = scmp.eq.s32.totalorder %s270_s14, 1  ;;  %p271_p5 = scmp.ge.s32.totalorder %s469_s12, 1 }
   0x9   : > { %p519_p4 = por %p693_p1, %p39_p0  ;;  %p97_p7 = scmp.lt.s32.totalorder %s469_s12, 3 }
   0xa   : > { %p524_p6 = por %p90_p3, %p39_p0  ;;  %s471_s18 = smov [#allocation5]  }
   0xb   : > { %s696_s15 = scalar_select %p519_p4, 1, 0 }
   0xc   : > { %s697_s16 = scalar_select %p524_p6, 1, 0 }
   0xd   : > { %p529_p8 = pnand %p271_p5, %p97_p7  ;;  %s110_s19 = sshll.u32 %s471_s18, 4  ;;  %s111_s19 = int_to_ptr.vmem [resolvable:$true] %s110_s19 }
   0xe   : > { %s537_s20 = sadd.s32 1, %s469_s12   ;;  %s26_s24 = sadd.s32 1, %s465_s11 }
   0xf   : > { %s698_s17 = scalar_select %p529_p8, 1, 0 }
  0x10   : > { %p292_p10 = pneg %p529_p8  ;;  %s23_s22 = ssub.s32 %s469_s12, %s537_s20 }
  0x11   : > { %p547_p12 = scmp.eq.s32.totalorder %s23_s22, 0  ;;  %s341_s27 = scalar_lea.hbm %s691_s1, 128 }
  0x12   : > { %p541_p11 = pnand %p292_p10, %p693_p1  ;;  %p342_p0 = scmp.ne.s32.totalorder %s691_s1, %s341_s27 }
  0x13   : > { %s700_s23 = scalar_select %p547_p12, 1, 0 }
  0x14   : > { %p343_p3 = pneg %p541_p11  ;;  %p348_p10 = scmp.lt.u32.totalorder %s341_s27, %s691_s1 }
  0x16   : > { %p344_p5 = pnand %p343_p3, %p342_p0 }
  0x18   : > { %p345_p7 = pneg %p344_p5 }
  0x1a   : > { %p350_p9 = pnand %p348_p10, %p345_p7 }
  0x1c   : > { %353 = shalt.err (!%p350_p9)
}
  0x1d   : > { %s354_s4 = scalar_lea.vmem %s111_s19, 128  ;;  %p362_p6 = scmp.lt.s32.totalorder %s111_s19, %s111_s19 }
  0x1e   : > { %p355_p1 = scmp.ne.s32.totalorder %s111_s19, %s354_s4  ;;  %p363_p4 = scmp.lt.s32.totalorder %s354_s4, %s354_s4 }
  0x20   : > { %p357_p2 = pnand %p355_p1, %p343_p3  ;;  %p364_p8 = por %p363_p4, %p362_p6 }
  0x22   : > { %p358_p13 = pneg %p357_p2 }
  0x24   : > { %p365_p12 = pnand %p364_p8, %p358_p13 }
  0x26   : > { %368 = shalt.err (!%p365_p12)
}
  0x27   : > { %295 = dma.hbm_to_vmem [thread:$0]  (!%p541_p11), %s691_s1, 128, %s111_s19, [#allocation6]  }
  0x28   : > { %p701_p1 = scmp.ne.s32.totalorder %s700_s23, 0  ;;  %p34_p2 = scmp.eq.s32.totalorder %s469_s12, 0 }
  0x29   : > { %p702_p4 = scmp.ne.s32.totalorder %s465_s11, %s461_s10  ;;  %p703_p6 = scmp.eq.s32.totalorder %s510_s13, 1 }
  0x2a   : > { %s573_s7 = scalar_select %p701_p1, %s465_s11, %s26_s24  }
  0x2b   : > { %p581_p8 = por %p703_p6, %p702_p4  ;;  %p305_p9 = scmp.lt.s32.totalorder %s469_s12, 2 }
  0x2c   : > { %s121_s14 = sand.u32 1, %s465_s11   ;;  %p705_p12 = pmov %p702_p4 }
  0x2d   : > { %s274_s18 = sshll.u32 %s121_s14, 3  ;;  %s275_s21 = sshll.u32 %s469_s12, 7 }
  0x2e   : > { %p35_p13 = por %p34_p2, %p705_p12  ;;  %s594_s19 = scalar_lea.hbm %s690_s0, %s275_s21 }
  0x2f   : > { %s125_s23 = scalar_lea.vmem [#allocation2], %s274_s18  ;;  %s122_s27 = scalar_lea.sflag [#allocation3], %s121_s14 }
  0x30   : > { %s132_s24 = sshll.u32 %s125_s23, 4  ;;  %p596_p11 = pnand %p305_p9, %p35_p13  ;;  %s600_s24 = int_to_ptr.vmem [resolvable:$true] %s132_s24 }
  0x31   : > { %s369_s28 = scalar_lea.hbm %s594_s19, 128  ;;  %s374_s3 = scalar_lea.hbm %s690_s0, 256 }
  0x32   : > { %p370_p0 = scmp.ne.s32.totalorder %s594_s19, %s369_s28  ;;  %p371_p3 = pneg %p596_p11 }
  0x33   : > { %p375_p10 = scmp.lt.u32.totalorder %s594_s19, %s690_s0  ;;  %p376_p1 = scmp.lt.u32.totalorder %s374_s3, %s369_s28 }
  0x34   : > { %p372_p5 = pnand %p371_p3, %p370_p0  ;;  %p378_p4 = scmp.lt.u32.totalorder %s369_s28, %s594_s19 }
  0x35   : > { %p377_p2 = por %p376_p1, %p375_p10 }
  0x36   : > { %p373_p7 = pneg %p372_p5 }
  0x37   : > { %p379_p6 = por %p378_p4, %p377_p2 }
  0x39   : > { %p380_p9 = pnand %p379_p6, %p373_p7 }
  0x3b   : > { %383 = shalt.err (!%p380_p9)
}
  0x3c   : > { %s384_s6 = scalar_lea.vmem %s600_s24, 128  ;;  %s472_s14 = smov [#allocation2]  }
  0x3d   : > { %p385_p12 = scmp.ne.s32.totalorder %s600_s24, %s384_s6  ;;  %s389_s18 = sshll.u32 %s472_s14, 4  ;;  %s390_s18 = int_to_ptr.vmem [resolvable:$false] %s389_s18 }
  0x3e   : > { %s391_s21 = scalar_lea.vmem %s390_s18, 256  ;;  %p392_p5 = scmp.lt.s32.totalorder %s600_s24, %s390_s18 }
  0x3f   : > { %p387_p13 = pnand %p385_p12, %p371_p3  ;;  %p393_p10 = scmp.lt.s32.totalorder %s391_s21, %s384_s6 }
  0x41   : > { %p388_p0 = pneg %p387_p13  ;;  %p394_p1 = por %p393_p10, %p392_p5 }
  0x43   : > { %p395_p2 = pnand %p394_p1, %p388_p0 }
  0x45   : > { %398 = shalt.err (!%p395_p2)
}
  0x46   : > { %299 = dma.hbm_to_vmem [thread:$0]  (!%p596_p11), %s594_s19, 128, %s600_s24, %s122_s27  }
  0x47   : > { %p707_p7 = scmp.ne.s32.totalorder %s698_s17, 0 }
  0x48   : > { %s630_s22 = sand.u32 (!%p707_p7), 1, %s461_s10   ;;  %p708_p3 = scmp.ne.s32.totalorder (!%p707_p7), %s696_s15, 0 }
  0x49   : > { %141 = sbr.rel (%p707_p7) target bundleno = 109 (0x6d), region = 28  ;;  %s277_s25 = sshll.u32 (!%p707_p7), %s630_s22, 3 }
  0x4a   : > { %s144_s23 = scalar_lea.sflag (!%p707_p7), [#allocation3], %s630_s22  ;;  %s147_s28 = scalar_lea.vmem (!%p707_p7), [#allocation2], %s277_s25 }
  0x50   : > { %444 = dma.done.wait (%p708_p3), %s144_s23, 128  }
  0x51   : > { %446 = vsyncadd (%p708_p3), %s144_s23, 4294967168  ;;  %p709_p4 = scmp.eq.s32.totalorder %s510_s13, 0 }
  0x53   : > { %448 = dma.done.wait (%p709_p4), [#allocation6], 128   ;;  %p710_p11 = pmov %p709_p4 }
  0x54   : > { %s171_s17 = scalar_lea.vmem [#allocation7], %s277_s25  ;;  %s281_s24 = sshll.u32 %s510_s13, 7  ;;  %v172_v0 = vld [vmem:[%s147_s28] sm:$0xff]  ;;  %v173_v1 = vld [vmem:[#allocation5] sm:$0xff] }
  0x55   : > { %450 = vsyncadd (%p710_p11), [#allocation6], 4294967168  ;;  %s190_s19 = sshll.u32 %s171_s17, 4  ;;  %v174_v2 = vadd.f32 %v173_v1, %v172_v0  ;;  %s648_s27 = scalar_lea.hbm %s692_s2, %s281_s24  ;;  %s643_s19 = int_to_ptr.vmem [resolvable:$true] %s190_s19 }
  0x56   : > { %s177_s29 = scalar_lea.sflag [#allocation4], %s630_s22  ;;  %s399_s30 = scalar_lea.vmem %s643_s19, 128 }
  0x57   : > { %175 = vst [vmem:[%s171_s17] sm:$0xff] %v174_v2  ;;  %p400_p6 = scmp.ne.s32.totalorder %s643_s19, %s399_s30  ;;  %s473_s13 = smov [#allocation7]  }
  0x58   : > { %s403_s3 = sshll.u32 %s473_s13, 4  ;;  %s404_s3 = int_to_ptr.vmem [resolvable:$false] %s403_s3 }
  0x59   : > { %p401_p9 = pnand %p400_p6, %p581_p8  ;;  %s405_s4 = scalar_lea.vmem %s404_s3, 256 }
  0x5a   : > { %p406_p13 = scmp.lt.s32.totalorder %s643_s19, %s404_s3  ;;  %p407_p0 = scmp.lt.s32.totalorder %s405_s4, %s399_s30 }
  0x5b   : > { %p402_p12 = pneg %p401_p9 }
  0x5c   : > { %p408_p5 = por %p407_p0, %p406_p13 }
  0x5e   : > { %p409_p10 = pnand %p408_p5, %p402_p12 }
  0x60   : > { %412 = shalt.err (!%p409_p10)
}
  0x61   : > { %s413_s5 = scalar_lea.hbm %s648_s27, 128  ;;  %s417_s18 = scalar_lea.hbm %s692_s2, 256 }
  0x62   : > { %p414_p1 = scmp.ne.s32.totalorder %s648_s27, %s413_s5  ;;  %p418_p3 = scmp.lt.u32.totalorder %s648_s27, %s692_s2 }
  0x63   : > { %p419_p4 = scmp.lt.u32.totalorder %s417_s18, %s413_s5  ;;  %p421_p6 = scmp.lt.u32.totalorder %s413_s5, %s648_s27 }
  0x64   : > { %p415_p2 = pnand %p414_p1, %p581_p8 }
  0x65   : > { %p420_p11 = por %p419_p4, %p418_p3 }
  0x66   : > { %p416_p7 = pneg %p415_p2 }
  0x67   : > { %p422_p9 = por %p421_p6, %p420_p11 }
  0x69   : > { %p423_p12 = pnand %p422_p9, %p416_p7 }
  0x6b   : > { %426 = shalt.err (!%p423_p12)
}
  0x6c   : > { %290 = dma.vmem_to_hbm [thread:$0]  (%p581_p8), %s643_s19, 128, %s648_s27, %s177_s29  }
  0x6d PF: > { %s202_s25 = sand.u32 1, %s457_s9   ;;  %p711_p13 = scmp.ne.s32.totalorder %s697_s16, 0 }
  0x6e   : > { %p712_p0 = scmp.ge.s32.totalorder %s469_s12, 2  ;;  %s203_s23 = scalar_lea.sflag [#allocation4], %s202_s25 }
  0x70   : > { %p301_p5 = pnand %p712_p0, %p711_p13 }
  0x72   : > { %452 = dma.done.wait (!%p301_p5), %s203_s23, 128  }
  0x73   : > { %454 = vsyncadd (!%p301_p5), %s203_s23, 4294967168  ;;  %p16_p10 = scmp.ge.s32.totalorder %s537_s20, 4   ;;  %s713_s9 = smov %s461_s10 }
  0x74   : > { %s714_s10 = smov %s465_s11  ;;  %s715_s11 = smov %s573_s7 }
  0x75   : > { %s716_s12 = smov %s537_s20  ;;  %18 = sbr.rel (!%p16_p10) target bundleno = 6 (0x6), region = 77 }
  0x7c   :  { %208 = vsyncpa [#allocation3], 1 }
  0x7d   :  { %210 = vsyncpa [#allocation3 + $0x1], 1 }
  0x7e   :  { %211 = vsyncpa [#allocation6], 1 }
  0x7f   :  { %212 = vsyncpa [#allocation4], 1 }
  0x80   :  { %214 = vsyncpa [#allocation4 + $0x1], 1 }

// kernel: cad_recode_forward.6
= control target key start
LH: loop header
LB: loop body
LE: loop exit
PB: predicated region body
PF: predicated region fallthrough
CT: control target
= control target key end

     0   :  { %s1050_s24 = smov 0   ;;  %s1182_s0 = inlined_call_operand.vmem [shape: f32[64,128], index: 0, kind: input, shape index: {}]   ;;  %s1183_s1 = inlined_call_operand.vmem [shape: f32[1,128], index: 1, kind: input, shape index: {}]   ;;  %s1184_s2 = inlined_call_operand.vmem [shape: bf16[128,128], index: 2, kind: input, shape index: {}]   ;;  %s1185_s3 = inlined_call_operand.vmem [shape: bf16[128,128], index: 3, kind: input, shape index: {}]   ;;  %s1186_s4 = inlined_call_operand.vmem [shape: bf16[128,128], index: 4, kind: input, shape index: {}]   ;;  %s1187_s5 = inlined_call_operand.vmem [shape: bf16[64,128], index: 5, kind: output, shape index: {0}]   ;;  %s1188_s6 = inlined_call_operand.vmem [shape: bf16[64,128], index: 6, kind: output, shape index: {1}]   ;;  %s1189_s7 = inlined_call_operand.vmem [shape: bf16[64,128], index: 7, kind: output, shape index: {2}]  }
   0x1 LB: > { %s808_s25 = sadd.s32 4294967295, %s1006_s24   ;;  %p812_p0 = scmp.ge.s32.totalorder %s1006_s24, 1  ;;  %s1006_s24 = sphi %s1050_s24, %s18_s24  }
   0x2   : > { %p243_p1 = scmp.lt.s32.totalorder %s1006_s24, 5 }
   0x4   : > { %p244_p2 = pnand %p812_p0, %p243_p1 }
   0x5   : > { %s813_s26 = sshll.u32 (!%p244_p2), %s808_s25, 1  ;;  %v1008_v0 = vmov (!%p244_p2), 0.0   ;;  %v972_v1 = vld [vmem:[%s1184_s2] sm:$0xff] (!%p244_p2)   ;;  %v974_v3 = vld [vmem:[%s1184_s2 + $0x8] sm:$0xff] (!%p244_p2)   ;;  %v976_v9 = vld [vmem:[%s1184_s2 + $0x10] sm:$0xff] (!%p244_p2)   ;;  %vm1009_vm0 = vmmov (!%p244_p2), 0  }
   0x6   : > { %247 = sbr.rel (%p244_p2) target bundleno = 435 (0x1b3), region = 40  ;;  %p286_p3 = scmp.lt.s32.totalorder (!%p244_p2), %s813_s26, 7  ;;  %902 = vmatprep.subr.bf16.mxu0 (!%p244_p2), %v1008_v0  ;;  %922 = vmatprep.subr.bf16.mxu1 (!%p244_p2), %v1008_v0  ;;  %v973_v2 = vld [vmem:[%s1185_s3] sm:$0xff] (!%p244_p2)   ;;  %v975_v4 = vld [vmem:[%s1185_s3 + $0x8] sm:$0xff] (!%p244_p2)   ;;  %v977_v10 = vld [vmem:[%s1185_s3 + $0x10] sm:$0xff] (!%p244_p2)  }
   0x7   : > { %903 = vmatpush3.bf16.msra.mxu0 (!%p244_p2), %v972_v1  ;;  %923 = vmatpush3.bf16.msra.mxu1 (!%p244_p2), %v973_v2  ;;  %v978_v11 = vld [vmem:[%s1184_s2 + $0x18] sm:$0xff] (!%p244_p2)   ;;  %v980_v13 = vld [vmem:[%s1184_s2 + $0x20] sm:$0xff] (!%p244_p2)   ;;  %v982_v15 = vld [vmem:[%s1184_s2 + $0x28] sm:$0xff] (!%p244_p2)  }
   0x8   : > { %904 = vmatprep.subr.bf16.mxu0 (!%p244_p2), %v1008_v0  ;;  %924 = vmatprep.subr.bf16.mxu1 (!%p244_p2), %v1008_v0  ;;  %v979_v12 = vld [vmem:[%s1185_s3 + $0x18] sm:$0xff] (!%p244_p2)   ;;  %v981_v14 = vld [vmem:[%s1185_s3 + $0x20] sm:$0xff] (!%p244_p2)   ;;  %v983_v16 = vld [vmem:[%s1185_s3 + $0x28] sm:$0xff] (!%p244_p2)  }
   0x9   : > { %918 = vmatprep.mubr.msk.bf16.mxu0 (!%p244_p2), %vm1009_vm0, %v1008_v0  ;;  %938 = vmatprep.mubr.msk.bf16.mxu1 (!%p244_p2), %vm1009_vm0, %v1008_v0  ;;  %v984_v17 = vld [vmem:[%s1184_s2 + $0x30] sm:$0xff] (!%p244_p2)   ;;  %v986_v19 = vld [vmem:[%s1184_s2 + $0x38] sm:$0xff] (!%p244_p2)   ;;  %v821_v30 = vld [vmem:[%s1183_s1] ss:$0 sm:$0xff] (!%p244_p2) }
   0xa   : > { %v985_v18 = vld [vmem:[%s1185_s3 + $0x30] sm:$0xff] (!%p244_p2)   ;;  %v987_v20 = vld [vmem:[%s1185_s3 + $0x38] sm:$0xff] (!%p244_p2)   ;;  %v988_v34 = vld [vmem:[%s1186_s4] sm:$0xff] (!%p244_p2)  }
   0xb   : > { %905 = vmatpush3.bf16.msra.mxu0 (!%p244_p2), %v974_v3  ;;  %925 = vmatpush3.bf16.msra.mxu1 (!%p244_p2), %v975_v4  ;;  %v989_v36 = vld [vmem:[%s1186_s4 + $0x8] sm:$0xff] (!%p244_p2)   ;;  %v990_v37 = vld [vmem:[%s1186_s4 + $0x10] sm:$0xff] (!%p244_p2)   ;;  %v991_v38 = vld [vmem:[%s1186_s4 + $0x18] sm:$0xff] (!%p244_p2)  }
   0xc   : > { %906 = vmatprep.subr.bf16.mxu0 (!%p244_p2), %v1008_v0  ;;  %926 = vmatprep.subr.bf16.mxu1 (!%p244_p2), %v1008_v0  ;;  %v992_v39 = vld [vmem:[%s1186_s4 + $0x20] sm:$0xff] (!%p244_p2)   ;;  %v993_v40 = vld [vmem:[%s1186_s4 + $0x28] sm:$0xff] (!%p244_p2)   ;;  %v994_v41 = vld [vmem:[%s1186_s4 + $0x30] sm:$0xff] (!%p244_p2)  }
   0xd   : > { %s1191_s26 = smov (!%p286_p3, %s813_s26), 7  ;;  %v995_v42 = vld [vmem:[%s1186_s4 + $0x38] sm:$0xff]  }
   0xe   : > { %s814_s12 = sshll.u32 %s1191_s26, 3  ;;  %s816_s16 = sshll.u32 %s1191_s26, 2 }
   0xf   : > { %s289_s15 = scalar_lea.vmem %s1182_s0, %s814_s12  ;;  %907 = vmatpush3.bf16.msra.mxu0 %v976_v9  ;;  %927 = vmatpush3.bf16.msra.mxu1 %v977_v10  ;;  %s301_s19 = scalar_lea.vmem %s1188_s6, %s816_s16 }
  0x10   : > { %v310_v5 = vld [vmem:[%s289_s15] sm:$0xff]  ;;  %v311_v6 = vld [vmem:[%s289_s15 + $0x8] sm:$0xff]  ;;  %908 = vmatprep.subr.bf16.mxu0 %v1008_v0  ;;  %928 = vmatprep.subr.bf16.mxu1 %v1008_v0  ;;  %s295_s22 = scalar_lea.vmem %s1187_s5, %s816_s16  ;;  %s307_s25 = scalar_lea.vmem %s1189_s7, %s816_s16 }
  0x11   : > { %v313_v7 = vmul.f32 %v310_v5, %v310_v5  ;;  %v314_v8 = vmul.f32 %v311_v6, %v311_v6 }
  0x13   : > { %315 = vadd.xlane.f32.xlu0 %v313_v7  ;;  %909 = vmatpush3.bf16.msra.mxu0 %v978_v11 }
  0x14   : > { %929 = vmatpush3.bf16.msra.mxu1 %v979_v12  ;;  %910 = vmatprep.subr.bf16.mxu0 %v1008_v0 }
  0x15   : > { %930 = vmatprep.subr.bf16.mxu1 %v1008_v0 }
  0x17   : > { %317 = vadd.xlane.f32.xlu0 %v314_v8  ;;  %911 = vmatpush3.bf16.msra.mxu0 %v980_v13 }
  0x18   : > { %931 = vmatpush3.bf16.msra.mxu1 %v981_v14  ;;  %912 = vmatprep.subr.bf16.mxu0 %v1008_v0 }
  0x19   : > { %932 = vmatprep.subr.bf16.mxu1 %v1008_v0 }
  0x1b   : > { %913 = vmatpush3.bf16.msra.mxu0 %v982_v15 }
  0x1c   : > { %933 = vmatpush3.bf16.msra.mxu1 %v983_v16  ;;  %914 = vmatprep.subr.bf16.mxu0 %v1008_v0 }
  0x1d   : > { %934 = vmatprep.subr.bf16.mxu1 %v1008_v0 }
  0x1f   : > { %915 = vmatpush3.bf16.msra.mxu0 %v984_v17 }
  0x20   : > { %935 = vmatpush3.bf16.msra.mxu1 %v985_v18  ;;  %916 = vmatprep.subr.bf16.mxu0 %v1008_v0 }
  0x21   : > { %936 = vmatprep.subr.bf16.mxu1 %v1008_v0 }
  0x23   : > { %917 = vmatpush3.bf16.msra.mxu0 %v986_v19 }
  0x24   : > { %937 = vmatpush3.bf16.msra.mxu1 %v987_v20  ;;  %942 = vmatprep.subr.bf16.mxu0 %v1008_v0 }
  0xa0   : > { %v316_v21 = vpop.xlane.xlu0 %315 }
  0xa1   : > { %v320_v22 = vmul.f32 0.0078125, %v316_v21 }
  0xa3   : > { %v322_v23 = vadd.f32 1e-06, %v320_v22 }
  0xa4   : > { %v318_v24 = vpop.xlane.xlu0 %317 }
  0xa5   : > { %996 = vrsqrt.f32 %v322_v23  ;;  %v321_v25 = vmul.f32 0.0078125, %v318_v24 }
  0xa7   : > { %v323_v26 = vadd.f32 1e-06, %v321_v25 }
  0xa9   : > { %998 = vrsqrt.f32 %v323_v26 }
  0xaf   : > { %v997_v27 = vpop.eup %996 }
  0xb0   : > { %v326_v28 = vmul.f32 %v997_v27, %v310_v5 }
  0xb2   : > { %v334_v32 = vmul.f32 %v821_v30, %v326_v28 }
  0xb3   : > { %v999_v29 = vpop.eup %998 }
  0xb4   : > { %v327_v31 = vmul.f32 %v999_v29, %v311_v6 }
  0xb6   : > { %v335_v33 = vmul.f32 %v821_v30, %v327_v31 }
  0xb8   : > { %v336_v35 = vpack.c.bf16 %v335_v33, %v334_v32 }
  0xba   : > { %919 = vmatmul.mubr.bf16.vlgmr.msra.gmra.mrb[0].mxu0 %v336_v35  ;;  %939 = vmatmul.mubr.bf16.vlgmr.msra.gmra.mrb[0].mxu1 %v336_v35 }
  0xbb   : > { %943 = vmatpush3.bf16.msra.mxu0 %v988_v34  ;;  %958 = vmatprep.mubr.msk.bf16.mxu0 %vm1009_vm0, %v1008_v0 }
  0xbc   : > { %944 = vmatprep.subr.bf16.mxu0 %v1008_v0 }
  0xbf   : > { %945 = vmatpush3.bf16.msra.mxu0 %v989_v36 }
  0xc0   : > { %946 = vmatprep.subr.bf16.mxu0 %v1008_v0 }
  0xc3   : > { %947 = vmatpush3.bf16.msra.mxu0 %v990_v37 }
  0xc4   : > { %948 = vmatprep.subr.bf16.mxu0 %v1008_v0 }
  0xc7   : > { %949 = vmatpush3.bf16.msra.mxu0 %v991_v38 }
  0xc8   : > { %950 = vmatprep.subr.bf16.mxu0 %v1008_v0 }
  0xcb   : > { %951 = vmatpush3.bf16.msra.mxu0 %v992_v39 }
  0xcc   : > { %952 = vmatprep.subr.bf16.mxu0 %v1008_v0 }
  0xcf   : > { %953 = vmatpush3.bf16.msra.mxu0 %v993_v40 }
  0xd0   : > { %954 = vmatprep.subr.bf16.mxu0 %v1008_v0 }
  0xd3   : > { %955 = vmatpush3.bf16.msra.mxu0 %v994_v41 }
  0xd4   : > { %956 = vmatprep.subr.bf16.mxu0 %v1008_v0 }
  0xd7   : > { %957 = vmatpush3.bf16.msra.mxu0 %v995_v42 }
  0xda   : > { %959 = vmatmul.mubr.bf16.vlgmr.msra.gmra.mrb[4].mxu0 %v336_v35 }
 0x18d   : > { %v435_v43 = vpop.f32.mrb[0].mxu0  ;;  %v552_v44 = vpop.f32.mrb[0].mxu1 }
 0x18e   : > { %v920_v45 = vpop.f32.mrb[1].mxu0  ;;  %v940_v46 = vpop.f32.mrb[1].mxu1  ;;  %v442_v49 = vmul.f32 0.088388346, %v435_v43 }
 0x18f   : > { %v438_v47 = vpop.f32.mrb[2].mxu0  ;;  %v555_v48 = vpop.f32.mrb[2].mxu1 }
 0x190   : > { %v443_v50 = vmul.f32 0.088388346, %v438_v47  ;;  %v868_v51 = vpack.c.bf16 %v555_v48, %v552_v44  ;;  %v921_v52 = vpop.f32.mrb[3].mxu0  ;;  %v941_v53 = vpop.f32.mrb[3].mxu1 }
 0x192   : > { %v863_v54 = vpack.c.bf16 %v443_v50, %v442_v49  ;;  %869 = vst [vmem:[%s301_s19] sm:$0xff] %v868_v51  }
 0x194   : > { %864 = vst [vmem:[%s295_s22] sm:$0xff] %v863_v54  }
 0x1ad   : > { %v667_v55 = vpop.f32.mrb[4].mxu0 }
 0x1ae   : > { %v960_v56 = vpop.f32.mrb[5].mxu0 }
 0x1af   : > { %v670_v57 = vpop.f32.mrb[6].mxu0 }
 0x1b0   : > { %v873_v58 = vpack.c.bf16 %v670_v57, %v667_v55  ;;  %v961_v59 = vpop.f32.mrb[7].mxu0 }
 0x1b2   : > { %874 = vst [vmem:[%s307_s25] sm:$0xff] %v873_v58  }
 0x1b3 PF: > { %s18_s24 = sadd.s32 1, %s1006_s24  }
 0x1b4   : > { %p15_p4 = scmp.ge.s32.totalorder %s18_s24, 6  }
 0x1b6   :  { %17 = sbr.rel (!%p15_p4) target bundleno = 1 (0x1), region = 94 }

// kernel: cad_recode_forward.5
= control target key start
LH: loop header
LB: loop body
LE: loop exit
PB: predicated region body
PF: predicated region fallthrough
CT: control target
= control target key end

     0   :  { %12 = vsyncpa [#allocation3], 0  ;;  %s1564_s0 = inlined_call_operand.vmem [shape: f32[48,3], index: 0, kind: input, shape index: {}]   ;;  %s1565_s1 = inlined_call_operand.vmem [shape: f32[3,128], index: 1, kind: input, shape index: {}]   ;;  %s1566_s2 = inlined_call_operand.vmem [shape: f32[1,128], index: 2, kind: input, shape index: {}]   ;;  %s1567_s3 = inlined_call_operand.hbm [shape: bf16[128,512], index: 3, kind: input, shape index: {}]   ;;  %s1568_s4 = inlined_call_operand.vmem [shape: f32[1,512], index: 4, kind: input, shape index: {}]   ;;  %s1569_s5 = inlined_call_operand.hbm [shape: bf16[512,128], index: 5, kind: input, shape index: {}]   ;;  %s1570_s6 = inlined_call_operand.vmem [shape: f32[1,128], index: 6, kind: input, shape index: {}]   ;;  %s1571_s7 = inlined_call_operand.vmem [shape: f32[48,128], index: 7, kind: output, shape index: {}]  }
   0x1   :  { %13 = vsyncpa [#allocation5], 0  ;;  %s1434_s24 = smov 0  }
   0x2 LB: > { %s1385_s25 = smov [#allocation2]   ;;  %s1440_s27 = sadd.s32 4294967295, %s1383_s24   ;;  %s1383_s24 = sphi %s1434_s24, %s19_s24  }
   0x3   : > { %s220_s26 = sshll.u32 %s1385_s25, 4  ;;  %p1072_p0 = scmp.ge.s32.totalorder %s1383_s24, 1  ;;  %s221_s26 = int_to_ptr.vmem [resolvable:$true] %s220_s26 }
   0x4   : > { %p202_p1 = scmp.lt.s32.totalorder %s1383_s24, 7  ;;  %p1572_p3 = scmp.eq.s32.totalorder %s1440_s27, 0 }
   0x5   : > { %s1386_s29 = smov [#allocation4]   ;;  %s1313_s11 = scalar_lea.hbm %s1567_s3, 4096 }
   0x6   : > { %p1444_p2 = pnand %p1072_p0, %p202_p1  ;;  %s236_s30 = sshll.u32 %s1386_s29, 4  ;;  %s1457_s30 = int_to_ptr.vmem [resolvable:$true] %s236_s30 }
   0x7   : > { %p1314_p6 = scmp.ne.s32.totalorder %s1567_s3, %s1313_s11  ;;  %p1320_p10 = scmp.lt.u32.totalorder %s1313_s11, %s1567_s3 }
   0x8   : > { %s1574_s28 = scalar_select %p1444_p2, 1, 0 }
   0x9   : > { %p1201_p4 = pneg %p1444_p2 }
   0xb   : > { %p1453_p5 = pnand %p1572_p3, %p1201_p4 }
   0xd   : > { %p1315_p7 = pneg %p1453_p5 }
   0xf   : > { %p1316_p8 = pnand %p1315_p7, %p1314_p6 }
  0x11   : > { %p1317_p9 = pneg %p1316_p8 }
  0x13   : > { %p1322_p11 = pnand %p1320_p10, %p1317_p9 }
  0x15   : > { %1325 = shalt.err (!%p1322_p11)
}
  0x16   : > { %s1326_s16 = scalar_lea.vmem %s221_s26, 4096  ;;  %p1334_p1 = scmp.lt.s32.totalorder %s221_s26, %s221_s26 }
  0x17   : > { %p1327_p12 = scmp.ne.s32.totalorder %s221_s26, %s1326_s16  ;;  %p1335_p4 = scmp.lt.s32.totalorder %s1326_s16, %s1326_s16 }
  0x19   : > { %p1329_p13 = pnand %p1327_p12, %p1315_p7  ;;  %p1336_p3 = por %p1335_p4, %p1334_p1 }
  0x1b   : > { %p1330_p0 = pneg %p1329_p13 }
  0x1d   : > { %p1337_p2 = pnand %p1336_p3, %p1330_p0 }
  0x1f   : > { %1340 = shalt.err (!%p1337_p2)
}
  0x20   : > { %s1387_s17 = smov 256   ;;  %s1388_s18 = smov 16  }
  0x21   : > { %1204 = dma.hbm_to_vmem [thread:$0]  (!%p1453_p5), %s1567_s3, 4096, %s221_s26, [#allocation3], %s1387_s17, %s1387_s17, %s1388_s18  }
  0x22   : > { %s1341_s23 = scalar_lea.hbm %s1569_s5, 4096 }
  0x23   : > { %p1342_p6 = scmp.ne.s32.totalorder %s1569_s5, %s1341_s23  ;;  %p1348_p8 = scmp.lt.u32.totalorder %s1341_s23, %s1569_s5 }
  0x25   : > { %p1344_p2 = pnand %p1342_p6, %p1315_p7 }
  0x27   : > { %p1345_p3 = pneg %p1344_p2 }
  0x29   : > { %p1350_p9 = pnand %p1348_p8, %p1345_p3 }
  0x2b   : > { %1353 = shalt.err (!%p1350_p9)
}
  0x2c   : > { %s1354_s26 = scalar_lea.vmem %s1457_s30, 4096  ;;  %p1362_p13 = scmp.lt.s32.totalorder %s1457_s30, %s1457_s30 }
  0x2d   : > { %p1355_p10 = scmp.ne.s32.totalorder %s1457_s30, %s1354_s26  ;;  %p1363_p0 = scmp.lt.s32.totalorder %s1354_s26, %s1354_s26 }
  0x2f   : > { %p1357_p11 = pnand %p1355_p10, %p1315_p7  ;;  %p1364_p1 = por %p1363_p0, %p1362_p13 }
  0x31   : > { %p1358_p12 = pneg %p1357_p11 }
  0x33   : > { %p1365_p4 = pnand %p1364_p1, %p1358_p12 }
  0x35   : > { %1368 = shalt.err (!%p1365_p4)
}
  0x36   : > { %s1389_s11 = smov 64   ;;  %s1390_s12 = smov 4  }
  0x37   : > { %1207 = dma.hbm_to_vmem [thread:$0]  (!%p1453_p5), %s1569_s5, 4096, %s1457_s30, [#allocation5], %s1389_s11, %s1389_s11, %s1390_s12  }
  0x38   : > { %p1576_p6 = scmp.ne.s32.totalorder %s1574_s28, 0 }
  0x39   : > { %p1577_p7 = scmp.eq.s32.totalorder (!%p1576_p6), %s1440_s27, 0 }
  0x3a   : > { %262 = sbr.rel (%p1576_p6) target bundleno = 661 (0x295), region = 48 }
  0x41   : > { %1374 = dma.done.wait (%p1577_p7), [#allocation3], 4096   ;;  %p1578_p2 = pmov %p1577_p7 }
  0x43   : > { %1376 = vsyncadd (%p1578_p2), [#allocation3], 4294963200  ;;  %p1579_p3 = pmov %p1578_p2 }
  0x44   : > { %p1580_p8 = pmov %p1578_p2 }
  0x45   : > { %1378 = dma.done.wait (%p1579_p3), [#allocation5], 4096  }
  0x46   : > { %1380 = vsyncadd (%p1580_p8), [#allocation5], 4294963200  ;;  %p296_p9 = scmp.lt.s32.totalorder %s1440_s27, 5  ;;  %v1391_v0 = vmov 0   ;;  %v1392_v1 = vmov 2   ;;  %v1393_v9 = vmov 1   ;;  %v312_v38 = vlaneseq }
  0x47   : > { %1229 = vset.pattern.permute.xlu0 %v1391_v0  ;;  %1231 = vset.pattern.permute.xlu1 %v1392_v1  ;;  %v1233_v3 = vld [vmem:[#allocation2 + $0x4] ss:$16 sps:$4 sm:$0xff]   ;;  %v1235_v4 = vld [vmem:[#allocation2 + $0xc] ss:$16 sps:$4 sm:$0xff]   ;;  %v1237_v5 = vld [vmem:[#allocation2] ss:$16 sps:$4 sm:$0xff]  }
  0x48   : > { %s1582_s27 = smov (!%p296_p9, %s1440_s27), 5  ;;  %593 = vmatprep.mubr.bf16.mxu0 %v1391_v0  ;;  %634 = vmatprep.mubr.bf16.mxu1 %v1391_v0  ;;  %v1238_v6 = vld [vmem:[#allocation2 + $0x8] ss:$16 sps:$4 sm:$0xff]   ;;  %v1239_v7 = vld [vmem:[#allocation2 + $0x24] ss:$16 sps:$4 sm:$0xff]   ;;  %v1526_v39 = vshrl.u32 %v312_v38, 7 }
  0x49   : > { %s1079_s28 = sshll.u32 %s1582_s27, 3  ;;  %561 = vmatprep.subr.bf16.mxu0 %v1233_v3  ;;  %602 = vmatprep.subr.bf16.mxu1 %v1235_v4  ;;  %v1241_v8 = vld [vmem:[#allocation2 + $0x2c] ss:$16 sps:$4 sm:$0xff]   ;;  %v1243_v10 = vld [vmem:[#allocation2 + $0x20] ss:$16 sps:$4 sm:$0xff]  }
  0x4a   : > { %s299_s15 = scalar_lea.vmem %s1564_s0, %s1079_s28  ;;  %562 = vmatpush1.bf16.msra.mxu0 %v1237_v5  ;;  %603 = vmatpush1.bf16.msra.mxu1 %v1238_v6  ;;  %v1244_v11 = vld [vmem:[#allocation2 + $0x28] ss:$16 sps:$4 sm:$0xff]   ;;  %v1245_v12 = vld [vmem:[#allocation2 + $0x44] ss:$16 sps:$4 sm:$0xff]   ;;  %v1247_v13 = vld [vmem:[#allocation2 + $0x4c] ss:$16 sps:$4 sm:$0xff]   ;;  %s303_s9 = scalar_lea.vmem %s1571_s7, %s1079_s28 }
  0x4b   : > { %v305_v2 = vld [vmem:[%s299_s15] sm:$0xff]  ;;  %563 = vmatprep.subr.bf16.mxu0 %v1239_v7  ;;  %604 = vmatprep.subr.bf16.mxu1 %v1241_v8  ;;  %v1250_v15 = vld [vmem:[#allocation2 + $0x48] ss:$16 sps:$4 sm:$0xff]   ;;  %v1253_v17 = vld [vmem:[#allocation2 + $0x6c] ss:$16 sps:$4 sm:$0xff]   ;;  %v314_v40 = vsub.s32 0, %v1526_v39 }
  0x4c   : > { %309 = vperm.xlu0 %1229, %v305_v2   ;;  %328 = vperm.xlu1 %1231, %v305_v2   ;;  %v1249_v14 = vld [vmem:[#allocation2 + $0x40] ss:$16 sps:$4 sm:$0xff]   ;;  %v1251_v16 = vld [vmem:[#allocation2 + $0x64] ss:$16 sps:$4 sm:$0xff]   ;;  %v1256_v19 = vld [vmem:[#allocation2 + $0x68] ss:$16 sps:$4 sm:$0xff]  }
  0x4d   : > { %v1255_v18 = vld [vmem:[#allocation2 + $0x60] ss:$16 sps:$4 sm:$0xff]   ;;  %v1257_v20 = vld [vmem:[#allocation2 + $0x84] ss:$16 sps:$4 sm:$0xff]   ;;  %v1259_v21 = vld [vmem:[#allocation2 + $0x8c] ss:$16 sps:$4 sm:$0xff]  }
  0x4e   : > { %564 = vmatpush1.bf16.msra.mxu0 %v1243_v10  ;;  %605 = vmatpush1.bf16.msra.mxu1 %v1244_v11  ;;  %v1261_v22 = vld [vmem:[#allocation2 + $0x80] ss:$16 sps:$4 sm:$0xff]   ;;  %v1262_v23 = vld [vmem:[#allocation2 + $0x88] ss:$16 sps:$4 sm:$0xff]   ;;  %v1263_v24 = vld [vmem:[#allocation2 + $0xa4] ss:$16 sps:$4 sm:$0xff]  }
  0x4f   : > { %565 = vmatprep.subr.bf16.mxu0 %v1245_v12  ;;  %606 = vmatprep.subr.bf16.mxu1 %v1247_v13  ;;  %v1265_v25 = vld [vmem:[#allocation2 + $0xac] ss:$16 sps:$4 sm:$0xff]   ;;  %v1267_v26 = vld [vmem:[#allocation2 + $0xa0] ss:$16 sps:$4 sm:$0xff]   ;;  %v1268_v27 = vld [vmem:[#allocation2 + $0xa8] ss:$16 sps:$4 sm:$0xff]  }
  0x50   : > { %1230 = vset.pattern.permute.xlu0 %v1393_v9  ;;  %v1269_v28 = vld [vmem:[#allocation2 + $0xc4] ss:$16 sps:$4 sm:$0xff]   ;;  %v1271_v29 = vld [vmem:[#allocation2 + $0xcc] ss:$16 sps:$4 sm:$0xff]   ;;  %v1273_v30 = vld [vmem:[#allocation2 + $0xc0] ss:$16 sps:$4 sm:$0xff]  }
  0x51   : > { %318 = vperm.xlu0 %1230, %v305_v2   ;;  %v1274_v31 = vld [vmem:[#allocation2 + $0xc8] ss:$16 sps:$4 sm:$0xff]   ;;  %v1275_v32 = vld [vmem:[#allocation2 + $0xe4] ss:$16 sps:$4 sm:$0xff]   ;;  %v1277_v33 = vld [vmem:[#allocation2 + $0xec] ss:$16 sps:$4 sm:$0xff]  }
  0x52   : > { %566 = vmatpush1.bf16.msra.mxu0 %v1249_v14  ;;  %607 = vmatpush1.bf16.msra.mxu1 %v1250_v15  ;;  %v1279_v34 = vld [vmem:[#allocation2 + $0xe0] ss:$16 sps:$4 sm:$0xff]   ;;  %v1280_v35 = vld [vmem:[#allocation2 + $0xe8] ss:$16 sps:$4 sm:$0xff]   ;;  %v323_v41 = vsub.s32 1, %v1526_v39  ;;  %v333_v42 = vsub.s32 2, %v1526_v39 }
  0x53   : > { %567 = vmatprep.subr.bf16.mxu0 %v1251_v16  ;;  %608 = vmatprep.subr.bf16.mxu1 %v1253_v17  ;;  %v1281_v36 = vld [vmem:[#allocation4 + $0x40] sm:$0xff]   ;;  %v1285_v61 = vld [vmem:[#allocation4 + $0x48] sm:$0xff]   ;;  %v1290_v2 = vld [vmem:[#allocation4 + $0xd0] sm:$0xff]  }
  0x54   : > { %v1282_v37 = vld [vmem:[#allocation4 + $0xc0] sm:$0xff]   ;;  %v1286_v62 = vld [vmem:[#allocation4 + $0xc8] sm:$0xff]   ;;  %v1291_v3 = vld [vmem:[#allocation4 + $0x10] sm:$0xff]  }
  0x55   : > { %1232 = vset.pattern.permute.xlu0 %v1392_v1  ;;  %v306_v43 = vld [vmem:[%s1565_s1] sm:$0x7]  ;;  %v1287_v63 = vld [vmem:[#allocation4 + $0x8] sm:$0xff]   ;;  %v1289_v1 = vld [vmem:[#allocation4 + $0x50] sm:$0xff]  }
  0x56   : > { %568 = vmatpush1.bf16.msra.mxu0 %v1255_v18  ;;  %609 = vmatpush1.bf16.msra.mxu1 %v1256_v19  ;;  %v315_v45 = vrot.slane %v306_v43, %v314_v40  ;;  %v324_v46 = vrot.slane %v306_v43, %v323_v41  ;;  %v334_v47 = vrot.slane %v306_v43, %v333_v42  ;;  %v1081_v54 = vld [vmem:[%s1566_s2] ss:$0 sm:$0xff]  ;;  %v1288_v0 = vld [vmem:[#allocation4 + $0x88] sm:$0xff]   ;;  %v1292_v4 = vld [vmem:[#allocation4 + $0x90] sm:$0xff]  }
  0x57   : > { %569 = vmatprep.subr.bf16.mxu0 %v1257_v20  ;;  %610 = vmatprep.subr.bf16.mxu1 %v1259_v21  ;;  %v1283_v58 = vld [vmem:[#allocation4] sm:$0xff]   ;;  %v1293_v5 = vld [vmem:[#allocation4 + $0x58] sm:$0xff]   ;;  %v1301_v13 = vld [vmem:[#allocation4 + $0x68] sm:$0xff]  }
  0x58   : > { %v1284_v59 = vld [vmem:[#allocation4 + $0x80] sm:$0xff]   ;;  %v1294_v6 = vld [vmem:[#allocation4 + $0xd8] sm:$0xff]   ;;  %v1302_v14 = vld [vmem:[#allocation4 + $0xe8] sm:$0xff]  }
  0x59   : > { %v1295_v7 = vld [vmem:[#allocation4 + $0x18] sm:$0xff]   ;;  %v1297_v9 = vld [vmem:[#allocation4 + $0x60] sm:$0xff]   ;;  %v1303_v15 = vld [vmem:[#allocation4 + $0x28] sm:$0xff]  }
  0x5a   : > { %570 = vmatpush1.bf16.msra.mxu0 %v1261_v22  ;;  %611 = vmatpush1.bf16.msra.mxu1 %v1262_v23  ;;  %v1296_v8 = vld [vmem:[#allocation4 + $0x98] sm:$0xff]   ;;  %v1298_v10 = vld [vmem:[#allocation4 + $0xe0] sm:$0xff]   ;;  %v1304_v16 = vld [vmem:[#allocation4 + $0xa8] sm:$0xff]  }
  0x5b   : > { %571 = vmatprep.subr.bf16.mxu0 %v1263_v24  ;;  %612 = vmatprep.subr.bf16.mxu1 %v1265_v25  ;;  %v1299_v11 = vld [vmem:[#allocation4 + $0x20] sm:$0xff]   ;;  %v1305_v17 = vld [vmem:[#allocation4 + $0x70] sm:$0xff]   ;;  %v1309_v21 = vld [vmem:[#allocation4 + $0x78] sm:$0xff]  }
  0x5c   : > { %v1300_v12 = vld [vmem:[#allocation4 + $0xa0] sm:$0xff]   ;;  %v1306_v18 = vld [vmem:[#allocation4 + $0xf0] sm:$0xff]   ;;  %v1310_v22 = vld [vmem:[#allocation4 + $0xf8] sm:$0xff]  }
  0x5d   : > { %v1307_v19 = vld [vmem:[#allocation4 + $0x30] sm:$0xff]   ;;  %v1311_v23 = vld [vmem:[#allocation4 + $0x38] sm:$0xff]   ;;  %v379_v25 = vld [vmem:[%s1568_s4] sm:$0xf] }
  0x5e   : > { %572 = vmatpush1.bf16.msra.mxu0 %v1267_v26  ;;  %613 = vmatpush1.bf16.msra.mxu1 %v1268_v27  ;;  %v1308_v20 = vld [vmem:[#allocation4 + $0xb0] sm:$0xff]   ;;  %v1312_v24 = vld [vmem:[#allocation4 + $0xb8] sm:$0xff]   ;;  %v395_v26 = vsub.s32 3, %v1526_v39  ;;  %v384_v27 = vrot.slane %v379_v25, %v314_v40 }
  0x5f   : > { %573 = vmatprep.subr.bf16.mxu0 %v1269_v28  ;;  %614 = vmatprep.subr.bf16.mxu1 %v1271_v29  ;;  %v392_v28 = vrot.slane %v379_v25, %v333_v42  ;;  %v388_v29 = vrot.slane %v379_v25, %v323_v41 }
  0x62   : > { %574 = vmatpush1.bf16.msra.mxu0 %v1273_v30  ;;  %615 = vmatpush1.bf16.msra.mxu1 %v1274_v31  ;;  %v396_v30 = vrot.slane %v379_v25, %v395_v26 }
  0x63   : > { %575 = vmatprep.subr.bf16.mxu0 %v1275_v32  ;;  %616 = vmatprep.subr.bf16.mxu1 %v1277_v33 }
  0x66   : > { %576 = vmatpush1.bf16.msra.mxu0 %v1279_v34  ;;  %617 = vmatpush1.bf16.msra.mxu1 %v1280_v35 }
  0x67   : > { %1149 = vmatprep.subr.bf16.mxu0 %v1281_v36  ;;  %1171 = vmatprep.subr.bf16.mxu1 %v1282_v37 }
  0xcb   : > { %v310_v44 = vpop.permute.xlu0 %309  ;;  %v329_v48 = vpop.permute.xlu1 %328 }
  0xcc   : > { %v316_v50 = vmul.f32 %v315_v45, %v310_v44  ;;  %v335_v52 = vmul.f32 %v334_v47, %v329_v48 }
  0xd0   : > { %v319_v49 = vpop.permute.xlu0 %318 }
  0xd1   : > { %v325_v51 = vmul.f32 %v324_v46, %v319_v49 }
  0xd3   : > { %v326_v53 = vadd.f32 %v325_v51, %v316_v50 }
  0xd5   : > { %v336_v55 = vadd.f32 %v335_v52, %v326_v53  ;;  %v1114_v53 = vld [vmem:[%s1570_s6] ss:$0 sm:$0xff] }
  0xd7   : > { %v344_v56 = vadd.f32 %v1081_v54, %v336_v55 }
  0xd9   : > { %v345_v57 = vmax.f32 %v344_v56, 0.0 }
  0xdb   : > { %v346_v60 = vpack.c.bf16 %v345_v57, %v345_v57 }
  0xdd   : > { %594 = vmatmul.mubr.bf16.vlgmr.msra.gmra.mrb[0].mxu0 %v346_v60  ;;  %635 = vmatmul.mubr.bf16.vlgmr.msra.gmra.mrb[0].mxu1 %v346_v60 }
  0xde   : > { %1150 = vmatpush3.bf16.msra.mxu0 %v1283_v58  ;;  %1172 = vmatpush3.bf16.msra.mxu1 %v1284_v59 }
  0xdf   : > { %1151 = vmatprep.subr.bf16.mxu0 %v1285_v61  ;;  %1173 = vmatprep.subr.bf16.mxu1 %v1286_v62 }
  0xe2   : > { %1152 = vmatpush3.bf16.msra.mxu0 %v1287_v63  ;;  %1174 = vmatpush3.bf16.msra.mxu1 %v1288_v0 }
  0xe3   : > { %1153 = vmatprep.subr.bf16.mxu0 %v1289_v1  ;;  %1175 = vmatprep.subr.bf16.mxu1 %v1290_v2 }
  0xe6   : > { %1154 = vmatpush3.bf16.msra.mxu0 %v1291_v3  ;;  %1176 = vmatpush3.bf16.msra.mxu1 %v1292_v4 }
  0xe7   : > { %1155 = vmatprep.subr.bf16.mxu0 %v1293_v5  ;;  %1177 = vmatprep.subr.bf16.mxu1 %v1294_v6 }
  0xea   : > { %1156 = vmatpush3.bf16.msra.mxu0 %v1295_v7  ;;  %1178 = vmatpush3.bf16.msra.mxu1 %v1296_v8 }
  0xeb   : > { %1157 = vmatprep.subr.bf16.mxu0 %v1297_v9  ;;  %1179 = vmatprep.subr.bf16.mxu1 %v1298_v10 }
  0xee   : > { %1158 = vmatpush3.bf16.msra.mxu0 %v1299_v11  ;;  %1180 = vmatpush3.bf16.msra.mxu1 %v1300_v12 }
  0xef   : > { %1159 = vmatprep.subr.bf16.mxu0 %v1301_v13  ;;  %1181 = vmatprep.subr.bf16.mxu1 %v1302_v14 }
  0xf2   : > { %1160 = vmatpush3.bf16.msra.mxu0 %v1303_v15  ;;  %1182 = vmatpush3.bf16.msra.mxu1 %v1304_v16 }
  0xf3   : > { %1161 = vmatprep.subr.bf16.mxu0 %v1305_v17  ;;  %1183 = vmatprep.subr.bf16.mxu1 %v1306_v18 }
  0xf6   : > { %1162 = vmatpush3.bf16.msra.mxu0 %v1307_v19  ;;  %1184 = vmatpush3.bf16.msra.mxu1 %v1308_v20 }
  0xf7   : > { %1163 = vmatprep.subr.bf16.mxu0 %v1309_v21  ;;  %1185 = vmatprep.subr.bf16.mxu1 %v1310_v22 }
  0xfa   : > { %1164 = vmatpush3.bf16.msra.mxu0 %v1311_v23  ;;  %1186 = vmatpush3.bf16.msra.mxu1 %v1312_v24 }
 0x1b0   : > { %v595_v31 = vpop.f32.mrb[0].mxu0  ;;  %v636_v32 = vpop.f32.mrb[0].mxu1 }
 0x1b1   : > { %v596_v33 = vadd.f32 %v595_v31, %v384_v27  ;;  %v637_v34 = vadd.f32 %v636_v32, %v392_v28  ;;  %v597_v35 = vpop.f32.mrb[1].mxu0  ;;  %v638_v36 = vpop.f32.mrb[1].mxu1 }
 0x1b2   : > { %v598_v37 = vadd.f32 %v597_v35, %v388_v29  ;;  %v639_v38 = vadd.f32 %v638_v36, %v396_v30  ;;  %v599_v43 = vpop.f32.mrb[2].mxu0  ;;  %v640_v44 = vpop.f32.mrb[2].mxu1 }
 0x1b3   : > { %v643_v45 = vmax.f32 %v596_v33, 0.0  ;;  %v645_v46 = vmax.f32 %v637_v34, 0.0  ;;  %v600_v40 = vpop.f32.mrb[3].mxu0  ;;  %v641_v47 = vpop.f32.mrb[3].mxu1 }
 0x1b4   : > { %v644_v48 = vmax.f32 %v598_v37, 0.0  ;;  %v646_v42 = vmax.f32 %v639_v38, 0.0 }
 0x1b5   : > { %v647_v41 = vpack.c.bf16 %v643_v45, %v643_v45  ;;  %v649_v50 = vpack.c.bf16 %v645_v46, %v645_v46 }
 0x1b6   : > { %v648_v49 = vpack.c.bf16 %v644_v48, %v644_v48  ;;  %v650_v39 = vpack.c.bf16 %v646_v42, %v646_v42 }
 0x1b8   : > { %946 = vmatprep.mubr.bf16.mxu0 %v648_v49  ;;  %986 = vmatprep.mubr.bf16.mxu1 %v650_v39 }
 0x1b9   : > { %947 = vmatmul.mubr.bf16.vlgmr.msra.gmra.mrb[4].mxu0 %v647_v41  ;;  %987 = vmatmul.mubr.bf16.vlgmr.msra.gmra.mrb[4].mxu1 %v649_v50 }
 0x28c   : > { %v1165_v51 = vpop.f32.mrb[4].mxu0  ;;  %v1187_v52 = vpop.f32.mrb[4].mxu1 }
 0x28d   : > { %v1166_v54 = vpop.f32.mrb[5].mxu0  ;;  %v1188_v55 = vpop.f32.mrb[5].mxu1 }
 0x28e   : > { %v1167_v56 = vadd.f32 %v1166_v54, %v1165_v51  ;;  %v1189_v57 = vadd.f32 %v1188_v55, %v1187_v52  ;;  %v1168_v58 = vpop.f32.mrb[6].mxu0  ;;  %v1190_v59 = vpop.f32.mrb[6].mxu1 }
 0x28f   : > { %v1169_v60 = vpop.f32.mrb[7].mxu0  ;;  %v1191_v61 = vpop.f32.mrb[7].mxu1 }
 0x290   : > { %v949_v62 = vadd.f32 %v1167_v56, %v1114_v53 }
 0x292   : > { %v989_v63 = vadd.f32 %v1189_v57, %v949_v62 }
 0x294   : > { %994 = vst [vmem:[%s303_s9] sm:$0xff] %v989_v63 }
 0x295 PF: > { %s19_s24 = sadd.s32 1, %s1383_s24  }
 0x296   : > { %p16_p5 = scmp.ge.s32.totalorder %s19_s24, 8  }
 0x298   :  { %18 = sbr.rel (!%p16_p5) target bundleno = 2 (0x2), region = 87 }
 0x29f   :  { %1014 = vsyncpa [#allocation3], 1 }
 0x2a0   :  { %1016 = vsyncpa [#allocation3 + $0x1], 1 }
 0x2a1   :  { %1017 = vsyncpa [#allocation5], 1 }

// kernel: cad_recode_forward.7
= control target key start
LH: loop header
LB: loop body
LE: loop exit
PB: predicated region body
PF: predicated region fallthrough
CT: control target
= control target key end

     0   :  { %s1354_s18 = smov 0   ;;  %s1356_s19 = smov 0   ;;  %s1506_s0 = inlined_call_operand.vmem [shape: f32[2,32,128], index: 0, kind: input, shape index: {}]   ;;  %s1507_s1 = inlined_call_operand.vmem [shape: bf16[2,32,128], index: 1, kind: input, shape index: {}]   ;;  %s1508_s2 = inlined_call_operand.vmem [shape: bf16[2,32,128], index: 2, kind: input, shape index: {}]   ;;  %s1509_s3 = inlined_call_operand.vmem [shape: bf16[2,32,128], index: 3, kind: input, shape index: {}]   ;;  %s1510_s4 = inlined_call_operand.vmem [shape: bf16[128,128], index: 4, kind: input, shape index: {}]   ;;  %s1511_s5 = inlined_call_operand.vmem [shape: f32[2,32,128], index: 5, kind: output, shape index: {}]  }
   0x1   :  { %1512 = sst [smem:[#allocation7_spill]] %s1506_s0  ;;  %s1358_s20 = smov 0  }
   0x2   :  { %s1360_s21 = smov 0   ;;  %s1362_s22 = smov 0  }
   0x3   :  { %s1364_s23 = smov 0   ;;  %s1366_s24 = smov 0  }
   0x4 LB: > { %s27_s25 = sadd.s32 1, %s1299_s21  ;;  %s30_s26 = sadd.s32 1, %s1303_s22  ;;  %s1311_s24 = sphi %s1366_s24, %s15_s24   ;;  %s1307_s23 = sphi %s1364_s23, %s1523_s23   ;;  %s1303_s22 = sphi %s1362_s22, %s1522_s22   ;;  %s1299_s21 = sphi %s1360_s21, %s1521_s21   ;;  %s1295_s20 = sphi %s1358_s20, %s1520_s20   ;;  %s1291_s19 = sphi %s1356_s19, %s1519_s19   ;;  %s1287_s18 = sphi %s1354_s18, %s1518_s18  }
   0x5   : > { %p28_p0 = scmp.ge.s32.totalorder %s27_s25, 2  ;;  %p1052_p1 = scmp.ge.s32.totalorder %s1311_s24, 1 }
   0x6   : > { %p266_p2 = scmp.lt.s32.totalorder %s1311_s24, 9  ;;  %s34_s27 = sadd.s32 1, %s1307_s23 }
   0x7   : > { %s1525_s25 = smov (%p28_p0, %s27_s25), 0  ;;  %s1527_s26 = smov (!%p28_p0, %s30_s26), %s1303_s22 }
   0x8   : > { %p267_p3 = pnand %p1052_p1, %p266_p2  ;;  %p32_p4 = scmp.ge.s32.totalorder %s1527_s26, 2 }
   0x9   : > { %s1053_s28 = sshll.u32 (!%p267_p3), %s1291_s19, 1  ;;  %p330_p6 = scmp.lt.s32.totalorder (!%p267_p3), %s1295_s20, 1 }
   0xa   : > { %s1529_s26 = smov (%p32_p4, %s1527_s26), 0  ;;  %s1531_s27 = smov (!%p32_p4, %s34_s27), %s1307_s23 }
   0xb   : > { %1513 = sst [smem:[#allocation5_spill]] %s1529_s26  ;;  %p36_p5 = scmp.ge.s32.totalorder %s1531_s27, 2 }
   0xc   : > { %270 = sbr.rel (%p267_p3) target bundleno = 1866 (0x74a), region = 40  ;;  %p332_p7 = scmp.lt.s32.totalorder (!%p267_p3), %s1053_s28, 3 }
   0xd   : > { %s1533_s27 = smov (%p36_p5, %s1531_s27), 0  ;;  %s1059_s29 = sshll.u32 (!%p267_p3), %s1287_s18, 1 }
   0xe   : > { %1514 = sst [smem:[#allocation6_spill]] %s1533_s27  ;;  %p352_p8 = scmp.lt.s32.totalorder (!%p267_p3), %s1059_s29, 3 }
   0xf   : > { %s1515_s0 = sld [smem:[#allocation7_spill]] (!%p267_p3)  ;;  %p1068_p9 = scmp.ne.s32.totalorder (!%p267_p3), %s1287_s18, 0 }
  0x13   : > { %s1535_s20 = smov (!%p330_p6, %s1295_s20), 1  ;;  %s1537_s28 = smov (!%p332_p7, %s1053_s28), 3 }
  0x14   : > { %s1054_s30 = sshll.u32 %s1535_s20, 2  ;;  %s1539_s29 = smov (!%p352_p8, %s1059_s29), 3  ;;  %vm384_vm0 = vcmask (!%p1068_p9), 7168   ;;  %v1313_v0 = vmov (!%p1068_p9), -inf   ;;  %v1314_v1 = vmov (!%p1068_p9), 0.0  }
  0x15   : > { %s335_s6 = sadd.s32 %s1054_s30, %s1537_s28  ;;  %s355_s20 = sadd.s32 %s1054_s30, %s1539_s29  ;;  %385 = vst.msk [vmem:[#allocation2] sm:$0xff] (!%p1068_p9), %vm384_vm0, %v1313_v0  ;;  %386 = vst.msk [vmem:[#allocation2 + $0x8] sm:$0xff] (!%p1068_p9), %vm384_vm0, %v1313_v0 }
  0x16   : > { %s1055_s7 = sshll.u32 %s335_s6, 3  ;;  %s1058_s8 = sshll.u32 %s335_s6, 2  ;;  %387 = vst.msk [vmem:[#allocation3] sm:$0xff] (!%p1068_p9), %vm384_vm0, %v1314_v1  ;;  %388 = vst.msk [vmem:[#allocation3 + $0x8] sm:$0xff] (!%p1068_p9), %vm384_vm0, %v1314_v1 }
  0x17   : > { %s1405_s11 = scalar_lea.vmem %s1515_s0, %s1055_s7  ;;  %s1410_s14 = scalar_lea.vmem %s1507_s1, %s1058_s8  ;;  %389 = vst [vmem:[#allocation4] sm:$0xff] (!%p1068_p9), %v1314_v1  ;;  %390 = vst [vmem:[#allocation4 + $0x8] sm:$0xff] (!%p1068_p9), %v1314_v1 }
  0x18   : > { %s1415_s17 = scalar_lea.vmem %s1511_s5, %s1055_s7  ;;  %s1061_s28 = sshll.u32 %s355_s20, 2 }
  0x19   : > { %s1420_s26 = scalar_lea.vmem %s1508_s2, %s1061_s28  ;;  %s1425_s0 = scalar_lea.vmem %s1509_s3, %s1061_s28 }
  0x1a   : > { %383 = sbr.rel (%p1068_p9) target bundleno = 33 (0x21), region = 44 }
  0x21 PF: > { %p1069_p10 = scmp.ge.s32.totalorder %s1287_s18, %s1291_s19 }
  0x22   : > { %v1220_v2 = vld [vmem:[%s1420_s26] sm:$0xff] (!%p1069_p10)   ;;  %v1315_v3 = vmov (!%p1069_p10), 0.0   ;;  %vm1316_vm1 = vmmov (!%p1069_p10), 0   ;;  %vm456_vm2 = vcmask (!%p1069_p10), 130048   ;;  %v1317_v11 = vmov (!%p1069_p10), 0   ;;  %v455_v15 = vld [vmem:[#allocation2 + $0x8] sm:$0xff] (!%p1069_p10) }
  0x23   : > { %394 = sbr.rel (%p1069_p10) target bundleno = 766 (0x2fe), region = 48  ;;  %1107 = vmatprep.subr.bf16.mxu0 (!%p1069_p10), %v1315_v3  ;;  %1113 = vmatprep.subr.bf16.mxu1 (!%p1069_p10), %v1315_v3  ;;  %v1221_v4 = vld [vmem:[%s1410_s14] sm:$0xff] (!%p1069_p10)   ;;  %vm499_vm3 = vcmask (!%p1069_p10), 7168   ;;  %v487_v36 = vld [vmem:[#allocation3] sm:$0xff] (!%p1069_p10)  ;;  %v488_v39 = vld [vmem:[#allocation3 + $0x8] sm:$0xff] (!%p1069_p10) }
  0x24   : > { %1108 = vmatpush3.bf16.xpose.msra.mxu0 (!%p1069_p10), %v1220_v2  ;;  %1109 = vmatprep.mubr.msk.bf16.mxu0 (!%p1069_p10), %vm1316_vm1, %v1315_v3  ;;  %v454_v12 = vld [vmem:[#allocation2] sm:$0xff] (!%p1069_p10)  ;;  %v503_v46 = vld [vmem:[#allocation4 + $0x8] sm:$0xff] (!%p1069_p10) }
  0x25   : > { %1115 = vmatprep.mubr.msk.bf16.mxu1 (!%p1069_p10), %vm1316_vm1, %v1315_v3  ;;  %1218 = vset.pattern.permute.xlu1 (!%p1069_p10), %v1317_v11  ;;  %v1222_v20 = vld [vmem:[%s1425_s0] sm:$0xff] (!%p1069_p10)  }
  0x26   : > { %1219 = vset.pattern.permute.xlu0 (!%p1069_p10), %v1317_v11  ;;  %1114 = vmatpush3.bf16.msra.mxu1 (!%p1069_p10), %v1222_v20  ;;  %v502_v44 = vld [vmem:[#allocation4] sm:$0xff] (!%p1069_p10) }
  0x2b   : > { %1110 = vmatmul.mubr.bf16.vlgmr.msra.gmra.mrb[0].mxu0 %v1221_v4 }
  0xfe   : > { %v447_v5 = vpop.f32.mrb[0].mxu0 }
  0xff   : > { %v1111_v6 = vpop.f32.mrb[1].mxu0  ;;  %v457_v7 = vsel %vm456_vm2, %v447_v5, -inf }
 0x100   : > { %458 = vmax.xlane.f32.xlu0 %v457_v7  ;;  %v450_v8 = vpop.f32.mrb[2].mxu0 }
 0x101   : > { %v1112_v9 = vpop.f32.mrb[3].mxu0  ;;  %v460_v10 = vsel %vm456_vm2, %v450_v8, -inf }
 0x104   : > { %461 = vmax.xlane.f32.xlu0 %v460_v10 }
 0x18d   : > { %v459_v13 = vpop.xlane.xlu0 %458 }
 0x18e   : > { %v463_v14 = vmax.f32 %v454_v12, %v459_v13 }
 0x190   : > { %v465_v16 = vsub.f32 %v454_v12, %v463_v14  ;;  %571 = vst.msk [vmem:[#allocation2] sm:$0xff] %vm499_vm3, %v463_v14  ;;  %473 = vperm.xlu1 %1218, %v463_v14  }
 0x191   : > { %v462_v17 = vpop.xlane.xlu0 %461 }
 0x192   : > { %v464_v18 = vmax.f32 %v455_v15, %v462_v17  ;;  %v467_v33 = vmul.f32 1.442695, %v465_v16 }
 0x194   : > { %v466_v19 = vsub.f32 %v455_v15, %v464_v18  ;;  %572 = vst.msk [vmem:[#allocation2 + $0x8] sm:$0xff] %vm499_vm3, %v464_v18  ;;  %478 = vperm.xlu1 %1218, %v464_v18  }
 0x196   : > { %v469_v32 = vmul.f32 1.442695, %v466_v19 }
 0x20f   : > { %v474_v21 = vpop.permute.xlu1 %473 }
 0x210   : > { %v481_v22 = vsub.f32 %v447_v5, %v474_v21 }
 0x212   : > { %v483_v23 = vmul.f32 1.442695, %v481_v22 }
 0x213   : > { %v479_v24 = vpop.permute.xlu1 %478 }
 0x214   : > { %1223 = vpow2.f32 %v483_v23  ;;  %v482_v25 = vsub.f32 %v450_v8, %v479_v24 }
 0x216   : > { %v485_v26 = vmul.f32 1.442695, %v482_v25 }
 0x218   : > { %1225 = vpow2.f32 %v485_v26 }
 0x219   : > { %1227 = vpow2.f32 %v469_v32 }
 0x21a   : > { %1229 = vpow2.f32 %v467_v33 }
 0x21e   : > { %v1224_v27 = vpop.eup %1223 }
 0x21f   : > { %v491_v28 = vsel %vm456_vm2, %v1224_v27, 0.0 }
 0x220   : > { %492 = vadd.xlane.f32.xlu0 %v491_v28 }
 0x222   : > { %v1226_v29 = vpop.eup %1225 }
 0x223   : > { %v494_v30 = vsel %vm456_vm2, %v1226_v29, 0.0  ;;  %v516_v31 = vpack.c.bf16 %v1226_v29, %v1224_v27  ;;  %v1228_v34 = vpop.eup %1227 }
 0x224   : > { %495 = vadd.xlane.f32.xlu1 %v494_v30  ;;  %v1230_v35 = vpop.eup %1229  ;;  %v490_v41 = vmul.f32 %v1228_v34, %v488_v39 }
 0x225   : > { %1116 = vmatmul.mubr.msk.bf16.vlgmr.msra.gmra.mrb[0].mxu1 %vm456_vm2, %v516_v31  ;;  %v489_v37 = vmul.f32 %v1230_v35, %v487_v36 }
 0x235   : > { %511 = vperm.xlu1 %1218, %v1228_v34  }
 0x236   : > { %506 = vperm.xlu0 %1219, %v1230_v35  }
 0x2ad   : > { %v493_v38 = vpop.xlane.xlu0 %492 }
 0x2ae   : > { %v497_v40 = vadd.f32 %v493_v38, %v489_v37 }
 0x2b0   : > { %500 = vst.msk [vmem:[#allocation3] sm:$0xff] %vm499_vm3, %v497_v40 }
 0x2b1   : > { %v496_v42 = vpop.xlane.xlu1 %495 }
 0x2b2   : > { %v498_v43 = vadd.f32 %v496_v42, %v490_v41 }
 0x2b4   : > { %501 = vst.msk [vmem:[#allocation3 + $0x8] sm:$0xff] %vm499_vm3, %v498_v43 }
 0x2b5   : > { %v507_v45 = vpop.permute.xlu0 %506  ;;  %v512_v47 = vpop.permute.xlu1 %511 }
 0x2b6   : > { %v514_v48 = vmul.f32 %v507_v45, %v502_v44  ;;  %v515_v50 = vmul.f32 %v512_v47, %v503_v46 }
 0x2f8   : > { %v560_v49 = vpop.f32.mrb[0].mxu1 }
 0x2f9   : > { %v567_v51 = vadd.f32 %v560_v49, %v514_v48  ;;  %v1117_v52 = vpop.f32.mrb[1].mxu1 }
 0x2fa   : > { %v563_v53 = vpop.f32.mrb[2].mxu1 }
 0x2fb   : > { %569 = vst [vmem:[#allocation4] sm:$0xff] %v567_v51  ;;  %v568_v54 = vadd.f32 %v563_v53, %v515_v50  ;;  %v1118_v55 = vpop.f32.mrb[3].mxu1 }
 0x2fd   : > { %570 = vst [vmem:[#allocation4 + $0x8] sm:$0xff] %v568_v54 }
 0x2fe PF: > { %p1074_p11 = scmp.ne.s32.totalorder %s1287_s18, %s1291_s19 }
 0x2ff   : > { %v1233_v56 = vld [vmem:[%s1420_s26] sm:$0xff] (!%p1074_p11)   ;;  %v1318_v57 = vmov (!%p1074_p11), 0.0   ;;  %vm1319_vm4 = vmmov (!%p1074_p11), 0   ;;  %v636_v59 = vlaneseq (!%p1074_p11)  ;;  %vm647_vm6 = vcmask (!%p1074_p11), 130048   ;;  %v646_v11 = vld [vmem:[#allocation2 + $0x8] sm:$0xff] (!%p1074_p11)  ;;  %v678_v32 = vld [vmem:[#allocation3] sm:$0xff] (!%p1074_p11) }
 0x300   : > { %576 = sbr.rel (%p1074_p11) target bundleno = 1500 (0x5dc), region = 52  ;;  %1119 = vmatprep.subr.bf16.mxu0 (!%p1074_p11), %v1318_v57  ;;  %1125 = vmatprep.subr.bf16.mxu1 (!%p1074_p11), %v1318_v57  ;;  %v1234_v58 = vld [vmem:[%s1410_s14] sm:$0xff] (!%p1074_p11)   ;;  %v1320_v7 = vmov (!%p1074_p11), 0   ;;  %vm690_vm8 = vcmask (!%p1074_p11), 7168   ;;  %v679_v35 = vld [vmem:[#allocation3 + $0x8] sm:$0xff] (!%p1074_p11) }
 0x301   : > { %1120 = vmatpush3.bf16.xpose.msra.mxu0 (!%p1074_p11), %v1233_v56  ;;  %1121 = vmatprep.mubr.msk.bf16.mxu0 (!%p1074_p11), %vm1319_vm4, %v1318_v57  ;;  %v637_v60 = vshrl.u32 (!%p1074_p11), %v636_v59, 7  ;;  %v640_v61 = vand.u32 (!%p1074_p11), 127, %v636_v59  ;;  %v645_v8 = vld [vmem:[#allocation2] sm:$0xff] (!%p1074_p11) }
 0x302   : > { %1127 = vmatprep.mubr.msk.bf16.mxu1 (!%p1074_p11), %vm1319_vm4, %v1318_v57  ;;  %1231 = vset.pattern.permute.xlu1 (!%p1074_p11), %v1320_v7  ;;  %v1235_v16 = vld [vmem:[%s1425_s0] sm:$0xff] (!%p1074_p11)  }
 0x303   : > { %v638_v62 = vadd.s32 (!%p1074_p11), 8, %v637_v60  ;;  %vm641_vm5 = vcmp.le.s32.totalorder (!%p1074_p11), %v640_v61, %v637_v60  ;;  %1232 = vset.pattern.permute.xlu0 (!%p1074_p11), %v1320_v7  ;;  %1126 = vmatpush3.bf16.msra.mxu1 (!%p1074_p11), %v1235_v16  ;;  %v693_v40 = vld [vmem:[#allocation4] sm:$0xff] (!%p1074_p11) }
 0x304   : > { %v694_v42 = vld [vmem:[#allocation4 + $0x8] sm:$0xff] (!%p1074_p11) }
 0x305   : > { %vm642_vm7 = vcmp.le.s32.totalorder (!%p1074_p11), %v640_v61, %v638_v62 }
 0x308   : > { %1122 = vmatmul.mubr.bf16.vlgmr.msra.gmra.mrb[0].mxu0 %v1234_v58 }
 0x3db   : > { %v629_v63 = vpop.f32.mrb[0].mxu0 }
 0x3dc   : > { %v643_v0 = vsel %vm641_vm5, %v629_v63, -1e+30  ;;  %v1123_v1 = vpop.f32.mrb[1].mxu0 }
 0x3dd   : > { %v632_v2 = vpop.f32.mrb[2].mxu0  ;;  %v648_v3 = vsel %vm647_vm6, %v643_v0, -inf }
 0x3de   : > { %v644_v4 = vsel %vm642_vm7, %v632_v2, -1e+30  ;;  %649 = vmax.xlane.f32.xlu0 %v648_v3  ;;  %v1124_v5 = vpop.f32.mrb[3].mxu0 }
 0x3df   : > { %v651_v6 = vsel %vm647_vm6, %v644_v4, -inf }
 0x3e2   : > { %652 = vmax.xlane.f32.xlu0 %v651_v6 }
 0x46b   : > { %v650_v9 = vpop.xlane.xlu0 %649 }
 0x46c   : > { %v654_v10 = vmax.f32 %v645_v8, %v650_v9 }
 0x46e   : > { %v656_v12 = vsub.f32 %v645_v8, %v654_v10  ;;  %762 = vst.msk [vmem:[#allocation2] sm:$0xff] %vm690_vm8, %v654_v10  ;;  %664 = vperm.xlu1 %1231, %v654_v10  }
 0x46f   : > { %v653_v13 = vpop.xlane.xlu0 %652 }
 0x470   : > { %v655_v14 = vmax.f32 %v646_v11, %v653_v13  ;;  %v658_v29 = vmul.f32 1.442695, %v656_v12 }
 0x472   : > { %v657_v15 = vsub.f32 %v646_v11, %v655_v14  ;;  %763 = vst.msk [vmem:[#allocation2 + $0x8] sm:$0xff] %vm690_vm8, %v655_v14  ;;  %669 = vperm.xlu1 %1231, %v655_v14  }
 0x474   : > { %v660_v28 = vmul.f32 1.442695, %v657_v15 }
 0x4ed   : > { %v665_v17 = vpop.permute.xlu1 %664 }
 0x4ee   : > { %v672_v18 = vsub.f32 %v643_v0, %v665_v17 }
 0x4f0   : > { %v674_v19 = vmul.f32 1.442695, %v672_v18 }
 0x4f1   : > { %v670_v20 = vpop.permute.xlu1 %669 }
 0x4f2   : > { %1236 = vpow2.f32 %v674_v19  ;;  %v673_v21 = vsub.f32 %v644_v4, %v670_v20 }
 0x4f4   : > { %v676_v22 = vmul.f32 1.442695, %v673_v21 }
 0x4f6   : > { %1238 = vpow2.f32 %v676_v22 }
 0x4f7   : > { %1240 = vpow2.f32 %v660_v28 }
 0x4f8   : > { %1242 = vpow2.f32 %v658_v29 }
 0x4fc   : > { %v1237_v23 = vpop.eup %1236 }
 0x4fd   : > { %v682_v24 = vsel %vm647_vm6, %v1237_v23, 0.0 }
 0x4fe   : > { %683 = vadd.xlane.f32.xlu0 %v682_v24 }
 0x500   : > { %v1239_v25 = vpop.eup %1238 }
 0x501   : > { %v685_v26 = vsel %vm647_vm6, %v1239_v25, 0.0  ;;  %v707_v27 = vpack.c.bf16 %v1239_v25, %v1237_v23  ;;  %v1241_v30 = vpop.eup %1240 }
 0x502   : > { %686 = vadd.xlane.f32.xlu1 %v685_v26  ;;  %v1243_v31 = vpop.eup %1242  ;;  %v681_v37 = vmul.f32 %v1241_v30, %v679_v35 }
 0x503   : > { %1128 = vmatmul.mubr.msk.bf16.vlgmr.msra.gmra.mrb[0].mxu1 %vm647_vm6, %v707_v27  ;;  %v680_v33 = vmul.f32 %v1243_v31, %v678_v32 }
 0x513   : > { %702 = vperm.xlu1 %1231, %v1241_v30  }
 0x514   : > { %697 = vperm.xlu0 %1232, %v1243_v31  }
 0x58b   : > { %v684_v34 = vpop.xlane.xlu0 %683 }
 0x58c   : > { %v688_v36 = vadd.f32 %v684_v34, %v680_v33 }
 0x58e   : > { %691 = vst.msk [vmem:[#allocation3] sm:$0xff] %vm690_vm8, %v688_v36 }
 0x58f   : > { %v687_v38 = vpop.xlane.xlu1 %686 }
 0x590   : > { %v689_v39 = vadd.f32 %v687_v38, %v681_v37 }
 0x592   : > { %692 = vst.msk [vmem:[#allocation3 + $0x8] sm:$0xff] %vm690_vm8, %v689_v39 }
 0x593   : > { %v698_v41 = vpop.permute.xlu0 %697  ;;  %v703_v43 = vpop.permute.xlu1 %702 }
 0x594   : > { %v705_v44 = vmul.f32 %v698_v41, %v693_v40  ;;  %v706_v46 = vmul.f32 %v703_v43, %v694_v42 }
 0x5d6   : > { %v751_v45 = vpop.f32.mrb[0].mxu1 }
 0x5d7   : > { %v758_v47 = vadd.f32 %v751_v45, %v705_v44  ;;  %v1129_v48 = vpop.f32.mrb[1].mxu1 }
 0x5d8   : > { %v754_v49 = vpop.f32.mrb[2].mxu1 }
 0x5d9   : > { %760 = vst [vmem:[#allocation4] sm:$0xff] %v758_v47  ;;  %v759_v50 = vadd.f32 %v754_v49, %v706_v46  ;;  %v1130_v51 = vpop.f32.mrb[3].mxu1 }
 0x5db   : > { %761 = vst [vmem:[#allocation4 + $0x8] sm:$0xff] %v759_v50 }
 0x5dc PF: > { %p1079_p12 = scmp.ne.s32.totalorder %s1287_s18, 1 }
 0x5dd   : > { %v770_v52 = vld [vmem:[#allocation3] sm:$0xff] (!%p1079_p12)  ;;  %v771_v53 = vld [vmem:[#allocation3 + $0x8] sm:$0xff] (!%p1079_p12)  ;;  %v1321_v54 = vmov (!%p1079_p12), 0   ;;  %v1322_v55 = vmov (!%p1079_p12), 0.0   ;;  %v1245_v56 = vld [vmem:[%s1510_s4] sm:$0xff] (!%p1079_p12)   ;;  %vm1323_vm9 = vmmov (!%p1079_p12), 0  }
 0x5de   : > { %767 = sbr.rel (%p1079_p12) target bundleno = 1866 (0x74a), region = 56  ;;  %1244 = vset.pattern.permute.xlu0 (!%p1079_p12), %v1321_v54  ;;  %1253 = vrcp.f32 (!%p1079_p12), %v770_v52  ;;  %1131 = vmatprep.subr.bf16.mxu0 (!%p1079_p12), %v1322_v55  ;;  %v1246_v57 = vld [vmem:[%s1510_s4 + $0x8] sm:$0xff] (!%p1079_p12)   ;;  %v1247_v58 = vld [vmem:[%s1510_s4 + $0x10] sm:$0xff] (!%p1079_p12)   ;;  %v1248_v60 = vld [vmem:[%s1510_s4 + $0x18] sm:$0xff] (!%p1079_p12)  }
 0x5df   : > { %1255 = vrcp.f32 (!%p1079_p12), %v771_v53  ;;  %1132 = vmatpush3.bf16.msra.mxu0 (!%p1079_p12), %v1245_v56  ;;  %v1249_v62 = vld [vmem:[%s1510_s4 + $0x20] sm:$0xff] (!%p1079_p12)   ;;  %v1250_v63 = vld [vmem:[%s1510_s4 + $0x28] sm:$0xff] (!%p1079_p12)   ;;  %1147 = vmatprep.mubr.msk.bf16.mxu0 (!%p1079_p12), %vm1323_vm9, %v1322_v55  ;;  %v1251_v0 = vld [vmem:[%s1510_s4 + $0x30] sm:$0xff] (!%p1079_p12)  }
 0x5e0   : > { %1133 = vmatprep.subr.bf16.mxu0 (!%p1079_p12), %v1322_v55  ;;  %v1252_v1 = vld [vmem:[%s1510_s4 + $0x38] sm:$0xff] (!%p1079_p12)   ;;  %v768_v3 = vld [vmem:[#allocation4] sm:$0xff] (!%p1079_p12)  ;;  %v787_v11 = vld [vmem:[%s1405_s11 + $0x8] sm:$0xff] (!%p1079_p12) }
 0x5e1   : > { %v786_v9 = vld [vmem:[%s1405_s11] sm:$0xff] (!%p1079_p12) }
 0x5e2   : > { %v769_v4 = vld [vmem:[#allocation4 + $0x8] sm:$0xff] (!%p1079_p12) }
 0x5e3   : > { %1134 = vmatpush3.bf16.msra.mxu0 (!%p1079_p12), %v1246_v57 }
 0x5e4   : > { %1135 = vmatprep.subr.bf16.mxu0 (!%p1079_p12), %v1322_v55 }
 0x5e7   : > { %1136 = vmatpush3.bf16.msra.mxu0 %v1247_v58 }
 0x5e8   : > { %v1254_v59 = vpop.eup %1253  ;;  %1137 = vmatprep.subr.bf16.mxu0 %v1322_v55 }
 0x5e9   : > { %776 = vperm.xlu0 %1244, %v1254_v59   ;;  %v1256_v61 = vpop.eup %1255 }
 0x5eb   : > { %1138 = vmatpush3.bf16.msra.mxu0 %v1248_v60 }
 0x5ec   : > { %1139 = vmatprep.subr.bf16.mxu0 %v1322_v55 }
 0x5ed   : > { %781 = vperm.xlu0 %1244, %v1256_v61  }
 0x5ef   : > { %1140 = vmatpush3.bf16.msra.mxu0 %v1249_v62 }
 0x5f0   : > { %1141 = vmatprep.subr.bf16.mxu0 %v1322_v55 }
 0x5f3   : > { %1142 = vmatpush3.bf16.msra.mxu0 %v1250_v63 }
 0x5f4   : > { %1143 = vmatprep.subr.bf16.mxu0 %v1322_v55 }
 0x5f7   : > { %1144 = vmatpush3.bf16.msra.mxu0 %v1251_v0 }
 0x5f8   : > { %1145 = vmatprep.subr.bf16.mxu0 %v1322_v55 }
 0x5fb   : > { %1146 = vmatpush3.bf16.msra.mxu0 %v1252_v1 }
 0x668   : > { %v777_v2 = vpop.permute.xlu0 %776 }
 0x669   : > { %v784_v6 = vmul.f32 %v777_v2, %v768_v3 }
 0x66c   : > { %v782_v5 = vpop.permute.xlu0 %781 }
 0x66d   : > { %v785_v7 = vmul.f32 %v782_v5, %v769_v4 }
 0x66f   : > { %v788_v8 = vpack.c.bf16 %v785_v7, %v784_v6 }
 0x671   : > { %1148 = vmatmul.mubr.bf16.vlgmr.msra.gmra.mrb[0].mxu0 %v788_v8 }
 0x744   : > { %v887_v10 = vpop.f32.mrb[0].mxu0 }
 0x745   : > { %v894_v12 = vadd.f32 %v887_v10, %v786_v9  ;;  %v1149_v13 = vpop.f32.mrb[1].mxu0 }
 0x746   : > { %v890_v14 = vpop.f32.mrb[2].mxu0 }
 0x747   : > { %896 = vst [vmem:[%s1415_s17] sm:$0xff] %v894_v12  ;;  %v895_v15 = vadd.f32 %v890_v14, %v787_v11  ;;  %v1150_v16 = vpop.f32.mrb[3].mxu0 }
 0x749   : > { %897 = vst [vmem:[%s1415_s17 + $0x8] sm:$0xff] %v895_v15 }
 0x74a PF: > { %s15_s24 = sadd.s32 1, %s1311_s24   ;;  %s1516_s6 = sld [smem:[#allocation5_spill]] }
 0x74b   : > { %p12_p13 = scmp.ge.s32.totalorder %s15_s24, 10   ;;  %s1517_s9 = sld [smem:[#allocation6_spill]] }
 0x74c   : > { %s1518_s18 = smov %s1299_s21  ;;  %s1519_s19 = smov %s1303_s22 }
 0x74d   : > { %s1520_s20 = smov %s1307_s23  ;;  %s1521_s21 = smov %s1525_s25 }
 0x74e   :  { %14 = sbr.rel (!%p12_p13) target bundleno = 4 (0x4), region = 95 }
 0x750   : > { %s1522_s22 = smov %s1516_s6 }
 0x751   : > { %s1523_s23 = smov %s1517_s9 }

// kernel: cad_recode_forward.8
= control target key start
LH: loop header
LB: loop body
LE: loop exit
PB: predicated region body
PF: predicated region fallthrough
CT: control target
= control target key end

     0   :  { %s1356_s0 = inlined_call_operand.vmem [shape: f32[64,128], index: 0, kind: input, shape index: {}]   ;;  %s1357_s1 = inlined_call_operand.vmem [shape: f32[1,128], index: 1, kind: input, shape index: {}]   ;;  %s1358_s2 = inlined_call_operand.vmem [shape: bf16[128,512], index: 2, kind: input, shape index: {}]   ;;  %s1359_s3 = inlined_call_operand.vmem [shape: f32[1,512], index: 3, kind: input, shape index: {}]   ;;  %s1360_s4 = inlined_call_operand.vmem [shape: bf16[512,128], index: 4, kind: input, shape index: {}]   ;;  %s1361_s5 = inlined_call_operand.vmem [shape: f32[1,128], index: 5, kind: input, shape index: {}]   ;;  %s1362_s6 = inlined_call_operand.vmem [shape: f32[64,128], index: 6, kind: output, shape index: {}]  }
   0x1   :  { %1363 = sst [smem:[#allocation5_spill]] %s1358_s2 }
   0x2   :  { %s1186_s21 = smov 0   ;;  %s1188_s22 = smov 0  }
   0x3   :  { %s1190_s23 = smov 0   ;;  %s1192_s24 = smov 0  }
   0x4   :  { %s1194_s25 = smov 0   ;;  %s1196_s26 = smov 0  }
   0x5   :  { %s1198_s27 = smov 0  }
   0x6 LB: > { %s25_s28 = sadd.s32 1, %s1140_s25  ;;  %s28_s29 = sadd.s32 1, %s1144_s26  ;;  %s1148_s27 = sphi %s1198_s27, %s16_s27   ;;  %s1144_s26 = sphi %s1196_s26, %s1370_s26   ;;  %s1140_s25 = sphi %s1194_s25, %s1369_s25   ;;  %s1136_s24 = sphi %s1192_s24, %s1368_s24   ;;  %s1132_s23 = sphi %s1190_s23, %s1367_s23   ;;  %s1128_s22 = sphi %s1188_s22, %s1366_s22   ;;  %s1124_s21 = sphi %s1186_s21, %s1365_s21  }
   0x7   : > { %p26_p0 = scmp.ge.s32.totalorder %s25_s28, 2  ;;  %s82_s30 = sadd.s32 1, %s1128_s22 }
   0x8   : > { %p89_p1 = scmp.ne.s32.totalorder %s1128_s22, %s1124_s21  ;;  %p90_p2 = scmp.eq.s32.totalorder %s1148_s27, 0 }
   0x9   : > { %s1372_s28 = smov (%p26_p0, %s25_s28), 0  ;;  %s1374_s29 = smov (!%p26_p0, %s28_s29), %s1144_s26 }
   0xa   : > { %s79_s7 = ssub.s32 %s1140_s25, %s1372_s28  ;;  %p91_p3 = por %p90_p2, %p89_p1 }
   0xb   : > { %p30_p4 = scmp.ge.s32.totalorder %s1374_s29, 4  ;;  %p80_p5 = scmp.eq.s32.totalorder %s79_s7, 0 }
   0xc   : > { %p919_p6 = scmp.ge.s32.totalorder %s1148_s27, 8 }
   0xd   : > { %s1376_s29 = smov (%p30_p4, %s1374_s29), 0 }
   0xe   : > { %s1235_s8 = scalar_select %p80_p5, %s1128_s22, %s82_s30  }
   0xf   : > { %220 = sbr.rel (%p919_p6) target bundleno = 40 (0x28), region = 24 }
  0x16   : > { %232 = sbr.rel (!%p91_p3) target bundleno = 40 (0x28), region = 32  ;;  %s234_s9 = sand.u32 (%p91_p3), 1, %s1128_s22  }
  0x17   : > { %s970_s10 = sshll.u32 (%p91_p3), %s1140_s25, 3  ;;  %s920_s11 = sshll.u32 (%p91_p3), %s234_s9, 7 }
  0x18   : > { %s1364_s2 = sld [smem:[#allocation5_spill]] (%p91_p3)  ;;  %s236_s15 = scalar_lea.vmem (%p91_p3), [#allocation4], %s920_s11 }
  0x1e   : > { %s1243_s14 = scalar_lea.vmem %s1364_s2, %s970_s10 }
  0x1f   : > { %v297_v0 = vld [vmem:[%s1243_s14] sm:$0xff]  ;;  %v299_v1 = vld [vmem:[%s1243_s14 + $0x10] sm:$0xff] }
  0x20   : > { %v301_v2 = vld [vmem:[%s1243_s14 + $0x20] sm:$0xff]  ;;  %298 = vst [vmem:[%s236_s15] sm:$0xff] %v297_v0  ;;  %300 = vst [vmem:[%s236_s15 + $0x8] sm:$0xff] %v299_v1  ;;  %v303_v3 = vld [vmem:[%s1243_s14 + $0x30] sm:$0xff] }
  0x21   : > { %302 = vst [vmem:[%s236_s15 + $0x10] sm:$0xff] %v301_v2  ;;  %v305_v4 = vld [vmem:[%s1243_s14 + $0x40] sm:$0xff]  ;;  %v307_v5 = vld [vmem:[%s1243_s14 + $0x50] sm:$0xff]  ;;  %304 = vst [vmem:[%s236_s15 + $0x18] sm:$0xff] %v303_v3 }
  0x22   : > { %306 = vst [vmem:[%s236_s15 + $0x20] sm:$0xff] %v305_v4  ;;  %308 = vst [vmem:[%s236_s15 + $0x28] sm:$0xff] %v307_v5  ;;  %v309_v6 = vld [vmem:[%s1243_s14 + $0x60] sm:$0xff]  ;;  %v311_v7 = vld [vmem:[%s1243_s14 + $0x70] sm:$0xff] }
  0x23   : > { %v313_v8 = vld [vmem:[%s1243_s14 + $0x80] sm:$0xff]  ;;  %310 = vst [vmem:[%s236_s15 + $0x30] sm:$0xff] %v309_v6  ;;  %312 = vst [vmem:[%s236_s15 + $0x38] sm:$0xff] %v311_v7  ;;  %v315_v9 = vld [vmem:[%s1243_s14 + $0x90] sm:$0xff] }
  0x24   : > { %314 = vst [vmem:[%s236_s15 + $0x40] sm:$0xff] %v313_v8  ;;  %v317_v10 = vld [vmem:[%s1243_s14 + $0xa0] sm:$0xff]  ;;  %v319_v11 = vld [vmem:[%s1243_s14 + $0xb0] sm:$0xff]  ;;  %316 = vst [vmem:[%s236_s15 + $0x48] sm:$0xff] %v315_v9 }
  0x25   : > { %318 = vst [vmem:[%s236_s15 + $0x50] sm:$0xff] %v317_v10  ;;  %320 = vst [vmem:[%s236_s15 + $0x58] sm:$0xff] %v319_v11  ;;  %v321_v12 = vld [vmem:[%s1243_s14 + $0xc0] sm:$0xff]  ;;  %v323_v13 = vld [vmem:[%s1243_s14 + $0xd0] sm:$0xff] }
  0x26   : > { %v325_v14 = vld [vmem:[%s1243_s14 + $0xe0] sm:$0xff]  ;;  %322 = vst [vmem:[%s236_s15 + $0x60] sm:$0xff] %v321_v12  ;;  %324 = vst [vmem:[%s236_s15 + $0x68] sm:$0xff] %v323_v13  ;;  %v327_v15 = vld [vmem:[%s1243_s14 + $0xf0] sm:$0xff] }
  0x27   : > { %326 = vst [vmem:[%s236_s15 + $0x70] sm:$0xff] %v325_v14  ;;  %328 = vst [vmem:[%s236_s15 + $0x78] sm:$0xff] %v327_v15 }
  0x28 PF: > { %p923_p7 = scmp.ge.s32.totalorder %s1148_s27, 1  ;;  %p350_p8 = scmp.lt.s32.totalorder %s1148_s27, 9 }
  0x2a   : > { %p351_p9 = pnand %p923_p7, %p350_p8 }
  0x2b   : > { %s357_s16 = sand.u32 (!%p351_p9), 1, %s1124_s21   ;;  %s925_s17 = sshll.u32 (!%p351_p9), %s1136_s24, 1 }
  0x2c   : > { %354 = sbr.rel (%p351_p9) target bundleno = 708 (0x2c4), region = 78  ;;  %s924_s18 = sshll.u32 (!%p351_p9), %s357_s16, 7 }
  0x2d   : > { %p401_p10 = scmp.lt.s32.totalorder (!%p351_p9), %s925_s17, 7  ;;  %s927_s19 = sshll.u32 (!%p351_p9), %s1132_s23, 1 }
  0x2e   : > { %p408_p11 = scmp.lt.s32.totalorder (!%p351_p9), %s927_s19, 3  ;;  %s928_s20 = sshll.u32 (!%p351_p9), %s1132_s23, 5 }
  0x2f   : > { %p413_p12 = scmp.lt.s32.totalorder (!%p351_p9), %s928_s20, 63  ;;  %s1286_s7 = scalar_lea.vmem (!%p351_p9), [#allocation4], %s924_s18 }
  0x30   : > { %p932_p13 = scmp.ne.s32.totalorder (!%p351_p9), %s1132_s23, 0 }
  0x33   : > { %s1378_s17 = smov (!%p401_p10, %s925_s17), 7  ;;  %s1380_s19 = smov (!%p408_p11, %s927_s19), 3 }
  0x34   : > { %s926_s30 = sshll.u32 %s1378_s17, 3  ;;  %s1382_s20 = smov (!%p413_p12, %s928_s20), 63  ;;  %v933_v17 = vld [vmem:[%s1361_s5] ss:$0 sm:$0xff] (!%p932_p13) }
  0x35   : > { %s404_s10 = scalar_lea.vmem %s1356_s0, %s926_s30  ;;  %s1273_s13 = scalar_lea.vmem %s1362_s6, %s926_s30  ;;  %v934_v32 = vld [vmem:[%s1357_s1] ss:$0 sm:$0xff] (!%p932_p13) }
  0x36   : > { %s410_s14 = scalar_lea.vmem %s1359_s3, %s1380_s19  ;;  %s929_s15 = sshll.u32 %s1382_s20, 2  ;;  %v429_v16 = vld [vmem:[%s404_s10] sm:$0xff] (!%p932_p13)  ;;  %v430_v18 = vld [vmem:[%s404_s10 + $0x8] sm:$0xff] (!%p932_p13) }
  0x37   : > { %s1284_s2 = scalar_lea.vmem %s1360_s4, %s929_s15  ;;  %428 = sbr.rel (%p932_p13) target bundleno = 225 (0xe1), region = 86  ;;  %v443_v19 = vmul.f32 (!%p932_p13), %v429_v16, %v429_v16  ;;  %v438_v20 = vadd.f32 (!%p932_p13), %v933_v17, %v429_v16  ;;  %v439_v21 = vadd.f32 (!%p932_p13), %v933_v17, %v430_v18  ;;  %v444_v22 = vmul.f32 (!%p932_p13), %v430_v18, %v430_v18 }
  0x39   : > { %445 = vadd.xlane.f32.xlu0 (!%p932_p13), %v443_v19  ;;  %440 = vst [vmem:[#allocation3] sm:$0xff] (!%p932_p13), %v438_v20  ;;  %441 = vst [vmem:[#allocation3 + $0x8] sm:$0xff] (!%p932_p13), %v439_v21 }
  0x3d   : > { %447 = vadd.xlane.f32.xlu0 (!%p932_p13), %v444_v22 }
  0xc6   : > { %v446_v23 = vpop.xlane.xlu0 %445 }
  0xc7   : > { %v450_v24 = vmul.f32 0.0078125, %v446_v23 }
  0xc9   : > { %v452_v25 = vadd.f32 1e-06, %v450_v24 }
  0xca   : > { %v448_v26 = vpop.xlane.xlu0 %447 }
  0xcb   : > { %1050 = vrsqrt.f32 %v452_v25  ;;  %v451_v27 = vmul.f32 0.0078125, %v448_v26 }
  0xcd   : > { %v453_v28 = vadd.f32 1e-06, %v451_v27 }
  0xcf   : > { %1052 = vrsqrt.f32 %v453_v28 }
  0xd5   : > { %v1051_v29 = vpop.eup %1050 }
  0xd6   : > { %v456_v30 = vmul.f32 %v1051_v29, %v429_v16 }
  0xd8   : > { %v464_v34 = vmul.f32 %v934_v32, %v456_v30 }
  0xd9   : > { %v1053_v31 = vpop.eup %1052 }
  0xda   : > { %v457_v33 = vmul.f32 %v1053_v31, %v430_v18 }
  0xdc   : > { %v465_v35 = vmul.f32 %v934_v32, %v457_v33 }
  0xde   : > { %v466_v36 = vpack.c.bf16 %v465_v35, %v464_v34 }
  0xe0   : > { %467 = vst [vmem:[#allocation2] sm:$0xff] %v466_v36 }
  0xe1 PF: > { %v1054_v37 = vld [vmem:[%s1286_s7 + $0x4] ss:$8 sps:$4 sm:$0xff]   ;;  %v1056_v38 = vld [vmem:[%s1286_s7] ss:$8 sps:$4 sm:$0xff]   ;;  %v1150_v39 = vmov 0   ;;  %v1080_v50 = vld [vmem:[%s1284_s2 + $0x48] sm:$0xff]   ;;  %v487_v7 = vlaneseq }
  0xe2   : > { %609 = vmatprep.mubr.bf16.mxu0 %v1150_v39  ;;  %577 = vmatprep.subr.bf16.mxu0 %v1054_v37  ;;  %v1057_v40 = vld [vmem:[%s1286_s7 + $0x14] ss:$8 sps:$4 sm:$0xff]   ;;  %v1059_v41 = vld [vmem:[%s1286_s7 + $0x10] ss:$8 sps:$4 sm:$0xff]   ;;  %v1060_v42 = vld [vmem:[%s1286_s7 + $0x24] ss:$8 sps:$4 sm:$0xff]  }
  0xe3   : > { %578 = vmatpush1.bf16.msra.mxu0 %v1056_v38  ;;  %v1062_v43 = vld [vmem:[%s1286_s7 + $0x20] ss:$8 sps:$4 sm:$0xff]   ;;  %v1063_v44 = vld [vmem:[%s1286_s7 + $0x34] ss:$8 sps:$4 sm:$0xff]   ;;  %v1065_v45 = vld [vmem:[%s1286_s7 + $0x30] ss:$8 sps:$4 sm:$0xff]  }
  0xe4   : > { %579 = vmatprep.subr.bf16.mxu0 %v1057_v40  ;;  %v1066_v46 = vld [vmem:[%s1286_s7 + $0x44] ss:$8 sps:$4 sm:$0xff]   ;;  %v1068_v49 = vld [vmem:[%s1286_s7 + $0x40] ss:$8 sps:$4 sm:$0xff]   ;;  %v1081_v51 = vld [vmem:[%s1284_s2 + $0x8] sm:$0xff]   ;;  %v488_v8 = vshrl.u32 %v487_v7, 7 }
  0xe5   : > { %v1078_v47 = vld [vmem:[%s1284_s2 + $0x40] sm:$0xff]   ;;  %v1082_v52 = vld [vmem:[%s1284_s2 + $0x50] sm:$0xff]   ;;  %v1084_v56 = vld [vmem:[%s1284_s2 + $0x58] sm:$0xff]   ;;  %p967_p0 = scmp.ne.s32.totalorder %s1132_s23, 1 }
  0xe6   : > { %v1079_v48 = vld [vmem:[%s1284_s2] sm:$0xff]   ;;  %971 = vmatprep.subr.bf16.mxu1 %v1078_v47  ;;  %v1069_v53 = vld [vmem:[%s1286_s7 + $0x54] ss:$8 sps:$4 sm:$0xff]   ;;  %v1071_v54 = vld [vmem:[%s1286_s7 + $0x50] ss:$8 sps:$4 sm:$0xff]   ;;  %v489_v9 = vsub.s32 0, %v488_v8 }
  0xe7   : > { %580 = vmatpush1.bf16.msra.mxu0 %v1059_v41  ;;  %972 = vmatpush3.bf16.msra.mxu1 %v1079_v48  ;;  %v1083_v55 = vld [vmem:[%s1284_s2 + $0x10] sm:$0xff]   ;;  %v1072_v57 = vld [vmem:[%s1286_s7 + $0x64] ss:$8 sps:$4 sm:$0xff]   ;;  %v1074_v58 = vld [vmem:[%s1286_s7 + $0x60] ss:$8 sps:$4 sm:$0xff]   ;;  %v493_v11 = vsub.s32 1, %v488_v8 }
  0xe8   : > { %581 = vmatprep.subr.bf16.mxu0 %v1060_v42  ;;  %973 = vmatprep.subr.bf16.mxu1 %v1080_v50  ;;  %v1085_v59 = vld [vmem:[%s1284_s2 + $0x18] sm:$0xff]   ;;  %v1075_v60 = vld [vmem:[%s1286_s7 + $0x74] ss:$8 sps:$4 sm:$0xff]   ;;  %v1086_v61 = vld [vmem:[%s1284_s2 + $0x60] sm:$0xff]  }
  0xe9   : > { %v1087_v62 = vld [vmem:[%s1284_s2 + $0x20] sm:$0xff]   ;;  %v1077_v63 = vld [vmem:[%s1286_s7 + $0x70] ss:$8 sps:$4 sm:$0xff]   ;;  %v1092_v5 = vld [vmem:[%s1284_s2 + $0x78] sm:$0xff]  }
  0xea   : > { %v1088_v0 = vld [vmem:[%s1284_s2 + $0x68] sm:$0xff]   ;;  %v468_v1 = vld [vmem:[#allocation2] sm:$0xff]  ;;  %v1090_v3 = vld [vmem:[%s1284_s2 + $0x70] sm:$0xff]  }
  0xeb   : > { %582 = vmatpush1.bf16.msra.mxu0 %v1062_v43  ;;  %974 = vmatpush3.bf16.msra.mxu1 %v1081_v51  ;;  %v1089_v2 = vld [vmem:[%s1284_s2 + $0x28] sm:$0xff]   ;;  %v1091_v4 = vld [vmem:[%s1284_s2 + $0x30] sm:$0xff]   ;;  %v1093_v6 = vld [vmem:[%s1284_s2 + $0x38] sm:$0xff]  }
  0xec   : > { %583 = vmatprep.subr.bf16.mxu0 %v1063_v44  ;;  %975 = vmatprep.subr.bf16.mxu1 %v1082_v52  ;;  %v485_v10 = vld [vmem:[%s410_s14] sm:$0x3]  ;;  %v624_v29 = vld [vmem:[#allocation3] sm:$0xff]  ;;  %v625_v33 = vld [vmem:[#allocation3 + $0x8] sm:$0xff] }
  0xed   : > { %v490_v12 = vrot.slane %v485_v10, %v489_v9  ;;  %v494_v13 = vrot.slane %v485_v10, %v493_v11 }
  0xef   : > { %584 = vmatpush1.bf16.msra.mxu0 %v1065_v45  ;;  %976 = vmatpush3.bf16.msra.mxu1 %v1083_v55 }
  0xf0   : > { %585 = vmatprep.subr.bf16.mxu0 %v1066_v46  ;;  %977 = vmatprep.subr.bf16.mxu1 %v1084_v56 }
  0xf3   : > { %586 = vmatpush1.bf16.msra.mxu0 %v1068_v49  ;;  %978 = vmatpush3.bf16.msra.mxu1 %v1085_v59 }
  0xf4   : > { %587 = vmatprep.subr.bf16.mxu0 %v1069_v53  ;;  %979 = vmatprep.subr.bf16.mxu1 %v1086_v61 }
  0xf7   : > { %588 = vmatpush1.bf16.msra.mxu0 %v1071_v54  ;;  %980 = vmatpush3.bf16.msra.mxu1 %v1087_v62 }
  0xf8   : > { %589 = vmatprep.subr.bf16.mxu0 %v1072_v57  ;;  %981 = vmatprep.subr.bf16.mxu1 %v1088_v0 }
  0xfb   : > { %590 = vmatpush1.bf16.msra.mxu0 %v1074_v58  ;;  %982 = vmatpush3.bf16.msra.mxu1 %v1089_v2 }
  0xfc   : > { %591 = vmatprep.subr.bf16.mxu0 %v1075_v60  ;;  %983 = vmatprep.subr.bf16.mxu1 %v1090_v3 }
  0xff   : > { %592 = vmatpush1.bf16.msra.mxu0 %v1077_v63  ;;  %984 = vmatpush3.bf16.msra.mxu1 %v1091_v4 }
 0x100   : > { %985 = vmatprep.subr.bf16.mxu1 %v1092_v5 }
 0x102   : > { %610 = vmatmul.mubr.bf16.vlgmr.msra.gmra.mrb[0].mxu0 %v468_v1 }
 0x103   : > { %986 = vmatpush3.bf16.msra.mxu1 %v1093_v6 }
 0x1d5   : > { %v611_v14 = vpop.f32.mrb[0].mxu0 }
 0x1d6   : > { %v612_v15 = vadd.f32 %v611_v14, %v490_v12  ;;  %v613_v16 = vpop.f32.mrb[1].mxu0 }
 0x1d7   : > { %v614_v17 = vadd.f32 %v613_v16, %v494_v13  ;;  %v615_v18 = vpop.f32.mrb[2].mxu0 }
 0x1d8   : > { %v616_v19 = vadd.f32 %v615_v18, %v490_v12  ;;  %v617_v20 = vpop.f32.mrb[3].mxu0  ;;  %v620_v22 = vmax.f32 %v612_v15, 0.0 }
 0x1d9   : > { %v618_v21 = vadd.f32 %v617_v20, %v494_v13  ;;  %v621_v24 = vmax.f32 %v614_v17, 0.0 }
 0x1da   : > { %v622_v23 = vmax.f32 %v616_v19, 0.0 }
 0x1db   : > { %v623_v25 = vmax.f32 %v618_v21, 0.0 }
 0x1dc   : > { %v626_v26 = vpack.c.bf16 %v622_v23, %v620_v22 }
 0x1dd   : > { %v627_v27 = vpack.c.bf16 %v623_v25, %v621_v24 }
 0x1df   : > { %788 = vmatprep.mubr.bf16.mxu1 %v627_v27 }
 0x1e0   : > { %789 = vmatmul.mubr.bf16.vlgmr.msra.gmra.mrb[0].mxu1 %v626_v26 }
 0x2b3   : > { %v987_v28 = vpop.f32.mrb[0].mxu1 }
 0x2b4   : > { %v988_v30 = vpop.f32.mrb[1].mxu1 }
 0x2b5   : > { %v989_v31 = vadd.f32 %v988_v30, %v987_v28  ;;  %v990_v32 = vpop.f32.mrb[2].mxu1  ;;  %804 = sbr.rel (%p967_p0) target bundleno = 708 (0x2c4), region = 90 }
 0x2b6   : > { %v991_v34 = vpop.f32.mrb[3].mxu1 }
 0x2b7   : > { %v797_v35 = vadd.f32 %v989_v31, %v624_v29  ;;  %v992_v36 = vadd.f32 %v991_v34, %v990_v32 }
 0x2b9   : > { %799 = vst [vmem:[#allocation3] sm:$0xff] %v797_v35  ;;  %v798_v37 = vadd.f32 %v992_v36, %v625_v33 }
 0x2bb   : > { %800 = vst [vmem:[#allocation3 + $0x8] sm:$0xff] %v798_v37 }
 0x2c0   : > { %v805_v38 = vld [vmem:[#allocation3] sm:$0xff] }
 0x2c1   : > { %807 = vst [vmem:[%s1273_s13] sm:$0xff] %v805_v38 }
 0x2c2   : > { %v806_v39 = vld [vmem:[#allocation3 + $0x8] sm:$0xff] }
 0x2c3   : > { %808 = vst [vmem:[%s1273_s13 + $0x8] sm:$0xff] %v806_v39 }
 0x2c4 PF: > { %s16_s27 = sadd.s32 1, %s1148_s27   ;;  %s1365_s21 = smov %s1128_s22 }
 0x2c5   : > { %p13_p1 = scmp.ge.s32.totalorder %s16_s27, 10   ;;  %s1366_s22 = smov %s1235_s8 }
 0x2c6   : > { %s1367_s23 = smov %s1140_s25  ;;  %s1368_s24 = smov %s1144_s26 }
 0x2c7   : > { %s1369_s25 = smov %s1372_s28  ;;  %s1370_s26 = smov %s1376_s29 }
 0x2c8   :  { %15 = sbr.rel (!%p13_p1) target bundleno = 6 (0x6), region = 134 }

// kernel: cad_recode_forward.9
= control target key start
LH: loop header
LB: loop body
LE: loop exit
PB: predicated region body
PF: predicated region fallthrough
CT: control target
= control target key end

     0   :  { %s743_s9 = smov 0   ;;  %s745_s10 = smov 0   ;;  %s889_s0 = inlined_call_operand.vmem [shape: f32[64,128], index: 0, kind: input, shape index: {}]   ;;  %s890_s1 = inlined_call_operand.vmem [shape: bf16[128,256], index: 1, kind: input, shape index: {}]   ;;  %s891_s2 = inlined_call_operand.vmem [shape: f32[64,256], index: 2, kind: output, shape index: {}]  }
   0x1   :  { %s747_s11 = smov 0   ;;  %s749_s12 = smov 0  }
   0x2   :  { %s751_s13 = smov 0   ;;  %s753_s14 = smov 0  }
   0x3   :  { %s755_s15 = smov 0   ;;  %s757_s16 = smov 0  }
   0x4   :  { %s759_s17 = smov 0  }
   0x5 LB: > { %s21_s18 = sadd.s32 1, %s716_s15  ;;  %s24_s19 = sadd.s32 1, %s720_s16  ;;  %s724_s17 = sphi %s759_s17, %s12_s17   ;;  %s720_s16 = sphi %s757_s16, %s901_s16   ;;  %s716_s15 = sphi %s755_s15, %s900_s15   ;;  %s712_s14 = sphi %s753_s14, %s899_s14   ;;  %s708_s13 = sphi %s751_s13, %s898_s13   ;;  %s704_s12 = sphi %s749_s12, %s897_s12   ;;  %s700_s11 = sphi %s747_s11, %s896_s11   ;;  %s696_s10 = sphi %s745_s10, %s895_s10   ;;  %s692_s9 = sphi %s743_s9, %s894_s9  }
   0x6   : > { %p22_p0 = scmp.ge.s32.totalorder %s21_s18, 4  ;;  %p64_p1 = scmp.ne.s32.totalorder %s704_s12, %s700_s11 }
   0x7   : > { %s517_s20 = sadd.s32 4294967295, %s724_s17   ;;  %p65_p2 = scmp.eq.s32.totalorder %s724_s17, 0 }
   0x8   : > { %s903_s18 = smov (%p22_p0, %s21_s18), 0  ;;  %s905_s19 = smov (!%p22_p0, %s24_s19), %s720_s16 }
   0x9   : > { %p26_p3 = scmp.ge.s32.totalorder %s905_s19, 2  ;;  %s80_s21 = ssub.s32 %s716_s15, %s903_s18 }
   0xa   : > { %p799_p4 = por %p65_p2, %p64_p1  ;;  %p95_p5 = scmp.ne.s32.totalorder %s696_s10, %s692_s9 }
   0xb   : > { %s907_s19 = smov (%p26_p3, %s905_s19), 0  ;;  %s57_s23 = sadd.s32 1, %s704_s12 }
   0xc   : > { %p96_p6 = scmp.eq.s32.totalorder %s517_s20, 7  ;;  %s54_s24 = ssub.s32 %s720_s16, %s907_s19 }
   0xd   : > { %s85_s25 = sadd.s32 1, %s696_s10  ;;  %p55_p7 = scmp.eq.s32.totalorder %s54_s24, 0 }
   0xe   : > { %s82_s26 = sor.u32 %s80_s21, %s54_s24  ;;  %p811_p9 = por %p96_p6, %p95_p5 }
   0xf   : > { %p83_p8 = scmp.eq.s32.totalorder %s82_s26, 0  ;;  %p520_p10 = scmp.ge.s32.totalorder %s724_s17, 8 }
  0x10   : > { %s816_s28 = scalar_select %p55_p7, %s704_s12, %s57_s23  }
  0x11   : > { %s819_s29 = scalar_select %p83_p8, %s696_s10, %s85_s25  }
  0x12   : > { %118 = sbr.rel (%p520_p10) target bundleno = 39 (0x27), region = 16 }
  0x19   : > { %130 = sbr.rel (!%p799_p4) target bundleno = 39 (0x27), region = 24  ;;  %s132_s30 = sand.u32 (%p799_p4), 1, %s704_s12  }
  0x1a   : > { %s522_s3 = sshll.u32 (%p799_p4), %s720_s16, 2  ;;  %s521_s4 = sshll.u32 (%p799_p4), %s132_s30, 6 }
  0x1b   : > { %s829_s7 = scalar_lea.vmem (%p799_p4), %s890_s1, %s522_s3  ;;  %s134_s8 = scalar_lea.vmem (%p799_p4), [#allocation2], %s521_s4 }
  0x1c   : > { %v152_v0 = vld [vmem:[%s829_s7] sm:$0xf] (%p799_p4)  ;;  %v154_v1 = vld [vmem:[%s829_s7 + $0x8] sm:$0xf] (%p799_p4)  ;;  %v156_v2 = vld [vmem:[%s829_s7 + $0x10] sm:$0xf] (%p799_p4) }
  0x1d   : > { %153 = vst [vmem:[%s134_s8] sm:$0xf] (%p799_p4), %v152_v0  ;;  %155 = vst [vmem:[%s134_s8 + $0x4] sm:$0xf] (%p799_p4), %v154_v1  ;;  %v158_v3 = vld [vmem:[%s829_s7 + $0x18] sm:$0xf] (%p799_p4) }
  0x1e   : > { %v160_v4 = vld [vmem:[%s829_s7 + $0x20] sm:$0xf] (%p799_p4)  ;;  %157 = vst [vmem:[%s134_s8 + $0x8] sm:$0xf] (%p799_p4), %v156_v2  ;;  %159 = vst [vmem:[%s134_s8 + $0xc] sm:$0xf] (%p799_p4), %v158_v3 }
  0x1f   : > { %161 = vst [vmem:[%s134_s8 + $0x10] sm:$0xf] (%p799_p4), %v160_v4  ;;  %v162_v5 = vld [vmem:[%s829_s7 + $0x28] sm:$0xf] (%p799_p4)  ;;  %v164_v6 = vld [vmem:[%s829_s7 + $0x30] sm:$0xf] (%p799_p4) }
  0x20   : > { %v166_v7 = vld [vmem:[%s829_s7 + $0x38] sm:$0xf]  ;;  %163 = vst [vmem:[%s134_s8 + $0x14] sm:$0xf] %v162_v5  ;;  %165 = vst [vmem:[%s134_s8 + $0x18] sm:$0xf] %v164_v6 }
  0x21   : > { %167 = vst [vmem:[%s134_s8 + $0x1c] sm:$0xf] %v166_v7  ;;  %v168_v8 = vld [vmem:[%s829_s7 + $0x40] sm:$0xf]  ;;  %v170_v9 = vld [vmem:[%s829_s7 + $0x48] sm:$0xf] }
  0x22   : > { %v172_v10 = vld [vmem:[%s829_s7 + $0x50] sm:$0xf]  ;;  %169 = vst [vmem:[%s134_s8 + $0x20] sm:$0xf] %v168_v8  ;;  %171 = vst [vmem:[%s134_s8 + $0x24] sm:$0xf] %v170_v9 }
  0x23   : > { %173 = vst [vmem:[%s134_s8 + $0x28] sm:$0xf] %v172_v10  ;;  %v174_v11 = vld [vmem:[%s829_s7 + $0x58] sm:$0xf]  ;;  %v176_v12 = vld [vmem:[%s829_s7 + $0x60] sm:$0xf] }
  0x24   : > { %v178_v13 = vld [vmem:[%s829_s7 + $0x68] sm:$0xf]  ;;  %175 = vst [vmem:[%s134_s8 + $0x2c] sm:$0xf] %v174_v11  ;;  %177 = vst [vmem:[%s134_s8 + $0x30] sm:$0xf] %v176_v12 }
  0x25   : > { %179 = vst [vmem:[%s134_s8 + $0x34] sm:$0xf] %v178_v13  ;;  %v180_v14 = vld [vmem:[%s829_s7 + $0x70] sm:$0xf]  ;;  %v182_v15 = vld [vmem:[%s829_s7 + $0x78] sm:$0xf] }
  0x26   : > { %181 = vst [vmem:[%s134_s8 + $0x38] sm:$0xf] %v180_v14  ;;  %183 = vst [vmem:[%s134_s8 + $0x3c] sm:$0xf] %v182_v15 }
  0x27 PF: > { %p523_p11 = scmp.ge.s32.totalorder %s724_s17, 1  ;;  %p237_p12 = scmp.lt.s32.totalorder %s724_s17, 9 }
  0x29   : > { %p238_p13 = pnand %p523_p11, %p237_p12 }
  0x2a   : > { %s244_s20 = sand.u32 (!%p238_p13), 1, %s700_s11   ;;  %v726_v16 = vmov (!%p238_p13), 0.0   ;;  %vm727_vm0 = vmmov (!%p238_p13), 0   ;;  %s526_s23 = sshll.u32 (!%p238_p13), %s708_s13, 1 }
  0x2b   : > { %241 = sbr.rel (%p238_p13) target bundleno = 300 (0x12c), region = 65  ;;  %552 = vmatprep.subr.bf16.mxu0 (!%p238_p13), %v726_v16  ;;  %s524_s21 = sshll.u32 (!%p238_p13), %s244_s20, 6  ;;  %568 = vmatprep.mubr.msk.bf16.mxu0 (!%p238_p13), %vm727_vm0, %v726_v16 }
  0x2c   : > { %s246_s22 = scalar_lea.vmem (!%p238_p13), [#allocation2], %s524_s21  ;;  %p270_p0 = scmp.lt.s32.totalorder (!%p238_p13), %s526_s23, 7 }
  0x2d   : > { %v646_v17 = vld [vmem:[%s246_s22] sm:$0xff] (!%p238_p13)   ;;  %v647_v18 = vld [vmem:[%s246_s22 + $0x8] sm:$0xff] (!%p238_p13)   ;;  %v648_v19 = vld [vmem:[%s246_s22 + $0x10] sm:$0xff] (!%p238_p13)   ;;  %s266_s30 = sand.u32 (!%p238_p13), 1, %s692_s9  }
  0x2e   : > { %553 = vmatpush3.bf16.msra.mxu0 (!%p238_p13), %v646_v17  ;;  %v649_v20 = vld [vmem:[%s246_s22 + $0x18] sm:$0xff] (!%p238_p13)   ;;  %v650_v21 = vld [vmem:[%s246_s22 + $0x20] sm:$0xff] (!%p238_p13)   ;;  %v651_v22 = vld [vmem:[%s246_s22 + $0x28] sm:$0xff] (!%p238_p13)   ;;  %s525_s3 = sshll.u32 (!%p238_p13), %s266_s30, 4 }
  0x2f   : > { %554 = vmatprep.subr.bf16.mxu0 (!%p238_p13), %v726_v16  ;;  %v652_v23 = vld [vmem:[%s246_s22 + $0x30] sm:$0xff] (!%p238_p13)   ;;  %v653_v24 = vld [vmem:[%s246_s22 + $0x38] sm:$0xff] (!%p238_p13)   ;;  %s268_s4 = scalar_lea.vmem (!%p238_p13), [#allocation3], %s525_s3 }
  0x32   : > { %555 = vmatpush3.bf16.msra.mxu0 %v647_v18  ;;  %s909_s23 = smov (!%p270_p0, %s526_s23), 7  ;;  %s542_s5 = sshll.u32 (%p811_p9), %s708_s13, 2 }
  0x33   : > { %556 = vmatprep.subr.bf16.mxu0 %v726_v16  ;;  %s527_s11 = sshll.u32 %s909_s23, 3  ;;  %s396_s6 = sadd.s32 (%p811_p9), %s712_s14, %s542_s5 }
  0x34   : > { %s273_s26 = scalar_lea.vmem %s889_s0, %s527_s11  ;;  %s539_s7 = sshll.u32 (%p811_p9), %s396_s6, 3 }
  0x35   : > { %v277_v25 = vld [vmem:[%s273_s26] sm:$0xff]  ;;  %v278_v26 = vld [vmem:[%s273_s26 + $0x8] sm:$0xff]  ;;  %s398_s20 = scalar_lea.vmem (%p811_p9), %s891_s2, %s539_s7 }
  0x36   : > { %557 = vmatpush3.bf16.msra.mxu0 %v648_v19  ;;  %v279_v27 = vpack.c.bf16 %v278_v26, %v277_v25 }
  0x37   : > { %558 = vmatprep.subr.bf16.mxu0 %v726_v16 }
  0x3a   : > { %559 = vmatpush3.bf16.msra.mxu0 %v649_v20 }
  0x3b   : > { %560 = vmatprep.subr.bf16.mxu0 %v726_v16 }
  0x3e   : > { %561 = vmatpush3.bf16.msra.mxu0 %v650_v21 }
  0x3f   : > { %562 = vmatprep.subr.bf16.mxu0 %v726_v16 }
  0x42   : > { %563 = vmatpush3.bf16.msra.mxu0 %v651_v22 }
  0x43   : > { %564 = vmatprep.subr.bf16.mxu0 %v726_v16 }
  0x46   : > { %565 = vmatpush3.bf16.msra.mxu0 %v652_v23 }
  0x47   : > { %566 = vmatprep.subr.bf16.mxu0 %v726_v16 }
  0x4a   : > { %567 = vmatpush3.bf16.msra.mxu0 %v653_v24 }
  0x4d   : > { %569 = vmatmul.mubr.bf16.vlgmr.msra.gmra.mrb[0].mxu0 %v279_v27 }
 0x11d   : > { %393 = sbr.rel (!%p811_p9) target bundleno = 300 (0x12c), region = 73 }
 0x120   : > { %v378_v28 = vpop.f32.mrb[0].mxu0 }
 0x121   : > { %385 = vst [vmem:[%s268_s4] sm:$0xff] %v378_v28  ;;  %v570_v29 = vpop.f32.mrb[1].mxu0 }
 0x122   : > { %v381_v30 = vpop.f32.mrb[2].mxu0 }
 0x123   : > { %386 = vst [vmem:[%s268_s4 + $0x8] sm:$0xff] %v381_v30  ;;  %v571_v31 = vpop.f32.mrb[3].mxu0 }
 0x128   : > { %v428_v32 = vld [vmem:[%s268_s4] sm:$0xff] }
 0x129   : > { %429 = vst [vmem:[%s398_s20] sm:$0xff] %v428_v32 }
 0x12a   : > { %v430_v33 = vld [vmem:[%s268_s4 + $0x8] sm:$0xff] }
 0x12b   : > { %431 = vst [vmem:[%s398_s20 + $0x10] sm:$0xff] %v430_v33 }
 0x12c PF: > { %s12_s17 = sadd.s32 1, %s724_s17   ;;  %s894_s9 = smov %s696_s10 }
 0x12d   : > { %p9_p1 = scmp.ge.s32.totalorder %s12_s17, 10   ;;  %s895_s10 = smov %s819_s29 }
 0x12e   : > { %s896_s11 = smov %s704_s12  ;;  %s897_s12 = smov %s816_s28 }
 0x12f   : > { %s898_s13 = smov %s716_s15  ;;  %s899_s14 = smov %s720_s16 }
 0x130   : > { %s900_s15 = smov %s903_s18  ;;  %s901_s16 = smov %s907_s19 }
 0x131   :  { %11 = sbr.rel (!%p9_p1) target bundleno = 5 (0x5), region = 145 }

</bundles_post_ra>
